<compile_context>
chip_gen: v5e
topology: v5e:2x2
jax: 0.10.0
libtpu: 0.0.40
codegen_flags: <defaults>
</compile_context>

<pallas_src>
import jax
import jax.numpy as jnp
from jax.experimental import pallas as pl
from jax.experimental.pallas import tpu as pltpu

_HIGHEST = jax.lax.Precision.HIGHEST


# ---------------------------------------------------------------------------
# Kernels
# ---------------------------------------------------------------------------

def _se_kernel_flat(x_ref, w1_ref, w2_ref, o_ref):
    """Lane-dense path.  x_ref: (TB, C*L) block; w1: (C, H); w2: (H, C)."""
    C = w1_ref.shape[0]
    CL = x_ref.shape[1]
    L = CL // C
    inv_l = 1.0 / float(L)

    # Build the one-hot pool (C*L, C) and expand (C, C*L) matrices on the VPU
    # each step.  No HBM traffic, no double-buffered VMEM input, and no
    # first-step scratch init (safe under megacore grid sharding).
    r = jax.lax.broadcasted_iota(jnp.int32, (C, CL), 0)
    c = jax.lax.broadcasted_iota(jnp.int32, (C, CL), 1)
    expand = jnp.where((c >= r * L) & (c < (r + 1) * L), 1.0, 0.0)   # (C, C*L)

    pr = jax.lax.broadcasted_iota(jnp.int32, (CL, C), 0)
    pc = jax.lax.broadcasted_iota(jnp.int32, (CL, C), 1)
    pool = jnp.where((pr >= pc * L) & (pr < (pc + 1) * L), inv_l, 0.0)  # (C*L, C)

    # Squeeze: average pool over L as a matmul on the otherwise-idle MXU.
    pooled = jnp.dot(x_ref[...], pool, precision=_HIGHEST,
                     preferred_element_type=jnp.float32)               # (TB, C)
    # Excitation MLP: Linear -> ReLU -> Linear -> Sigmoid (bias-free).
    h = jnp.maximum(
        jnp.dot(pooled, w1_ref[...], precision=_HIGHEST,
                preferred_element_type=jnp.float32), 0.0)
    s = jax.nn.sigmoid(
        jnp.dot(h, w2_ref[...], precision=_HIGHEST,
                preferred_element_type=jnp.float32))                    # (TB, C)
    # Scale: broadcast the per-channel gate over its L positions with the
    # one-hot expand matrix (exact copy at HIGHEST precision), then re-read x
    # so the big tile is not held live in vregs across the pool + MLP.
    gate = jnp.dot(s, expand, precision=_HIGHEST,
                   preferred_element_type=jnp.float32)                  # (TB, C*L)
    o_ref[...] = (x_ref[...] * gate).astype(o_ref.dtype)


def _se_kernel_ncl(x_ref, w1_ref, w2_ref, o_ref):
    """General path.  x_ref: (TB, C, L) block (lane-dense when L % 128 == 0)."""
    pooled = jnp.mean(x_ref[...].astype(jnp.float32), axis=-1)          # (TB, C)
    h = jnp.maximum(
        jnp.dot(pooled, w1_ref[...], precision=_HIGHEST,
                preferred_element_type=jnp.float32), 0.0)
    s = jax.nn.sigmoid(
        jnp.dot(h, w2_ref[...], precision=_HIGHEST,
                preferred_element_type=jnp.float32))                    # (TB, C)
    o_ref[...] = (x_ref[...].astype(jnp.float32) * s[:, :, None]).astype(o_ref.dtype)


# ---------------------------------------------------------------------------
# Wrapper helpers
# ---------------------------------------------------------------------------

def _device_config():
    """Generation-aware VMEM limit, x-tile budget and flat-path channel cap."""
    kind = ""
    try:
        kind = jax.devices()[0].device_kind.lower()
    except Exception:  # defensive: never fail the wrapper on device query
        pass
    if "v7" in kind:
        # 64 MiB physical VMEM per TensorCore: stay well under it.
        return {"vmem_limit": 48 * 1024 * 1024, "tile_budget": 4 << 20, "flat_c_cap": 256}
    if "v5" in kind:
        # v5e MXU (197 TF/s) becomes the bottleneck for the pool/expand
        # matmuls at wide channel counts; keep the flat path for narrow C.
        return {"vmem_limit": 64 * 1024 * 1024, "tile_budget": 8 << 20, "flat_c_cap": 128}
    if "v6" in kind or "v4" in kind:
        return {"vmem_limit": 64 * 1024 * 1024, "tile_budget": 8 << 20, "flat_c_cap": 256}
    # Unknown chip: conservative (also fits a 64 MiB-VMEM part).
    return {"vmem_limit": 48 * 1024 * 1024, "tile_budget": 4 << 20, "flat_c_cap": 128}


def _pick_batch_tile(B, row_bytes, budget_bytes, sublane):
    """Largest batch tile TB that divides B, fits the VMEM tile budget, is
    sublane-aligned (dtype-aware) or the full batch, and leaves >= 4 grid
    steps when possible (then >= 2) so the software pipeline's prologue /
    epilogue DMAs are hidden."""
    divisors = [d for d in range(1, B + 1) if B % d == 0]
    fits = [d for d in divisors if d * row_bytes <= budget_bytes]
    aligned = [d for d in fits if d % sublane == 0 or d == B]
    if not aligned:
        # Row(s) too large for the budget: pick the smallest layout-friendly
        # tile instead of a full-batch block that can blow VMEM.
        # TODO(synk): add C/L tiling (pooled accumulator) for rows that do not
        # fit VMEM at all.
        small = [d for d in divisors if d % sublane == 0]
        return min(small) if small else 1
    for min_steps in (4, 2, 1):
        ok = [d for d in aligned if B // d >= min_steps]
        if ok:
            return max(ok)
    return max(aligned)


# ---------------------------------------------------------------------------
# Wrapper
# ---------------------------------------------------------------------------

def se_block(x, w1, w2):
    """x: (B, C, L); w1: (C, H); w2: (H, C) -> (B, C, L)."""
    B, C, L = x.shape
    H = w1.shape[1]
    assert w1.shape == (C, H) and w2.shape == (H, C)

    cfg = _device_config()
    itemsize = jnp.dtype(x.dtype).itemsize
    sublane = max(8, 32 // itemsize)          # 8 for f32, 16 for bf16, 32 for int8
    row_bytes = C * L * itemsize
    tb = _pick_batch_tile(B, row_bytes, cfg["tile_budget"], sublane)
    grid = (pl.cdiv(B, tb),)

    cparams = pltpu.CompilerParams(
        # Batch tiles are independent.
        # TODO(synk): pltpu.CORE_PARALLEL on v7x for explicit 2-TensorCore split.
        dimension_semantics=("parallel",),
        vmem_limit_bytes=cfg["vmem_limit"],
    )
    weight_bytes = 2 * C * H * 4

    # Lane-dense flat path: when the natural (B, C, L) layout would leave most
    # of the 128 output lanes masked (L % 128 != 0), flatten to (B, C*L) and
    # do the pool / gate-broadcast as matmuls against in-kernel one-hot
    # matrices.  Gated by the VMEM cost of those matrices and (on v5e) by C.
    aux_bytes = 2 * C * (C * L) * 4
    use_flat = (L % 128 != 0) and (C <= cfg["flat_c_cap"]) and (aux_bytes <= (4 << 20))
    # TODO(synk): shapes with L % 128 != 0 that fail the flat gate fall back to
    # the masked-store (TB, C, L) path; an L-padded variant could cover them.

    if use_flat:
        cost = pl.CostEstimate(
            flops=int(4 * B * C * L * C + 4 * B * C * H + 2 * B * C * L),
            transcendentals=int(B * C),
            bytes_accessed=int(2 * B * C * L * itemsize + weight_bytes),
        )
        x_flat = x.reshape(B, C * L)  # free: contiguous metadata-only reshape
        out_flat = pl.pallas_call(
            _se_kernel_flat,
            out_shape=jax.ShapeDtypeStruct((B, C * L), x.dtype),
            grid_spec=pltpu.PrefetchScalarGridSpec(
                num_scalar_prefetch=0,
                grid=grid,
                in_specs=[
                    pl.BlockSpec((tb, C * L), lambda b: (b, 0)),
                    pl.BlockSpec((C, H), lambda b: (0, 0)),
                    pl.BlockSpec((H, C), lambda b: (0, 0)),
                ],
                out_specs=pl.BlockSpec((tb, C * L), lambda b: (b, 0)),
            ),
            compiler_params=cparams,
            cost_estimate=cost,
        )(x_flat, w1, w2)
        return out_flat.reshape(B, C, L)

    # General (B, C, L) path (lane-dense whenever L is a multiple of 128).
    cost = pl.CostEstimate(
        flops=int(3 * B * C * L + 4 * B * C * H),
        transcendentals=int(B * C),
        bytes_accessed=int(2 * B * C * L * itemsize + weight_bytes),
    )
    return pl.pallas_call(
        _se_kernel_ncl,
        out_shape=jax.ShapeDtypeStruct((B, C, L), x.dtype),
        grid_spec=pltpu.PrefetchScalarGridSpec(
            num_scalar_prefetch=0,
            grid=grid,
            in_specs=[
                pl.BlockSpec((tb, C, L), lambda b: (b, 0, 0)),
                pl.BlockSpec((C, H), lambda b: (0, 0)),
                pl.BlockSpec((H, C), lambda b: (0, 0)),
            ],
            out_specs=pl.BlockSpec((tb, C, L), lambda b: (b, 0, 0)),
        ),
        compiler_params=cparams,
        cost_estimate=cost,
    )(x, w1, w2)


# ---------------------------------------------------------------------------
# Reference + self-check
# ---------------------------------------------------------------------------

def se_block_reference(x, w1, w2):
    y = jnp.mean(x.astype(jnp.float32), axis=2)                      # (B, C)
    h = jnp.maximum(jnp.dot(y, w1, precision=_HIGHEST), 0.0)         # (B, H)
    s = jax.nn.sigmoid(jnp.dot(h, w2, precision=_HIGHEST))           # (B, C)
    return (x.astype(jnp.float32) * s[:, :, None]).astype(x.dtype)


if __name__ == "__main__":
    root = jax.random.PRNGKey(0)

    def run_case(case_idx, B, C, L, reduction):
        H = max(C // reduction, 1)
        kx, k1, k2 = jax.random.split(jax.random.fold_in(root, case_idx), 3)
        x = jax.random.normal(kx, (B, C, L), dtype=jnp.float32)
        # Bias-free Linear layers, stored as (in_features, out_features).
        w1 = jax.random.normal(k1, (C, H), dtype=jnp.float32) * (1.0 / jnp.sqrt(C))
        w2 = jax.random.normal(k2, (H, C), dtype=jnp.float32) * (1.0 / jnp.sqrt(H))

        out = jax.block_until_ready(se_block(x, w1, w2))
        ref = se_block_reference(x, w1, w2)
        assert out.shape == (B, C, L)
        assert jnp.allclose(out, ref, atol=2e-5, rtol=2e-5), f"mismatch at {(B, C, L)}"

    # Small lane-sparse L: exercises the flat (MXU pool / broadcast) path.
    run_case(0, B=16, C=64, L=16, reduction=16)
    # L multiple of 128: exercises the natural (TB, C, L) path (already dense).
    run_case(1, B=16, C=64, L=128, reduction=16)
    # Odd-ish small shapes: single grid step, TB == B < 8 (full-dim block).
    run_case(2, B=4, C=32, L=48, reduction=8)

    print("KERNEL_OK")
</pallas_src>

<mosaic_0001>
module attributes {stable_mosaic.version = 11 : i64} {
  func.func @_se_kernel_flat(%arg0: i32, %arg1: memref<8x1024xf32, #tpu.memory_space<vmem>>, %arg2: memref<64x4xf32, #tpu.memory_space<vmem>>, %arg3: memref<4x64xf32, #tpu.memory_space<vmem>>, %arg4: memref<8x1024xf32, #tpu.memory_space<vmem>>) attributes {dimension_semantics = [#tpu.dimension_semantics<parallel>], iteration_bounds = array<i64: 2>, scalar_prefetch = 0 : i64, scratch_operands = 0 : i64, tpu.core_type = #tpu.core_type<tc>, window_params = [{transform_indices = @transform_0, window_bounds = array<i64: 8, 1024>}, {pipeline_mode = #tpu.pipeline_mode<synchronous>, transform_indices = @transform_1, window_bounds = array<i64: 64, 4>}, {pipeline_mode = #tpu.pipeline_mode<synchronous>, transform_indices = @transform_2, window_bounds = array<i64: 4, 64>}, {transform_indices = @transform_3, window_bounds = array<i64: 8, 1024>}]} {
    %0 = tpu.iota {dimensions = array<i32: 0>} : vector<64x1024xi32>
    %1 = tpu.iota {dimensions = array<i32: 1>} : vector<64x1024xi32>
    %c16_i32 = arith.constant 16 : i32
    %2 = vector.broadcast %c16_i32 : i32 to vector<64x1024xi32>
    %3 = arith.muli %0, %2 : vector<64x1024xi32>
    %4 = arith.cmpi sge, %1, %3 : vector<64x1024xi32>
    %c1_i32 = arith.constant 1 : i32
    %5 = vector.broadcast %c1_i32 : i32 to vector<64x1024xi32>
    %6 = arith.addi %0, %5 : vector<64x1024xi32>
    %c16_i32_0 = arith.constant 16 : i32
    %7 = vector.broadcast %c16_i32_0 : i32 to vector<64x1024xi32>
    %8 = arith.muli %6, %7 : vector<64x1024xi32>
    %9 = arith.cmpi slt, %1, %8 : vector<64x1024xi32>
    %10 = arith.andi %4, %9 : vector<64x1024xi1>
    %cst = arith.constant 1.000000e+00 : f32
    %cst_1 = arith.constant 0.000000e+00 : f32
    %11 = vector.broadcast %cst : f32 to vector<64x1024xf32>
    %12 = vector.broadcast %cst_1 : f32 to vector<64x1024xf32>
    %13 = arith.select %10, %11, %12 : vector<64x1024xi1>, vector<64x1024xf32>
    %14 = tpu.iota {dimensions = array<i32: 0>} : vector<1024x64xi32>
    %15 = tpu.iota {dimensions = array<i32: 1>} : vector<1024x64xi32>
    %c16_i32_2 = arith.constant 16 : i32
    %16 = vector.broadcast %c16_i32_2 : i32 to vector<1024x64xi32>
    %17 = arith.muli %15, %16 : vector<1024x64xi32>
    %18 = arith.cmpi sge, %14, %17 : vector<1024x64xi32>
    %c1_i32_3 = arith.constant 1 : i32
    %19 = vector.broadcast %c1_i32_3 : i32 to vector<1024x64xi32>
    %20 = arith.addi %15, %19 : vector<1024x64xi32>
    %c16_i32_4 = arith.constant 16 : i32
    %21 = vector.broadcast %c16_i32_4 : i32 to vector<1024x64xi32>
    %22 = arith.muli %20, %21 : vector<1024x64xi32>
    %23 = arith.cmpi slt, %14, %22 : vector<1024x64xi32>
    %24 = arith.andi %18, %23 : vector<1024x64xi1>
    %cst_5 = arith.constant 6.250000e-02 : f32
    %cst_6 = arith.constant 0.000000e+00 : f32
    %25 = vector.broadcast %cst_5 : f32 to vector<1024x64xf32>
    %26 = vector.broadcast %cst_6 : f32 to vector<1024x64xf32>
    %27 = arith.select %24, %25, %26 : vector<1024x64xi1>, vector<1024x64xf32>
    %c0 = arith.constant 0 : index
    %c0_7 = arith.constant 0 : index
    %28 = vector.load %arg1[%c0, %c0_7] : memref<8x1024xf32, #tpu.memory_space<vmem>>, vector<8x1024xf32>
    %cst_8 = arith.constant dense<0.000000e+00> : vector<8x64xf32>
    %29 = tpu.matmul %28, %27, %cst_8 {dimension_numbers = #tpu.dot_dimension_numbers<[1], [0], [0], [1], [0, 0, 1, 1], [], []>, precision = #tpu.contract_precision<fp32>} : vector<8x1024xf32>, vector<1024x64xf32>, vector<8x64xf32> -> vector<8x64xf32>
    %c0_9 = arith.constant 0 : index
    %c0_10 = arith.constant 0 : index
    %30 = vector.load %arg2[%c0_9, %c0_10] : memref<64x4xf32, #tpu.memory_space<vmem>>, vector<64x4xf32>
    %cst_11 = arith.constant dense<0.000000e+00> : vector<8x4xf32>
    %31 = tpu.matmul %29, %30, %cst_11 {dimension_numbers = #tpu.dot_dimension_numbers<[1], [0], [0], [1], [0, 0, 1, 1], [], []>, precision = #tpu.contract_precision<fp32>} : vector<8x64xf32>, vector<64x4xf32>, vector<8x4xf32> -> vector<8x4xf32>
    %cst_12 = arith.constant 0.000000e+00 : f32
    %32 = vector.broadcast %cst_12 : f32 to vector<8x4xf32>
    %33 = arith.maximumf %31, %32 : vector<8x4xf32>
    %c0_13 = arith.constant 0 : index
    %c0_14 = arith.constant 0 : index
    %34 = vector.load %arg3[%c0_13, %c0_14] : memref<4x64xf32, #tpu.memory_space<vmem>>, vector<4x64xf32>
    %cst_15 = arith.constant dense<0.000000e+00> : vector<8x64xf32>
    %35 = tpu.matmul %33, %34, %cst_15 {dimension_numbers = #tpu.dot_dimension_numbers<[1], [0], [0], [1], [0, 0, 1, 1], [], []>, precision = #tpu.contract_precision<fp32>} : vector<8x4xf32>, vector<4x64xf32>, vector<8x64xf32> -> vector<8x64xf32>
    %36 = arith.negf %35 : vector<8x64xf32>
    %37 = math.exp %36 : vector<8x64xf32>
    %cst_16 = arith.constant 1.000000e+00 : f32
    %38 = vector.broadcast %cst_16 : f32 to vector<8x64xf32>
    %39 = arith.addf %38, %37 : vector<8x64xf32>
    %40 = arith.divf %38, %39 : vector<8x64xf32>
    %cst_17 = arith.constant dense<0.000000e+00> : vector<8x1024xf32>
    %41 = tpu.matmul %40, %13, %cst_17 {dimension_numbers = #tpu.dot_dimension_numbers<[1], [0], [0], [1], [0, 0, 1, 1], [], []>, precision = #tpu.contract_precision<fp32>} : vector<8x64xf32>, vector<64x1024xf32>, vector<8x1024xf32> -> vector<8x1024xf32>
    %c0_18 = arith.constant 0 : index
    %c0_19 = arith.constant 0 : index
    %42 = vector.load %arg1[%c0_18, %c0_19] : memref<8x1024xf32, #tpu.memory_space<vmem>>, vector<8x1024xf32>
    %43 = arith.mulf %42, %41 : vector<8x1024xf32>
    %c0_20 = arith.constant 0 : index
    %c0_21 = arith.constant 0 : index
    %44 = vector.load %arg4[%c0_20, %c0_21] : memref<8x1024xf32, #tpu.memory_space<vmem>>, vector<8x1024xf32>
    tpu.vector_store %arg4[%c0_20, %c0_21], %43 {strides = array<i32>} : memref<8x1024xf32, #tpu.memory_space<vmem>>, vector<8x1024xf32>,
    return
  }
  func.func @transform_0(%arg0: i32) -> (i32, i32) {
    %c0_i32 = arith.constant 0 : i32
    %c0_i32_0 = arith.constant 0 : i32
    return %arg0, %c0_i32 : i32, i32
  }
  func.func @transform_1(%arg0: i32) -> (i32, i32) {
    %c0_i32 = arith.constant 0 : i32
    %c0_i32_0 = arith.constant 0 : i32
    %c0_i32_1 = arith.constant 0 : i32
    return %c0_i32, %c0_i32_0 : i32, i32
  }
  func.func @transform_2(%arg0: i32) -> (i32, i32) {
    %c0_i32 = arith.constant 0 : i32
    %c0_i32_0 = arith.constant 0 : i32
    %c0_i32_1 = arith.constant 0 : i32
    return %c0_i32, %c0_i32_0 : i32, i32
  }
  func.func @transform_3(%arg0: i32) -> (i32, i32) {
    %c0_i32 = arith.constant 0 : i32
    %c0_i32_0 = arith.constant 0 : i32
    return %arg0, %c0_i32 : i32, i32
  }
}

</mosaic_0001>

<bundles_post_ra>
// kernel: tpu_custom_call.1
= control target key start
LH: loop header
LB: loop body
LE: loop exit
PB: predicated region body
PF: predicated region fallthrough
CT: control target
= control target key end

     0   :  { %8 = vsyncpa [#allocation3], 0  ;;  %s12363_s0 = inlined_call_operand.hbm [shape: f32[16,1024], index: 0, kind: input, shape index: {}]   ;;  %s12364_s1 = inlined_call_operand.vmem [shape: f32[64,4], index: 1, kind: input, shape index: {}]   ;;  %s12365_s2 = inlined_call_operand.vmem [shape: f32[4,64], index: 2, kind: input, shape index: {}]   ;;  %s12366_s3 = inlined_call_operand.hbm [shape: f32[16,1024], index: 3, kind: output, shape index: {}]  }
   0x1   :  { %10 = vsyncpa [#allocation3 + $0x1], 0 }
   0x2   :  { %11 = vsyncpa [#allocation4], 0 }
   0x3   :  { %13 = vsyncpa [#allocation4 + $0x1], 0  ;;  %s5907_s12 = smov 0   ;;  %s5909_s13 = smov 0  }
   0x4   :  { %s5911_s14 = smov 0   ;;  %s5913_s15 = smov 0  }
   0x5 LB: > { %s5928_s16 = sadd.s32 4294967295, %s5882_s15   ;;  %s5132_s17 = sadd.s32 4294967294, %s5882_s15   ;;  %s5882_s15 = sphi %s5913_s15, %s13400_s15   ;;  %s5878_s14 = sphi %s5911_s14, %s13399_s14   ;;  %s5874_s13 = sphi %s5909_s13, %s13398_s13   ;;  %s5870_s12 = sphi %s5907_s12, %s13397_s12  }
   0x6   : > { %s5932_s18 = sadd.s32 1, %s5882_s15   ;;  %s26_s19 = sadd.s32 1, %s5878_s14 }
   0x7   : > { %s23_s20 = ssub.s32 %s5882_s15, %s5932_s18  ;;  %p33_p0 = scmp.ne.s32.totalorder %s5878_s14, %s5874_s13 }
   0x8   : > { %p24_p1 = scmp.eq.s32.totalorder %s23_s20, 0  ;;  %p34_p2 = scmp.eq.s32.totalorder %s5882_s15, 0 }
   0x9   : > { %p39_p3 = scmp.ne.s32.totalorder %s5874_s13, %s5870_s12  ;;  %p40_p4 = scmp.eq.s32.totalorder %s5928_s16, 0 }
   0xa   : > { %s5944_s21 = scalar_select %p24_p1, %s5878_s14, %s26_s19  }
   0xb   : > { %p5946_p5 = por %p34_p2, %p33_p0  ;;  %p5950_p6 = por %p40_p4, %p39_p3 }
   0xc   : > { %p105_p7 = scmp.eq.s32.totalorder %s5928_s16, 1  ;;  %p111_p8 = scmp.eq.s32.totalorder %s5132_s17, 1 }
   0xd   : > { %p5737_p10 = scmp.lt.s32.totalorder %s5882_s15, 2  ;;  %s137_s26 = sand.u32 1, %s5878_s14  }
   0xe   : > { %p5957_p11 = por %p105_p7, %p33_p0  ;;  %p5961_p12 = por %p111_p8, %p39_p3 }
   0xf   : > { %s5723_s27 = sshll.u32 %s5882_s15, 6  ;;  %s5135_s28 = sshll.u32 %s137_s26, 6 }
  0x10   : > { %s146_s4 = scalar_lea.hbm %s12363_s0, %s5723_s27  ;;  %s141_s6 = scalar_lea.vmem [#allocation2], %s5135_s28 }
  0x11   : > { %s148_s5 = sshll.u32 %s146_s4, 4  ;;  %s150_s7 = sshll.u32 %s141_s6, 4  ;;  %s149_s5 = int_to_ptr.hbm [resolvable:$true] %s148_s5  ;;  %s151_s7 = int_to_ptr.vmem [resolvable:$true] %s150_s7 }
  0x12   : > { %p5972_p13 = pnand %p5737_p10, %p5946_p5  ;;  %p5138_p0 = scmp.ge.s32.totalorder %s5882_s15, 1 }
  0x13   : > { %p155_p1 = scmp.lt.s32.totalorder %s5882_s15, 3  ;;  %s138_s9 = scalar_lea.sflag [#allocation3], %s137_s26 }
  0x14   : > { %s5786_s10 = sshra.s32 %s149_s5, 4  ;;  %p5790_p3 = pneg %p5972_p13  ;;  %s5787_s10 = int_to_ptr.hbm [resolvable:$true] %s5786_s10 }
  0x15   : > { %s5788_s11 = scalar_lea.hbm %s5787_s10, 64  ;;  %s5793_s20 = scalar_lea.hbm %s12363_s0, 128 }
  0x16   : > { %p5789_p2 = scmp.ne.s32.totalorder %s5787_s10, %s5788_s11  ;;  %p5794_p5 = scmp.lt.s32.totalorder %s5787_s10, %s12363_s0 }
  0x17   : > { %p5795_p8 = scmp.lt.s32.totalorder %s5793_s20, %s5788_s11 }
  0x18   : > { %p5791_p4 = pnand %p5790_p3, %p5789_p2 }
  0x19   : > { %p5796_p10 = por %p5795_p8, %p5794_p5 }
  0x1a   : > { %p5792_p7 = pneg %p5791_p4 }
  0x1c   : > { %p5797_p9 = pnand %p5796_p10, %p5792_p7 }
  0x1e   : > { %5800 = shalt.err (!%p5797_p9)
}
  0x1f   : > { %5732 = dma.hbm_to_vmem [thread:$0]  (!%p5972_p13), %s149_s5, 1024, %s151_s7, %s138_s9  }
  0x20   : > { %p156_p2 = pnand %p5138_p0, %p155_p1 }
  0x22   : > { %159 = sbr.rel (%p156_p2) target bundleno = 1282 (0x502), region = 32 }
  0x27   : > { %s5993_s26 = sand.u32 1, %s5874_s13   ;;  %v189_v0 = vlaneseq }
  0x28   : > { %s5139_s28 = sshll.u32 %s5993_s26, 6  ;;  %s162_s29 = scalar_lea.sflag [#allocation3], %s5993_s26 }
  0x29   : > { %s5999_s30 = scalar_lea.vmem [#allocation2], %s5139_s28 }
  0x2a   : > { %5861 = dma.done.wait (%p5950_p6), %s162_s29, 1024  }
  0x2b   : > { %5863 = vsyncadd (%p5950_p6), %s162_s29, 4294966272  ;;  %v6005_v1 = vshrl.u32 %v189_v0, 7  ;;  %v6007_v2 = vand.u32 127, %v189_v0  ;;  %v12425_v14 = vmov 0.0625   ;;  %v12422_v16 = vmov 0.0   ;;  %s12200_s6 = scalar_lea.vmem [#allocation5], %s5139_s28 }
  0x2c   : > { %v12669_v53 = vmov 0  ;;  %v12672_v61 = vmov 0  ;;  %v12713_v31 = vmov 0  ;;  %v12754_v13 = vmov 0  ;;  %s5724_s28 = sshll.u32 %s5928_s16, 6  ;;  %s5059_s10 = sshll.u32 %s12200_s6, 4  ;;  %s5060_s10 = int_to_ptr.vmem [resolvable:$true] %s5059_s10 }
  0x2d   : > { %12649 = vst [vmem:[#allocation8_spill] sm:$0xff] %v6007_v2  ;;  %v494_v3 = vadd.s32 120, %v6005_v1  ;;  %v6011_v4 = vmul.u32 16, %v6007_v2  ;;  %v736_v5 = vadd.s32 1, %v6007_v2  ;;  %v493_v6 = vadd.s32 112, %v6005_v1  ;;  %s5057_s9 = scalar_lea.hbm %s12366_s3, %s5724_s28  ;;  %s5046_s16 = scalar_lea.sflag [#allocation4], %s5993_s26 }
  0x2e   : > { %v492_v7 = vadd.s32 104, %v6005_v1  ;;  %v491_v8 = vadd.s32 96, %v6005_v1  ;;  %v490_v9 = vadd.s32 88, %v6005_v1  ;;  %v489_v10 = vadd.s32 80, %v6005_v1  ;;  %s5061_s11 = sshll.u32 %s5057_s9, 4  ;;  %s5836_s27 = scalar_lea.hbm %s12366_s3, 128  ;;  %s5062_s11 = int_to_ptr.hbm [resolvable:$true] %s5061_s11 }
  0x2f   : > { %vm623_vm0 = vcmp.ge.s32.totalorder %v494_v3, %v6011_v4  ;;  %v6020_v11 = vmul.u32 16, %v736_v5  ;;  %vm622_vm1 = vcmp.ge.s32.totalorder %v493_v6, %v6011_v4  ;;  %v488_v12 = vadd.s32 72, %v6005_v1  ;;  %s5830_s17 = sshra.s32 %s5062_s11, 4  ;;  %s5831_s17 = int_to_ptr.hbm [resolvable:$true] %s5830_s17 }
  0x30   : > { %vm621_vm4 = vcmp.ge.s32.totalorder %v492_v7, %v6011_v4  ;;  %vm620_vm7 = vcmp.ge.s32.totalorder %v491_v8, %v6011_v4  ;;  %vm619_vm9 = vcmp.ge.s32.totalorder %v490_v9, %v6011_v4  ;;  %vm618_vm10 = vcmp.ge.s32.totalorder %v489_v10, %v6011_v4  ;;  %s5832_s19 = scalar_lea.hbm %s5831_s17, 64  ;;  %p5837_p0 = scmp.lt.s32.totalorder %s5831_s17, %s12366_s3 }
  0x31   : > { %vm753_vm2 = vcmp.lt.s32.totalorder %v494_v3, %v6020_v11  ;;  %vm752_vm3 = vcmp.lt.s32.totalorder %v493_v6, %v6020_v11  ;;  %vm751_vm5 = vcmp.lt.s32.totalorder %v492_v7, %v6020_v11  ;;  %vm750_vm8 = vcmp.lt.s32.totalorder %v491_v8, %v6020_v11  ;;  %p5833_p6 = scmp.ne.s32.totalorder %s5831_s17, %s5832_s19  ;;  %p5838_p1 = scmp.lt.s32.totalorder %s5836_s27, %s5832_s19 }
  0x32   : > { %vm6028_vm6 = vmand %vm623_vm0, %vm753_vm2  ;;  %vm749_vm12 = vcmp.lt.s32.totalorder %v490_v9, %v6020_v11  ;;  %vm748_vm13 = vcmp.lt.s32.totalorder %v489_v10, %v6020_v11  ;;  %v487_v18 = vadd.s32 64, %v6005_v1  ;;  %vm617_vm15 = vcmp.ge.s32.totalorder %v488_v12, %v6011_v4 }
  0x33   : > { %5141 = vmatpush.msk.msra.mxu0 %vm6028_vm6, %v12425_v14  ;;  %vm6039_vm11 = vmand %vm622_vm1, %vm752_vm3  ;;  %v1009_v17 = vsel %vm6028_vm6, 0.0625, %v12422_v16  ;;  %5157 = vmatpush.msk.msra.mxu3 %vm6028_vm6, %v12425_v14  ;;  %vm747_vm0 = vcmp.lt.s32.totalorder %v488_v12, %v6020_v11  ;;  %v6087_v25 = vadd.s32 56, %v6005_v1  ;;  %v6090_v26 = vadd.s32 48, %v6005_v1  ;;  %p5834_p9 = pnand %p5833_p6, %p5957_p11  ;;  %p5839_p3 = por %p5838_p1, %p5837_p0 }
  0x34   : > { %vm6056_vm14 = vmand %vm621_vm4, %vm751_vm5  ;;  %v6060_v20 = vsub.f32 %v1009_v17, %v1009_v17  ;;  %v1008_v21 = vsel %vm6039_vm11, 0.0625, %v12422_v16  ;;  %vm616_vm3 = vcmp.ge.s32.totalorder %v487_v18, %v6011_v4  ;;  %vm746_vm5 = vcmp.lt.s32.totalorder %v487_v18, %v6020_v11 }
  0x35   : > { %5142 = vmatpush.msk.msra.mxu0 %vm6039_vm11, %v12425_v14  ;;  %vm6074_vm1 = vmand %vm620_vm7, %vm750_vm8  ;;  %v6078_v23 = vsub.f32 %v1008_v21, %v1008_v21  ;;  %v1007_v24 = vsel %vm6056_vm14, 0.0625, %v12422_v16  ;;  %5158 = vmatpush.msk.msra.mxu3 %vm6039_vm11, %v12425_v14  ;;  %12658 = vst [vmem:[#allocation9_spill] sm:$0xff] %v6087_v25  ;;  %v6160_v43 = vadd.s32 40, %v6005_v1  ;;  %vm615_vm8 = vcmp.ge.s32.totalorder %v6087_v25, %v6011_v4  ;;  %p5835_p13 = pneg %p5834_p9 }
  0x36   : > { %12659 = vst [vmem:[#allocation10_spill] sm:$0xff] %v6090_v26  ;;  %1241 = vmatpush.msra.mxu2 %v6060_v20  ;;  %vm6097_vm2 = vmand %vm619_vm9, %vm749_vm12  ;;  %v1156_v28 = vand.u32 4294901760, %v6060_v20  ;;  %v6102_v29 = vsub.f32 %v1007_v24, %v1007_v24  ;;  %v1006_v30 = vsel %vm6074_vm1, 0.0625, %v12422_v16  ;;  %vm745_vm9 = vcmp.lt.s32.totalorder %v6087_v25, %v6020_v11 }
  0x37   : > { %5143 = vmatpush.msk.msra.mxu0 %vm6056_vm14, %v12425_v14  ;;  %vm6115_vm4 = vmand %vm618_vm10, %vm748_vm13  ;;  %v1161_v32 = vand.u32 4294901760, %v6078_v23  ;;  %v6120_v33 = vsub.f32 %v1006_v30, %v1006_v30  ;;  %5159 = vmatpush.msk.msra.mxu3 %vm6056_vm14, %v12425_v14  ;;  %v1005_v34 = vsel %vm6097_vm2, 0.0625, %v12422_v16  ;;  %12666 = vst [vmem:[#allocation11_spill] sm:$0xff] %v6160_v43  ;;  %vm614_vm13 = vcmp.ge.s32.totalorder %v6090_v26, %v6011_v4  ;;  %p5840_p4 = pnand %p5839_p3, %p5835_p13 }
  0x38   : > { %1243 = vmatpush.msra.mxu2 %v6078_v23  ;;  %v1157_v35 = vsub.f32 %v6060_v20, %v1156_v28  ;;  %vm6137_vm7 = vmand %vm617_vm15, %vm747_vm0  ;;  %v1166_v37 = vand.u32 4294901760, %v6102_v29  ;;  %v6142_v38 = vsub.f32 %v1005_v34, %v1005_v34  ;;  %v1004_v39 = vsel %vm6115_vm4, 0.0625, %v12422_v16 }
  0x39   : > { %5144 = vmatpush.msk.msra.mxu0 %vm6074_vm1, %v12425_v14  ;;  %v1162_v40 = vsub.f32 %v6078_v23, %v1161_v32  ;;  %5160 = vmatpush.msk.msra.mxu3 %vm6074_vm1, %v12425_v14  ;;  %v1171_v41 = vand.u32 4294901760, %v6120_v33  ;;  %v6157_v42 = vsub.f32 %v1004_v39, %v1004_v39  ;;  %vm6177_vm10 = vmand %vm616_vm3, %vm746_vm5  ;;  %v1003_v50 = vsel %vm6137_vm7, 0.0625, %v12422_v16 }
  0x3a   : > { %v1158_v44 = vand.u32 4294901760, %v1157_v35  ;;  %1245 = vmatpush.msra.mxu2 %v6102_v29  ;;  %v1167_v45 = vsub.f32 %v6102_v29, %v1166_v37  ;;  %v1176_v49 = vand.u32 4294901760, %v6142_v38  ;;  %v6192_v52 = vsub.f32 %v1003_v50, %v1003_v50  ;;  %vm6197_vm12 = vmand %vm615_vm8, %vm745_vm9 }
  0x3b   : > { %5145 = vmatpush.msk.msra.mxu0 %vm6097_vm2, %v12425_v14  ;;  %v1163_v46 = vand.u32 4294901760, %v1162_v40  ;;  %v1172_v48 = vsub.f32 %v6120_v33, %v1171_v41  ;;  %5161 = vmatpush.msk.msra.mxu3 %vm6097_vm2, %v12425_v14  ;;  %v12670_v53 = vsel %vm6197_vm12, 4294967295, %v12669_v53  ;;  %vm744_vm15 = vcmp.lt.s32.totalorder %v6090_v26, %v6020_v11 }
  0x3c   : > { %1159 = vmatpush.msra.mxu1 %v1158_v44  ;;  %1247 = vmatpush.msra.mxu2 %v6120_v33  ;;  %v1168_v51 = vand.u32 4294901760, %v1167_v45  ;;  %v1177_v54 = vsub.f32 %v6142_v38, %v1176_v49  ;;  %v1181_v56 = vand.u32 4294901760, %v6157_v42  ;;  %v1002_v57 = vsel %vm6177_vm10, 0.0625, %v12422_v16  ;;  %vm6233_vm3 = vmand %vm614_vm13, %vm744_vm15 }
  0x3d   : > { %5146 = vmatpush.msk.msra.mxu0 %vm6115_vm4, %v12425_v14  ;;  %5162 = vmatpush.msk.msra.mxu3 %vm6115_vm4, %v12425_v14  ;;  %v1173_v55 = vand.u32 4294901760, %v1172_v48  ;;  %v6217_v58 = vadd.s32 32, %v6005_v1  ;;  %v6222_v60 = vsub.f32 %v1002_v57, %v1002_v57  ;;  %vm613_vm0 = vcmp.ge.s32.totalorder %v6160_v43, %v6011_v4 }
  0x3e   : > { %1164 = vmatpush.msra.mxu1 %v1163_v46  ;;  %1249 = vmatpush.msra.mxu2 %v6142_v38  ;;  %v1178_v59 = vand.u32 4294901760, %v1177_v54  ;;  %v12673_v61 = vsel %vm6233_vm3, 4294967295, %v12672_v61  ;;  %v1182_v62 = vsub.f32 %v6157_v42, %v1181_v56  ;;  %vm743_vm5 = vcmp.lt.s32.totalorder %v6160_v43, %v6020_v11 }
  0x3f   : > { %12671 = vst [vmem:[#allocation12_spill] sm:$0xff] %v6217_v58  ;;  %5147 = vmatpush.msk.msra.mxu0 %vm6137_vm7, %v12425_v14  ;;  %5163 = vmatpush.msk.msra.mxu3 %vm6137_vm7, %v12425_v14  ;;  %v1186_v63 = vand.u32 4294901760, %v6192_v52  ;;  %v1001_v0 = vsel %vm6197_vm12, 0.0625, %v12422_v16  ;;  %vm6249_vm8 = vmand %vm613_vm0, %vm743_vm5  ;;  %v12674_v3 = vmov 0  ;;  %vm612_vm9 = vcmp.ge.s32.totalorder %v6217_v58, %v6011_v4 }
  0x40   : > { %1169 = vmatpush.msra.mxu1 %v1168_v51  ;;  %1251 = vmatpush.msra.mxu2 %v6157_v42  ;;  %v12675_v3 = vsel %vm6249_vm8, 4294967295, %v12674_v3  ;;  %v6253_v5 = vsub.f32 %v1001_v0, %v1001_v0  ;;  %v1183_v6 = vand.u32 4294901760, %v1182_v62  ;;  %vm742_vm13 = vcmp.lt.s32.totalorder %v6217_v58, %v6020_v11 }
  0x41   : > { %5148 = vmatpush.msk.msra.mxu0 %vm6177_vm10, %v12425_v14  ;;  %5164 = vmatpush.msk.msra.mxu3 %vm6177_vm10, %v12425_v14  ;;  %v1187_v7 = vsub.f32 %v6192_v52, %v1186_v63  ;;  %v12382_v8 = vand.u32 4294901760, %v6222_v60  ;;  %v1000_v9 = vsel %vm6233_vm3, 0.0625, %v12422_v16  ;;  %v6277_v10 = vadd.s32 24, %v6005_v1  ;;  %vm6280_vm15 = vmand %vm612_vm9, %vm742_vm13 }
  0x42   : > { %1174 = vmatpush.msra.mxu1 %v1173_v55  ;;  %1253 = vmatpush.msra.mxu2 %v6192_v52  ;;  %v12677_v17 = vmov 0  ;;  %v6284_v18 = vsub.f32 %v1000_v9, %v1000_v9  ;;  %v12374_v21 = vand.u32 4294901760, %v6253_v5  ;;  %v999_v24 = vsel %vm6249_vm8, 0.0625, %v12422_v16 }
  0x43   : > { %5149 = vmatpush.msk.msra.mxu0 %vm6197_vm12, %v12425_v14  ;;  %5165 = vmatpush.msk.msra.mxu3 %vm6197_vm12, %v12425_v14  ;;  %12676 = vst [vmem:[#allocation13_spill] sm:$0xff] %v6277_v10  ;;  %v1188_v12 = vand.u32 4294901760, %v1187_v7  ;;  %v12678_v17 = vsel %vm6280_vm15, 4294967295, %v12677_v17  ;;  %v1192_v30 = vsub.f32 %v6222_v60, %v12382_v8  ;;  %vm611_vm0 = vcmp.ge.s32.totalorder %v6277_v10, %v6011_v4 }
  0x44   : > { %1179 = vmatpush.msra.mxu1 %v1178_v59  ;;  %1255 = vmatpush.msra.mxu2 %v6222_v60  ;;  %vm741_vm5 = vcmp.lt.s32.totalorder %v6277_v10, %v6020_v11  ;;  %v1197_v34 = vsub.f32 %v6253_v5, %v12374_v21  ;;  %v6307_v35 = vsub.f32 %v999_v24, %v999_v24  ;;  %v6310_v39 = vadd.s32 16, %v6005_v1 }
  0x45   : > { %5150 = vmatpush.msk.msra.mxu0 %vm6233_vm3, %v12425_v14  ;;  %5166 = vmatpush.msk.msra.mxu3 %vm6233_vm3, %v12425_v14  ;;  %v1193_v40 = vand.u32 4294901760, %v1192_v30  ;;  %vm6315_vm9 = vmand %vm611_vm0, %vm741_vm5  ;;  %v12680_v44 = vmov 0  ;;  %v12373_v45 = vand.u32 4294901760, %v6284_v18  ;;  %v998_v46 = vsel %vm6280_vm15, 0.0625, %v12422_v16 }
  0x46   : > { %1184 = vmatpush.msra.mxu1 %v1183_v6  ;;  %1257 = vmatpush.msra.mxu2 %v6253_v5  ;;  %12679 = vst [vmem:[#allocation14_spill] sm:$0xff] %v6310_v39  ;;  %v12681_v44 = vsel %vm6315_vm9, 4294967295, %v12680_v44  ;;  %v1198_v48 = vand.u32 4294901760, %v1197_v34  ;;  %vm610_vm13 = vcmp.ge.s32.totalorder %v6310_v39, %v6011_v4  ;;  %vm740_vm0 = vcmp.lt.s32.totalorder %v6310_v39, %v6020_v11 }
  0x47   : > { %5151 = vmatpush.msk.msra.mxu0 %vm6249_vm8, %v12425_v14  ;;  %5167 = vmatpush.msk.msra.mxu3 %vm6249_vm8, %v12425_v14  ;;  %v1202_v50 = vsub.f32 %v6284_v18, %v12373_v45  ;;  %v6337_v51 = vsub.f32 %v998_v46, %v998_v46  ;;  %v6340_v54 = vadd.s32 8, %v6005_v1  ;;  %vm6346_vm5 = vmand %vm610_vm13, %vm740_vm0  ;;  %v12683_v55 = vmov 0 }
  0x48   : > { %1189 = vmatpush.msra.mxu1 %v1188_v12  ;;  %1259 = vmatpush.msra.mxu2 %v6284_v18  ;;  %v12684_v55 = vsel %vm6346_vm5, 4294967295, %v12683_v55  ;;  %v12371_v57 = vand.u32 4294901760, %v6307_v35  ;;  %v997_v59 = vsel %vm6315_vm9, 0.0625, %v12422_v16  ;;  %v12685_v9 = vmov 0 }
  0x49   : > { %5152 = vmatpush.msk.msra.mxu0 %vm6280_vm15, %v12425_v14  ;;  %12682 = vst [vmem:[#allocation15_spill] sm:$0xff] %v6340_v54  ;;  %5168 = vmatpush.msk.msra.mxu3 %vm6280_vm15, %v12425_v14  ;;  %v1203_v62 = vand.u32 4294901760, %v1202_v50  ;;  %vm609_vm15 = vcmp.ge.s32.totalorder %v6340_v54, %v6011_v4  ;;  %vm739_vm0 = vcmp.lt.s32.totalorder %v6340_v54, %v6020_v11  ;;  %v12369_v7 = vand.u32 4294901760, %v6337_v51 }
  0x4a   : > { %1194 = vmatpush.msra.mxu1 %v1193_v40  ;;  %1261 = vmatpush.msra.mxu2 %v6307_v35  ;;  %v1207_v0 = vsub.f32 %v6307_v35, %v12371_v57  ;;  %v6370_v6 = vsub.f32 %v997_v59, %v997_v59  ;;  %vm6376_vm13 = vmand %vm609_vm15, %vm739_vm0  ;;  %v996_v12 = vsel %vm6346_vm5, 0.0625, %v12422_v16  ;;  %v510_v24 = vadd.s32 248, %v6005_v1 }
  0x4b   : > { %5153 = vmatpush.msk.msra.mxu0 %vm6315_vm9, %v12425_v14  ;;  %5169 = vmatpush.msk.msra.mxu3 %vm6315_vm9, %v12425_v14  ;;  %v12686_v9 = vsel %vm6376_vm13, 4294967295, %v12685_v9  ;;  %vm738_vm9 = vcmp.lt.s32.totalorder %v6005_v1, %v6020_v11  ;;  %vm12687_vm15 = vcmp.ge.s32.totalorder %v6005_v1, %v6011_v4  ;;  %v12688_v34 = vmov 0 }
  0x4c   : > { %1199 = vmatpush.msra.mxu1 %v1198_v48  ;;  %1263 = vmatpush.msra.mxu2 %v6337_v51  ;;  %v1208_v30 = vand.u32 4294901760, %v1207_v0  ;;  %vm6393_vm0 = vmand %vm12687_vm15, %vm738_vm9  ;;  %v1212_v40 = vsub.f32 %v6337_v51, %v12369_v7  ;;  %v6400_v46 = vsub.f32 %v996_v12, %v996_v12  ;;  %v12372_v48 = vand.u32 4294901760, %v6370_v6 }
  0x4d   : > { %5154 = vmatpush.msk.msra.mxu0 %vm6346_vm5, %v12425_v14  ;;  %5170 = vmatpush.msk.msra.mxu3 %vm6346_vm5, %v12425_v14  ;;  %v12689_v34 = vsel %vm6393_vm0, 4294967295, %v12688_v34  ;;  %v995_v50 = vsel %vm6376_vm13, 0.0625, %v12422_v16  ;;  %v994_v59 = vsel %vm6393_vm0, 0.0625, %v12422_v16  ;;  %vm639_vm9 = vcmp.ge.s32.totalorder %v510_v24, %v6011_v4 }
  0x4e   : > { %1204 = vmatpush.msra.mxu1 %v1203_v62  ;;  %1265 = vmatpush.msra.mxu2 %v6370_v6  ;;  %vm769_vm15 = vcmp.lt.s32.totalorder %v510_v24, %v6020_v11  ;;  %v1213_v62 = vand.u32 4294901760, %v1212_v40  ;;  %v1217_v0 = vsub.f32 %v6370_v6, %v12372_v48  ;;  %v6421_v12 = vsub.f32 %v995_v50, %v995_v50 }
  0x4f   : > { %5155 = vmatpush.msk.msra.mxu0 %vm6376_vm13, %v12425_v14  ;;  %5171 = vmatpush.msk.msra.mxu3 %vm6376_vm13, %v12425_v14  ;;  %v12381_v7 = vand.u32 4294901760, %v6400_v46  ;;  %vm6424_vm5 = vmand %vm639_vm9, %vm769_vm15  ;;  %v12690_v57 = vmov 0  ;;  %v6431_v24 = vsub.f32 %v994_v59, %v994_v59  ;;  %v508_v50 = vadd.s32 232, %v6005_v1 }
  0x50   : > { %1209 = vmatpush.msra.mxu1 %v1208_v30  ;;  %1267 = vmatpush.msra.mxu2 %v6400_v46  ;;  %v12691_v57 = vsel %vm6424_vm5, 4294967295, %v12690_v57  ;;  %v509_v30 = vadd.s32 240, %v6005_v1  ;;  %v1025_v40 = vsel %vm6424_vm5, 0.0625, %v12422_v16  ;;  %v1218_v48 = vand.u32 4294901760, %v1217_v0 }
  0x51   : > { %5156 = vmatpush.msk.msra.mxu0 %vm6393_vm0, %v12425_v14  ;;  %5172 = vmatpush.msk.msra.mxu3 %vm6393_vm0, %v12425_v14  ;;  %v1222_v59 = vsub.f32 %v6400_v46, %v12381_v7  ;;  %v12380_v45 = vand.u32 4294901760, %v6421_v12  ;;  %v6447_v21 = vsub.f32 %v1025_v40, %v1025_v40  ;;  %vm637_vm0 = vcmp.ge.s32.totalorder %v508_v50, %v6011_v4 }
  0x52   : > { %1214 = vmatpush.msra.mxu1 %v1213_v62  ;;  %1269 = vmatpush.msra.mxu2 %v6421_v12  ;;  %vm638_vm9 = vcmp.ge.s32.totalorder %v509_v30, %v6011_v4  ;;  %vm768_vm15 = vcmp.lt.s32.totalorder %v509_v30, %v6020_v11  ;;  %v12379_v62 = vand.u32 4294901760, %v6431_v24  ;;  %vm767_vm8 = vcmp.lt.s32.totalorder %v508_v50, %v6020_v11 }
  0x53   : > { %1303 = vmatpush.msrb.mxu0 %v1156_v28  ;;  %v1223_v20 = vand.u32 4294901760, %v1222_v59  ;;  %v1227_v28 = vsub.f32 %v6421_v12, %v12380_v45  ;;  %vm6459_vm13 = vmand %vm638_vm9, %vm768_vm15  ;;  %v12399_v40 = vand.u32 4294901760, %v6447_v21  ;;  %v507_v30 = vadd.s32 224, %v6005_v1 }
  0x54   : > { %1219 = vmatpush.msra.mxu1 %v1218_v48  ;;  %1271 = vmatpush.msra.mxu2 %v6431_v24  ;;  %v1232_v23 = vsub.f32 %v6431_v24, %v12379_v62  ;;  %vm6469_vm3 = vmand %vm637_vm0, %vm767_vm8  ;;  %v1024_v48 = vsel %vm6459_vm13, 0.0625, %v12422_v16  ;;  %v506_v59 = vadd.s32 216, %v6005_v1  ;;  %v524_v0 = vadd.s32 360, %v6005_v1 }
  0x55   : > { %1306 = vmatpush.msrb.mxu0 %v1161_v32  ;;  %v1228_v50 = vand.u32 4294901760, %v1227_v28  ;;  %v1402_v62 = vsub.f32 %v6447_v21, %v12399_v40  ;;  %v6483_v45 = vsub.f32 %v1024_v48, %v1024_v48  ;;  %v1023_v7 = vsel %vm6469_vm3, 0.0625, %v12422_v16 }
  0x56   : > { %1224 = vmatpush.msra.mxu1 %v1223_v20  ;;  %5189 = vmatpush.msk.msrb.mxu2 %vm6424_vm5, %v12425_v14  ;;  %v1233_v8 = vand.u32 4294901760, %v1232_v23  ;;  %vm636_vm8 = vcmp.ge.s32.totalorder %v507_v30, %v6011_v4  ;;  %vm766_vm0 = vcmp.lt.s32.totalorder %v507_v30, %v6020_v11  ;;  %v6493_v29 = vsub.f32 %v1023_v7, %v1023_v7 }
  0x57   : > { %1309 = vmatpush.msrb.mxu0 %v1166_v37  ;;  %v1403_v37 = vand.u32 4294901760, %v1402_v62  ;;  %v12396_v20 = vand.u32 4294901760, %v6483_v45  ;;  %vm6498_vm9 = vmand %vm636_vm8, %vm766_vm0  ;;  %v12696_v28 = vmov 0  ;;  %vm635_vm15 = vcmp.ge.s32.totalorder %v506_v59, %v6011_v4 }
  0x58   : > { %1229 = vmatpush.msra.mxu1 %v1228_v50  ;;  %v12697_v28 = vsel %vm6498_vm9, 4294967295, %v12696_v28  ;;  %vm765_vm5 = vcmp.lt.s32.totalorder %v506_v59, %v6020_v11  ;;  %5190 = vmatpush.msk.msrb.mxu2 %vm6459_vm13, %v12425_v14  ;;  %v12391_v7 = vand.u32 4294901760, %v6493_v29  ;;  %v505_v62 = vadd.s32 208, %v6005_v1 }
  0x59   : > { %1312 = vmatpush.msrb.mxu0 %v1171_v41  ;;  %vm6508_vm12 = vmand %vm635_vm15, %vm765_vm5  ;;  %v1022_v41 = vsel %vm6498_vm9, 0.0625, %v12422_v16  ;;  %v504_v23 = vadd.s32 200, %v6005_v1  ;;  %1404 = vmatpush.msrb.mxu3 %v1403_v37  ;;  %v1407_v48 = vsub.f32 %v6483_v45, %v12396_v20  ;;  %v503_v50 = vadd.s32 192, %v6005_v1 }
  0x5a   : > { %1234 = vmatpush.msra.mxu1 %v1233_v8  ;;  %v6520_v30 = vsub.f32 %v1022_v41, %v1022_v41  ;;  %v1021_v59 = vsel %vm6508_vm12, 0.0625, %v12422_v16  ;;  %v1412_v8 = vsub.f32 %v6493_v29, %v12391_v7  ;;  %vm634_vm5 = vcmp.ge.s32.totalorder %v505_v62, %v6011_v4  ;;  %5191 = vmatpush.msk.msrb.mxu2 %vm6469_vm3, %v12425_v14 }
  0x5b   : > { %1315 = vmatpush.msrb.mxu0 %v1176_v49  ;;  %vm764_vm8 = vcmp.lt.s32.totalorder %v505_v62, %v6020_v11  ;;  %v502_v37 = vadd.s32 184, %v6005_v1  ;;  %v1408_v38 = vand.u32 4294901760, %v1407_v48  ;;  %v6545_v41 = vsub.f32 %v1021_v59, %v1021_v59 }
  0x5c   : > { %5173 = vmatpush.msk.msrb.mxu1 %vm6028_vm6, %v12425_v14  ;;  %v12390_v49 = vand.u32 4294901760, %v6520_v30  ;;  %vm6541_vm0 = vmand %vm634_vm5, %vm764_vm8  ;;  %vm633_vm6 = vcmp.ge.s32.totalorder %v504_v23, %v6011_v4  ;;  %v1413_v62 = vand.u32 4294901760, %v1412_v8  ;;  %vm763_vm15 = vcmp.lt.s32.totalorder %v504_v23, %v6020_v11  ;;  %5192 = vmatpush.msk.msrb.mxu2 %vm6498_vm9, %v12425_v14 }
  0x5d   : > { %1318 = vmatpush.msrb.mxu0 %v1181_v56  ;;  %v1020_v48 = vsel %vm6541_vm0, 0.0625, %v12422_v16  ;;  %vm632_vm5 = vcmp.ge.s32.totalorder %v503_v50, %v6011_v4  ;;  %1409 = vmatpush.msrb.mxu3 %v1408_v38  ;;  %v12389_v15 = vand.u32 4294901760, %v6545_v41  ;;  %vm762_vm8 = vcmp.lt.s32.totalorder %v503_v50, %v6020_v11 }
  0x5e   : > { %5174 = vmatpush.msk.msrb.mxu1 %vm6039_vm11, %v12425_v14  ;;  %v1417_v42 = vsub.f32 %v6520_v30, %v12390_v49  ;;  %vm6565_vm11 = vmand %vm633_vm6, %vm763_vm15  ;;  %v6569_v23 = vsub.f32 %v1020_v48, %v1020_v48  ;;  %vm631_vm6 = vcmp.ge.s32.totalorder %v502_v37, %v6011_v4  ;;  %vm761_vm15 = vcmp.lt.s32.totalorder %v502_v37, %v6020_v11  ;;  %v1122_v49 = vld [vmem:[%s5999_s30] sm:$0xff] }
  0x5f   : > { %1321 = vmatpush.msrb.mxu0 %v1186_v63  ;;  %vm6577_vm9 = vmand %vm632_vm5, %vm762_vm8  ;;  %v1019_v8 = vsel %vm6565_vm11, 0.0625, %v12422_v16  ;;  %v501_v50 = vadd.s32 176, %v6005_v1  ;;  %1414 = vmatpush.msrb.mxu3 %v1413_v62  ;;  %v1422_v52 = vsub.f32 %v6545_v41, %v12389_v15  ;;  %v12708_v37 = vand.u32 4294901760, %v6222_v60 }
  0x60   : > { %5175 = vmatpush.msk.msrb.mxu1 %vm6056_vm14, %v12425_v14  ;;  %5193 = vmatpush.msk.msrb.mxu2 %vm6508_vm12, %v12425_v14  ;;  %v1418_v19 = vand.u32 4294901760, %v1417_v42  ;;  %v12388_v63 = vand.u32 4294901760, %v6569_v23  ;;  %v6594_v38 = vsub.f32 %v1019_v8, %v1019_v8  ;;  %vm6596_vm14 = vmand %vm631_vm6, %vm761_vm15  ;;  %v1018_v62 = vsel %vm6577_vm9, 0.0625, %v12422_v16 }
  0x61   : > { %1324 = vmatpush.msrb.mxu0 %v12708_v37  ;;  %vm630_vm5 = vcmp.ge.s32.totalorder %v501_v50, %v6011_v4  ;;  %vm760_vm8 = vcmp.lt.s32.totalorder %v501_v50, %v6020_v11  ;;  %v1017_v42 = vsel %vm6596_vm14, 0.0625, %v12422_v16  ;;  %v1423_v60 = vand.u32 4294901760, %v1422_v52 }
  0x62   : > { %5176 = vmatpush.msk.msrb.mxu1 %vm6074_vm1, %v12425_v14  ;;  %1419 = vmatpush.msrb.mxu3 %v1418_v19  ;;  %v1427_v22 = vsub.f32 %v6569_v23, %v12388_v63  ;;  %v12394_v8 = vand.u32 4294901760, %v6594_v38  ;;  %v6620_v37 = vsub.f32 %v1018_v62, %v1018_v62  ;;  %vm6622_vm1 = vmand %vm630_vm5, %vm760_vm8  ;;  %v12711_v19 = vand.u32 4294901760, %v6253_v5 }
  0x63   : > { %5194 = vmatpush.msk.msrb.mxu2 %vm6541_vm0, %v12425_v14  ;;  %v6631_v52 = vsub.f32 %v1017_v42, %v1017_v42  ;;  %v500_v63 = vadd.s32 168, %v6005_v1  ;;  %v1016_v62 = vsel %vm6622_vm1, 0.0625, %v12422_v16  ;;  %v499_v15 = vadd.s32 160, %v6005_v1 }
  0x64   : > { %1327 = vmatpush.msrb.mxu0 %v12711_v19  ;;  %5177 = vmatpush.msk.msrb.mxu1 %vm6097_vm2, %v12425_v14  ;;  %v1428_v5 = vand.u32 4294901760, %v1427_v22  ;;  %v1432_v27 = vsub.f32 %v6594_v38, %v12394_v8  ;;  %v12393_v42 = vand.u32 4294901760, %v6620_v37  ;;  %v6645_v19 = vsub.f32 %v1016_v62, %v1016_v62 }
  0x65   : > { %1424 = vmatpush.msrb.mxu3 %v1423_v60  ;;  %5195 = vmatpush.msk.msrb.mxu2 %vm6565_vm11, %v12425_v14  ;;  %v12712_v7 = vand.u32 4294901760, %v6284_v18  ;;  %v12392_v60 = vand.u32 4294901760, %v6631_v52  ;;  %vm629_vm2 = vcmp.ge.s32.totalorder %v500_v63, %v6011_v4  ;;  %vm759_vm6 = vcmp.lt.s32.totalorder %v500_v63, %v6020_v11 }
  0x66   : > { %5178 = vmatpush.msk.msrb.mxu1 %vm6115_vm4, %v12425_v14  ;;  %vm628_vm15 = vcmp.ge.s32.totalorder %v499_v15, %v6011_v4  ;;  %v1433_v22 = vand.u32 4294901760, %v1432_v27  ;;  %v1437_v18 = vsub.f32 %v6620_v37, %v12393_v42  ;;  %vm6663_vm5 = vmand %vm629_vm2, %vm759_vm6  ;;  %vm758_vm4 = vcmp.lt.s32.totalorder %v499_v15, %v6020_v11 }
  0x67   : > { %1330 = vmatpush.msrb.mxu0 %v12712_v7  ;;  %1429 = vmatpush.msrb.mxu3 %v1428_v5  ;;  %v12714_v31 = vsel %vm6663_vm5, 4294967295, %v12713_v31  ;;  %v12395_v7 = vand.u32 4294901760, %v6645_v19  ;;  %v12715_v63 = vand.u32 4294901760, %v6307_v35  ;;  %v1442_v62 = vsub.f32 %v6631_v52, %v12392_v60  ;;  %vm6677_vm8 = vmand %vm628_vm15, %vm758_vm4 }
  0x68   : > { %5196 = vmatpush.msk.msrb.mxu2 %vm6577_vm9, %v12425_v14  ;;  %5179 = vmatpush.msk.msrb.mxu1 %vm6137_vm7, %v12425_v14  ;;  %v12716_v5 = vmov 0  ;;  %v1015_v27 = vsel %vm6663_vm5, 0.0625, %v12422_v16  ;;  %v498_v15 = vadd.s32 152, %v6005_v1  ;;  %v6685_v35 = vand.u32 4294901760, %v1122_v49 }
  0x69   : > { %1333 = vmatpush.msrb.mxu0 %v12715_v63  ;;  %v12717_v5 = vsel %vm6677_vm8, 4294967295, %v12716_v5  ;;  %1434 = vmatpush.msrb.mxu3 %v1433_v22  ;;  %v1438_v36 = vand.u32 4294901760, %v1437_v18  ;;  %v1447_v63 = vsub.f32 %v6645_v19, %v12395_v7  ;;  %v6693_v60 = vsub.f32 %v1015_v27, %v1015_v27 }
  0x6a   : > { %5197 = vmatpush.msk.msrb.mxu2 %vm6596_vm14, %v12425_v14  ;;  %v1014_v42 = vsel %vm6677_vm8, 0.0625, %v12422_v16  ;;  %v12718_v8 = vand.u32 4294901760, %v6337_v51  ;;  %5180 = vmatpush.msk.msrb.mxu1 %vm6177_vm10, %v12425_v14  ;;  %v1443_v22 = vand.u32 4294901760, %v1442_v62  ;;  %vm627_vm7 = vcmp.ge.s32.totalorder %v498_v15, %v6011_v4 }
  0x6b   : > { %vm757_vm2 = vcmp.lt.s32.totalorder %v498_v15, %v6020_v11  ;;  %v6705_v18 = vsub.f32 %v1014_v42, %v1014_v42  ;;  %1439 = vmatpush.msrb.mxu3 %v1438_v36  ;;  %v1448_v27 = vand.u32 4294901760, %v1447_v63  ;;  %v12397_v51 = vand.u32 4294901760, %v6693_v60  ;;  %v1123_v15 = vld [vmem:[%s5999_s30 + $0x8] sm:$0xff]  ;;  %1236 = vmatmul.f32.vlgmr.msra.gmra.mxu1 %v6685_v35 }
  0x6c   : > { %1336 = vmatpush.msrb.mxu0 %v12718_v8  ;;  %5198 = vmatpush.msk.msrb.mxu2 %vm6622_vm1, %v12425_v14  ;;  %vm6711_vm6 = vmand %vm627_vm7, %vm757_vm2  ;;  %v6716_v47 = vsub.f32 %v1122_v49, %v6685_v35  ;;  %v497_v62 = vadd.s32 144, %v6005_v1  ;;  %v12721_v42 = vand.u32 4294901760, %v6370_v6  ;;  %vm12722_vm10 = vnez %v12670_v53 }
  0x6d   : > { %5181 = vmatpush.msk.msrb.mxu1 %vm12722_vm10, %v12425_v14  ;;  %v12398_v36 = vand.u32 4294901760, %v6705_v18  ;;  %v1013_v63 = vsel %vm6711_vm6, 0.0625, %v12422_v16  ;;  %v496_v7 = vadd.s32 136, %v6005_v1  ;;  %v495_v49 = vadd.s32 128, %v6005_v1  ;;  %1444 = vmatpush.msrb.mxu3 %v1443_v22 }
  0x6e   : > { %1339 = vmatpush.msrb.mxu0 %v12721_v42  ;;  %5199 = vmatpush.msk.msrb.mxu2 %vm6663_vm5, %v12425_v14  ;;  %v1452_v53 = vsub.f32 %v6693_v60, %v12397_v51  ;;  %v1148_v6 = vand.u32 4294901760, %v6716_v47  ;;  %vm626_vm15 = vcmp.ge.s32.totalorder %v497_v62, %v6011_v4  ;;  %vm756_vm4 = vcmp.lt.s32.totalorder %v497_v62, %v6020_v11 }
  0x6f   : > { %v12723_v42 = vand.u32 4294901760, %v6400_v46  ;;  %vm12724_vm7 = vnez %v12673_v61  ;;  %v1457_v22 = vsub.f32 %v6705_v18, %v12398_v36  ;;  %vm6748_vm2 = vmand %vm626_vm15, %vm756_vm4  ;;  %v6752_v51 = vsub.f32 %v1013_v63, %v1013_v63  ;;  %1449 = vmatpush.msrb.mxu3 %v1448_v27  ;;  %1274 = vmatmul.f32.vlgmr.msra.gmra.mxu2 %v6716_v47 }
  0x70   : > { %5182 = vmatpush.msk.msrb.mxu1 %vm12724_vm7, %v12425_v14  ;;  %vm625_vm10 = vcmp.ge.s32.totalorder %v496_v7, %v6011_v4  ;;  %v6755_v62 = vand.u32 4294901760, %v1123_v15  ;;  %5200 = vmatpush.msk.msrb.mxu2 %vm6677_vm8, %v12425_v14  ;;  %v1453_v61 = vand.u32 4294901760, %v1452_v53  ;;  %v1149_v46 = vsub.f32 %v6716_v47, %v1148_v6 }
  0x71   : > { %1342 = vmatpush.msrb.mxu0 %v12723_v42  ;;  %vm755_vm7 = vcmp.lt.s32.totalorder %v496_v7, %v6020_v11  ;;  %v1012_v42 = vsel %vm6748_vm2, 0.0625, %v12422_v16  ;;  %v12727_v63 = vand.u32 4294901760, %v6421_v12  ;;  %vm12728_vm15 = vnez %v12675_v3  ;;  %1297 = vmatmul.f32.vlgmr.msra.gmra.mxu3 %v1148_v6 }
  0x72   : > { %5183 = vmatpush.msk.msrb.mxu1 %vm12728_vm15, %v12425_v14  ;;  %v1458_v27 = vand.u32 4294901760, %v1457_v22  ;;  %v1461_v36 = vand.u32 4294901760, %v6752_v51  ;;  %vm6771_vm4 = vmand %vm625_vm10, %vm755_vm7  ;;  %v6775_v40 = vsub.f32 %v1012_v42, %v1012_v42  ;;  %vm624_vm8 = vcmp.ge.s32.totalorder %v495_v49, %v6011_v4  ;;  %1454 = vmatpush.msrb.mxu3 %v1453_v61 }
  0x73   : > { %1345 = vmatpush.msrb.mxu0 %v12727_v63  ;;  %5201 = vmatpush.msk.msrb.mxu2 %vm6711_vm6, %v12425_v14  ;;  %v1150_v12 = vand.u32 4294901760, %v1149_v46  ;;  %vm754_vm5 = vcmp.lt.s32.totalorder %v495_v49, %v6020_v11  ;;  %v1011_v3 = vsel %vm6771_vm4, 0.0625, %v12422_v16  ;;  %v6786_v7 = vsub.f32 %v1123_v15, %v6755_v62 }
  0x74   : > { %v12731_v22 = vand.u32 4294901760, %v6431_v24  ;;  %vm12732_vm10 = vnez %v12678_v17  ;;  %v1462_v61 = vsub.f32 %v6752_v51, %v1461_v36  ;;  %v1466_v49 = vand.u32 4294901760, %v6775_v40  ;;  %vm6797_vm7 = vmand %vm624_vm8, %vm754_vm5  ;;  %1459 = vmatpush.msrb.mxu3 %v1458_v27 }
  0x75   : > { %5184 = vmatpush.msk.msrb.mxu1 %vm12732_vm10, %v12425_v14  ;;  %v12733_v46 = vmov 0  ;;  %v6801_v42 = vsub.f32 %v1011_v3, %v1011_v3  ;;  %1151 = vmatmul.f32.vlgmr.msra.gmra.mxu0 %v1150_v12  ;;  %v1010_v24 = vsel %vm6797_vm7, 0.0625, %v12422_v16  ;;  %vm12735_vm5 = vnez %v12681_v44 }
  0x76   : > { %1348 = vmatpush.msrb.mxu0 %v12731_v22  ;;  %v12734_v46 = vsel %vm6797_vm7, 4294967295, %v12733_v46  ;;  %5202 = vmatpush.msk.msrb.mxu2 %vm6748_vm2, %v12425_v14  ;;  %v1463_v17 = vand.u32 4294901760, %v1462_v61  ;;  %v1467_v15 = vsub.f32 %v6775_v40, %v1466_v49  ;;  %v6814_v3 = vsub.f32 %v1010_v24, %v1010_v24 }
  0x77   : > { %v1471_v63 = vand.u32 4294901760, %v6801_v42  ;;  %5185 = vmatpush.msk.msrb.mxu1 %vm12735_vm5, %v12425_v14  ;;  %v1393_v27 = vand.u32 4294901760, %v6786_v7  ;;  %vm12736_vm8 = vnez %v12684_v55  ;;  %v12737_v55 = vand.u32 4294901760, %v6447_v21 }
  0x78   : > { %1486 = vmatpush.msra.mxu0 %v6447_v21  ;;  %1464 = vmatpush.msrb.mxu3 %v1463_v17  ;;  %v1468_v12 = vand.u32 4294901760, %v1467_v15  ;;  %v1476_v61 = vand.u32 4294901760, %v6814_v3  ;;  %vm12738_vm15 = vnez %v12686_v9  ;;  %v12739_v6 = vand.u32 4294901760, %v6483_v45 }
  0x79   : > { %5203 = vmatpush.msk.msrb.mxu2 %vm6771_vm4, %v12425_v14  ;;  %v1472_v22 = vsub.f32 %v6801_v42, %v1471_v63  ;;  %5186 = vmatpush.msk.msrb.mxu1 %vm12736_vm8, %v12425_v14  ;;  %v1394_v24 = vsub.f32 %v6786_v7, %v1393_v27  ;;  %vm12740_vm10 = vnez %v12691_v57  ;;  %vm12741_vm5 = vnez %v12689_v34 }
  0x7a   : > { %1488 = vmatpush.msra.mxu0 %v6483_v45  ;;  %1469 = vmatpush.msrb.mxu3 %v1468_v12  ;;  %v1477_v47 = vsub.f32 %v6814_v3, %v1476_v61  ;;  %v12742_v21 = vand.u32 4294901760, %v6493_v29  ;;  %v12743_v45 = vand.u32 4294901760, %v6520_v30  ;;  %v526_v57 = vadd.s32 376, %v6005_v1 }
  0x7b   : > { %5204 = vmatpush.msk.msrb.mxu2 %vm6797_vm7, %v12425_v14  ;;  %v1473_v44 = vand.u32 4294901760, %v1472_v22  ;;  %5187 = vmatpush.msk.msrb.mxu1 %vm12738_vm15, %v12425_v14  ;;  %v1395_v15 = vand.u32 4294901760, %v1394_v24  ;;  %v525_v9 = vadd.s32 368, %v6005_v1  ;;  %v12744_v34 = vand.u32 4294901760, %v6545_v41 }
  0x7c   : > { %1490 = vmatpush.msra.mxu0 %v6493_v29  ;;  %v1478_v17 = vand.u32 4294901760, %v1477_v47  ;;  %vm655_vm8 = vcmp.ge.s32.totalorder %v526_v57, %v6011_v4  ;;  %vm785_vm15 = vcmp.lt.s32.totalorder %v526_v57, %v6020_v11  ;;  %v12746_v32 = vand.u32 4294901760, %v6569_v23 }
  0x7d   : > { %1474 = vmatpush.msrb.mxu3 %v1473_v44  ;;  %1548 = vmatpush.msra.mxu2 %v12737_v55  ;;  %v12747_v29 = vand.u32 4294901760, %v6594_v38  ;;  %vm653_vm7 = vcmp.ge.s32.totalorder %v524_v0, %v6011_v4  ;;  %v12752_v33 = vand.u32 4294901760, %v6620_v37  ;;  %v521_v56 = vadd.s32 336, %v6005_v1 }
  0x7e   : > { %1492 = vmatpush.msra.mxu0 %v6520_v30  ;;  %5188 = vmatpush.msk.msrb.mxu1 %vm12741_vm5, %v12425_v14  ;;  %vm6909_vm5 = vmand %vm655_vm8, %vm785_vm15  ;;  %v12750_v30 = vmov 0  ;;  %v520_v12 = vadd.s32 328, %v6005_v1  ;;  %v12757_v47 = vand.u32 4294901760, %v6693_v60  ;;  %v518_v24 = vadd.s32 312, %v6005_v1 }
  0x7f   : > { %1479 = vmatpush.msrb.mxu3 %v1478_v17  ;;  %1551 = vmatpush.msra.mxu2 %v12739_v6  ;;  %v12758_v48 = vmov 0  ;;  %vm650_vm15 = vcmp.ge.s32.totalorder %v521_v56, %v6011_v4  ;;  %v12762_v50 = vmov 0  ;;  %v12764_v6 = vmov 0 }
  0x80   : > { %1494 = vmatpush.msra.mxu0 %v6545_v41  ;;  %5205 = vmatpush.msk.msra.mxu1 %vm12740_vm10, %v12425_v14  ;;  %v523_v41 = vadd.s32 352, %v6005_v1  ;;  %v12771_v57 = vmov 0  ;;  %v535_v54 = vadd.s32 448, %v6005_v1  ;;  %v534_v10 = vadd.s32 440, %v6005_v1 }
  0x81   : > { %5221 = vmatpush.msk.msra.mxu3 %vm12740_vm10, %v12425_v14  ;;  %1554 = vmatpush.msra.mxu2 %v12742_v21  ;;  %vm784_vm10 = vcmp.lt.s32.totalorder %v525_v9, %v6020_v11 }
  0x82   : > { %1496 = vmatpush.msra.mxu0 %v6569_v23  ;;  %1396 = vmatmul.f32.vlgmr.msrb.gmra.mxu2 %v1395_v15  ;;  %v12753_v23 = vand.u32 4294901760, %v6631_v52 }
  0x83   : > { %5222 = vmatpush.msk.msra.mxu3 %vm6459_vm13, %v12425_v14  ;;  %5206 = vmatpush.msk.msra.mxu1 %vm6459_vm13, %v12425_v14  ;;  %vm12745_vm13 = vnez %v12697_v28  ;;  %v12748_v28 = vmov 0 }
  0x84   : > { %1557 = vmatpush.msra.mxu2 %v12743_v45  ;;  %1498 = vmatpush.msra.mxu0 %v6594_v38  ;;  %v12749_v28 = vsel %vm6909_vm5, 4294967295, %v12748_v28  ;;  %v1041_v38 = vsel %vm6909_vm5, 0.0625, %v12422_v16 }
  0x85   : > { %5223 = vmatpush.msk.msra.mxu3 %vm6469_vm3, %v12425_v14  ;;  %1350 = vmatmul.f32.vlgmr.msrb.gmra.mxu0 %v6685_v35  ;;  %v6966_v22 = vsub.f32 %v1041_v38, %v1041_v38 }
  0x86   : > { %1481 = vmatmul.f32.vlgmr.msrb.gmra.mxu3 %v6755_v62  ;;  %5207 = vmatpush.msk.msra.mxu1 %vm6469_vm3, %v12425_v14  ;;  %vm654_vm3 = vcmp.ge.s32.totalorder %v525_v9, %v6011_v4 }
  0x87   : > { %1560 = vmatpush.msra.mxu2 %v12744_v34  ;;  %5224 = vmatpush.msk.msra.mxu3 %vm12745_vm13, %v12425_v14  ;;  %v12773_v34 = vmov 0 }
  0x88   : > { %1500 = vmatpush.msra.mxu0 %v6620_v37  ;;  %1371 = vmatmul.f32.vlgmr.msrb.gmra.mxu1 %v6685_v35  ;;  %v522_v35 = vadd.s32 344, %v6005_v1 }
  0x89   : > { %5208 = vmatpush.msk.msra.mxu1 %vm12745_vm13, %v12425_v14  ;;  %1563 = vmatpush.msra.mxu2 %v12746_v32  ;;  %vm6917_vm13 = vmand %vm654_vm3, %vm784_vm10  ;;  %vm780_vm3 = vcmp.lt.s32.totalorder %v521_v56, %v6020_v11 }
  0x8a   : > { %5225 = vmatpush.msk.msra.mxu3 %vm6508_vm12, %v12425_v14  ;;  %1502 = vmatpush.msra.mxu0 %v6631_v52  ;;  %v12751_v30 = vsel %vm6917_vm13, 4294967295, %v12750_v30  ;;  %v1040_v37 = vsel %vm6917_vm13, 0.0625, %v12422_v16  ;;  %v12756_v52 = vand.u32 4294901760, %v6645_v19 }
  0x8b   : > { %5209 = vmatpush.msk.msra.mxu1 %vm6508_vm12, %v12425_v14  ;;  %1566 = vmatpush.msra.mxu2 %v12747_v29  ;;  %vm783_vm12 = vcmp.lt.s32.totalorder %v524_v0, %v6020_v11  ;;  %v6968_v44 = vsub.f32 %v1040_v37, %v1040_v37  ;;  %v514_v0 = vadd.s32 280, %v6005_v1 }
  0x8c   : > { %5226 = vmatpush.msk.msra.mxu3 %vm6541_vm0, %v12425_v14  ;;  %1504 = vmatpush.msra.mxu0 %v6645_v19  ;;  %vm6938_vm8 = vmand %vm653_vm7, %vm783_vm12  ;;  %v519_v19 = vadd.s32 320, %v6005_v1  ;;  %vm781_vm7 = vcmp.lt.s32.totalorder %v522_v35, %v6020_v11  ;;  %vm779_vm12 = vcmp.lt.s32.totalorder %v520_v12, %v6020_v11 }
  0x8d   : > { %5210 = vmatpush.msk.msra.mxu1 %vm6541_vm0, %v12425_v14  ;;  %1569 = vmatpush.msra.mxu2 %v12752_v33  ;;  %v12755_v13 = vsel %vm6938_vm8, 4294967295, %v12754_v13  ;;  %vm652_vm0 = vcmp.ge.s32.totalorder %v523_v41, %v6011_v4  ;;  %v1039_v59 = vsel %vm6938_vm8, 0.0625, %v12422_v16  ;;  %v12420_v17 = vand.u32 4294901760, %v6968_v44 }
  0x8e   : > { %5227 = vmatpush.msk.msra.mxu3 %vm6565_vm11, %v12425_v14  ;;  %1506 = vmatpush.msra.mxu0 %v6693_v60  ;;  %v12760_v60 = vand.u32 4294901760, %v6705_v18  ;;  %v7001_v55 = vsub.f32 %v1039_v59, %v1039_v59  ;;  %vm778_vm10 = vcmp.lt.s32.totalorder %v519_v19, %v6020_v11  ;;  %v12782_v59 = vmov 0 }
  0x8f   : > { %5211 = vmatpush.msk.msra.mxu1 %vm6565_vm11, %v12425_v14  ;;  %1572 = vmatpush.msra.mxu2 %v12753_v23  ;;  %vm782_vm11 = vcmp.lt.s32.totalorder %v523_v41, %v6020_v11  ;;  %v513_v23 = vadd.s32 272, %v6005_v1 }
  0x90   : > { %5228 = vmatpush.msk.msra.mxu3 %vm6577_vm9, %v12425_v14  ;;  %1508 = vmatpush.msra.mxu0 %v6705_v18  ;;  %v12421_v18 = vand.u32 4294901760, %v6966_v22  ;;  %v12418_v21 = vand.u32 4294901760, %v7001_v55 }
  0x91   : > { %5212 = vmatpush.msk.msra.mxu1 %vm6577_vm9, %v12425_v14  ;;  %1575 = vmatpush.msra.mxu2 %v12756_v52  ;;  %vm651_vm9 = vcmp.ge.s32.totalorder %v522_v35, %v6011_v4 }
  0x92   : > { %5229 = vmatpush.msk.msra.mxu3 %vm6596_vm14, %v12425_v14  ;;  %1510 = vmatpush.msra.mxu0 %v6752_v51  ;;  %v12768_v51 = vmov 0 }
  0x93   : > { %5213 = vmatpush.msk.msra.mxu1 %vm6596_vm14, %v12425_v14  ;;  %1578 = vmatpush.msra.mxu2 %v12757_v47  ;;  %vm6990_vm14 = vmand %vm652_vm0, %vm782_vm11  ;;  %vm12761_vm0 = vnez %v12714_v31  ;;  %v517_v31 = vadd.s32 304, %v6005_v1 }
  0x94   : > { %5230 = vmatpush.msk.msra.mxu3 %vm6622_vm1, %v12425_v14  ;;  %1512 = vmatpush.msra.mxu0 %v6775_v40  ;;  %v12759_v48 = vsel %vm6990_vm14, 4294967295, %v12758_v48  ;;  %vm7011_vm11 = vmand %vm651_vm9, %vm781_vm7  ;;  %v1038_v15 = vsel %vm6990_vm14, 0.0625, %v12422_v16  ;;  %vm647_vm7 = vcmp.ge.s32.totalorder %v518_v24, %v6011_v4  ;;  %v515_v40 = vadd.s32 288, %v6005_v1 }
  0x95   : > { %5214 = vmatpush.msk.msra.mxu1 %vm6622_vm1, %v12425_v14  ;;  %1581 = vmatpush.msra.mxu2 %v12760_v60  ;;  %v12763_v50 = vsel %vm7011_vm11, 4294967295, %v12762_v50  ;;  %vm7028_vm9 = vmand %vm650_vm15, %vm780_vm3  ;;  %vm777_vm1 = vcmp.lt.s32.totalorder %v518_v24, %v6020_v11  ;;  %vm12767_vm15 = vcmp.ge.s32.totalorder %v520_v12, %v6011_v4  ;;  %v1037_v45 = vsel %vm7011_vm11, 0.0625, %v12422_v16 }
  0x96   : > { %5231 = vmatpush.msk.msra.mxu3 %vm12761_vm0, %v12425_v14  ;;  %1514 = vmatpush.msra.mxu0 %v6801_v42  ;;  %v12765_v6 = vsel %vm7028_vm9, 4294967295, %v12764_v6  ;;  %vm7046_vm3 = vmand %vm12767_vm15, %vm779_vm12  ;;  %vm12770_vm12 = vcmp.ge.s32.totalorder %v519_v19, %v6011_v4  ;;  %v7077_v9 = vsub.f32 %v1038_v15, %v1038_v15  ;;  %v7107_v8 = vsub.f32 %v1037_v45, %v1037_v45 }
  0x97   : > { %5215 = vmatpush.msk.msra.mxu1 %vm12761_vm0, %v12425_v14  ;;  %1584 = vmatpush.msra.mxu2 %v1461_v36  ;;  %vm12766_vm0 = vnez %v12717_v5  ;;  %v12769_v51 = vsel %vm7046_vm3, 4294967295, %v12768_v51  ;;  %v516_v36 = vadd.s32 296, %v6005_v1  ;;  %vm7063_vm15 = vmand %vm12770_vm12, %vm778_vm10  ;;  %v7075_v5 = vsub.f32 %v6966_v22, %v12421_v18 }
  0x98   : > { %5232 = vmatpush.msk.msra.mxu3 %vm12766_vm0, %v12425_v14  ;;  %1516 = vmatpush.msra.mxu0 %v6814_v3  ;;  %v12772_v57 = vsel %vm7063_vm15, 4294967295, %v12771_v57  ;;  %vm7083_vm10 = vmand %vm647_vm7, %vm777_vm1  ;;  %vm646_vm1 = vcmp.ge.s32.totalorder %v517_v31, %v6011_v4  ;;  %vm776_vm7 = vcmp.lt.s32.totalorder %v517_v31, %v6020_v11  ;;  %v1036_v32 = vsel %vm7028_vm9, 0.0625, %v12422_v16  ;;  %v1124_v31 = vld [vmem:[%s5999_s30 + $0x10] sm:$0xff] }
  0x99   : > { %1519 = vmatmul.f32.vlgmr.msra.gmra.mxu0 %v6786_v7  ;;  %5216 = vmatpush.msk.msra.mxu1 %vm12766_vm0, %v12425_v14  ;;  %v12774_v34 = vsel %vm7083_vm10, 4294967295, %v12773_v34  ;;  %vm775_vm0 = vcmp.lt.s32.totalorder %v516_v36, %v6020_v11  ;;  %v7123_v42 = vsub.f32 %v7001_v55, %v12418_v21  ;;  %v1034_v29 = vsel %vm7063_vm15, 0.0625, %v12422_v16 }
  0x9a   : > { %1587 = vmatpush.msra.mxu2 %v1466_v49  ;;  %5233 = vmatpush.msk.msra.mxu3 %vm6711_vm6, %v12425_v14  ;;  %v7097_v49 = vsub.f32 %v6968_v44, %v12420_v17  ;;  %v1033_v33 = vsel %vm7083_vm10, 0.0625, %v12422_v16  ;;  %v12417_v20 = vand.u32 4294901760, %v7077_v9  ;;  %v7154_v3 = vsub.f32 %v1036_v32, %v1036_v32 }
  0x9b   : > { %5237 = vmatpush.msk.msrb.mxu0 %vm6909_vm5, %v12425_v14  ;;  %5217 = vmatpush.msk.msra.mxu1 %vm6711_vm6, %v12425_v14  ;;  %vm774_vm6 = vcmp.lt.s32.totalorder %v515_v40, %v6020_v11  ;;  %vm12777_vm10 = vcmp.ge.s32.totalorder %v516_v36, %v6011_v4  ;;  %vm773_vm12 = vcmp.lt.s32.totalorder %v514_v0, %v6020_v11  ;;  %v12415_v38 = vand.u32 4294901760, %v7107_v8 }
  0x9c   : > { %1590 = vmatpush.msra.mxu2 %v1471_v63  ;;  %5234 = vmatpush.msk.msra.mxu3 %vm6748_vm2, %v12425_v14  ;;  %v1035_v63 = vsel %vm7046_vm3, 0.0625, %v12422_v16  ;;  %v7174_v35 = vsub.f32 %v1034_v29, %v1034_v29  ;;  %v7176_v56 = vsub.f32 %v1033_v33, %v1033_v33  ;;  %v1648_v52 = vand.u32 4294901760, %v7075_v5 }
  0x9d   : > { %5238 = vmatpush.msk.msrb.mxu0 %vm6917_vm13, %v12425_v14  ;;  %5218 = vmatpush.msk.msra.mxu1 %vm6748_vm2, %v12425_v14  ;;  %vm7144_vm2 = vmand %vm646_vm1, %vm776_vm7  ;;  %vm643_vm7 = vcmp.ge.s32.totalorder %v514_v0, %v6011_v4  ;;  %v7172_v37 = vsub.f32 %v1035_v63, %v1035_v63  ;;  %v1653_v53 = vand.u32 4294901760, %v7097_v49  ;;  %v1658_v12 = vand.u32 4294901760, %v7123_v42 }
  0x9e   : > { %1593 = vmatpush.msra.mxu2 %v1476_v61  ;;  %5235 = vmatpush.msk.msra.mxu3 %vm6771_vm4, %v12425_v14  ;;  %vm7160_vm1 = vmand %vm12777_vm10, %vm775_vm0  ;;  %v12778_v61 = vmov 0  ;;  %vm12780_vm10 = vnez %v12734_v46  ;;  %v1662_v19 = vsub.f32 %v7077_v9, %v12417_v20  ;;  %v1032_v47 = vsel %vm7144_vm2, 0.0625, %v12422_v16 }
  0x9f   : > { %5239 = vmatpush.msk.msrb.mxu0 %vm6938_vm8, %v12425_v14  ;;  %1595 = vmatmul.f32.vlgmr.msra.gmra.mxu2 %v6755_v62  ;;  %v12779_v61 = vsel %vm7160_vm1, 4294967295, %v12778_v61  ;;  %v12784_v24 = vmov 0  ;;  %v512_v60 = vadd.s32 264, %v6005_v1  ;;  %v12414_v15 = vand.u32 4294901760, %v7154_v3 }
  0xa0   : > { %1731 = vmatpush.msrb.mxu2 %v6966_v22  ;;  %5219 = vmatpush.msk.msra.mxu1 %vm6771_vm4, %v12425_v14  ;;  %vm12781_vm4 = vcmp.ge.s32.totalorder %v515_v40, %v6011_v4  ;;  %v542_v36 = vadd.s32 504, %v6005_v1  ;;  %v1667_v46 = vsub.f32 %v7107_v8, %v12415_v38  ;;  %v12413_v45 = vand.u32 4294901760, %v7172_v37 }
  0xa1   : > { %5236 = vmatpush.msk.msra.mxu3 %vm12780_vm10, %v12425_v14  ;;  %5240 = vmatpush.msk.msrb.mxu0 %vm6990_vm14, %v12425_v14  ;;  %vm7191_vm0 = vmand %vm12781_vm4, %vm774_vm6  ;;  %v12409_v5 = vand.u32 4294901760, %v7174_v35  ;;  %v12412_v40 = vand.u32 4294901760, %v7176_v56  ;;  %v7238_v49 = vsub.f32 %v1032_v47, %v1032_v47  ;;  %v12787_v32 = vmov 0 }
  0xa2   : > { %v12783_v59 = vsel %vm7191_vm0, 4294967295, %v12782_v59  ;;  %1616 = vmatmul.f32.vlgmr.msra.gmra.mxu3 %v6755_v62  ;;  %1733 = vmatpush.msrb.mxu2 %v6968_v44  ;;  %vm7207_vm6 = vmand %vm643_vm7, %vm773_vm12  ;;  %v1031_v62 = vsel %vm7160_vm1, 0.0625, %v12422_v16  ;;  %vm642_vm12 = vcmp.ge.s32.totalorder %v513_v23, %v6011_v4  ;;  %vm772_vm7 = vcmp.lt.s32.totalorder %v513_v23, %v6020_v11 }
  0xa3   : > { %v12785_v24 = vsel %vm7207_vm6, 4294967295, %v12784_v24  ;;  %5253 = vmatpush.msk.msrb.mxu3 %vm6909_vm5, %v12425_v14  ;;  %5220 = vmatpush.msk.msra.mxu1 %vm12780_vm10, %v12425_v14  ;;  %v7240_v0 = vsub.f32 %v1031_v62, %v1031_v62  ;;  %v1030_v7 = vsel %vm7191_vm0, 0.0625, %v12422_v16  ;;  %vm7258_vm10 = vmand %vm642_vm12, %vm772_vm7  ;;  %vm641_vm4 = vcmp.ge.s32.totalorder %v512_v60, %v6011_v4 }
  0xa4   : > { %12786 = vst [vmem:[#allocation16_spill] sm:$0xff] %v12785_v24  ;;  %5241 = vmatpush.msk.msrb.mxu0 %vm7011_vm11, %v12425_v14  ;;  %1542 = vmatmul.f32.vlgmr.msra.gmra.mxu1 %v1393_v27  ;;  %v1029_v27 = vsel %vm7207_vm6, 0.0625, %v12422_v16  ;;  %v12788_v32 = vsel %vm7258_vm10, 4294967295, %v12787_v32  ;;  %vm771_vm5 = vcmp.lt.s32.totalorder %v512_v60, %v6020_v11  ;;  %v511_v42 = vadd.s32 256, %v6005_v1 }
  0xa5   : > { %1649 = vmatpush.msrb.mxu1 %v1648_v52  ;;  %1735 = vmatpush.msrb.mxu2 %v7001_v55  ;;  %12789 = vst [vmem:[#allocation17_spill] sm:$0xff] %v12788_v32  ;;  %v7265_v63 = vand.u32 4294901760, %v1124_v31  ;;  %v1663_v29 = vand.u32 4294901760, %v1662_v19  ;;  %v1672_v33 = vsub.f32 %v7154_v3, %v12414_v15  ;;  %vm801_vm7 = vcmp.lt.s32.totalorder %v542_v36, %v6020_v11  ;;  %vm7300_vm12 = vmand %vm641_vm4, %vm771_vm5 }
  0xa6   : > { %5254 = vmatpush.msk.msrb.mxu3 %vm6917_vm13, %v12425_v14  ;;  %5242 = vmatpush.msk.msrb.mxu0 %vm7028_vm9, %v12425_v14  ;;  %v1668_v23 = vand.u32 4294901760, %v1667_v46  ;;  %v1677_v52 = vsub.f32 %v7172_v37, %v12413_v45  ;;  %v7290_v19 = vsub.f32 %v7176_v56, %v12412_v40  ;;  %v12416_v47 = vand.u32 4294901760, %v7238_v49 }
  0xa7   : > { %1654 = vmatpush.msrb.mxu1 %v1653_v53  ;;  %1737 = vmatpush.msrb.mxu2 %v7077_v9  ;;  %v7285_v53 = vsub.f32 %v7174_v35, %v12409_v5  ;;  %v7294_v62 = vsub.f32 %v1030_v7, %v1030_v7  ;;  %v12790_v46 = vmov 0  ;;  %v7304_v5 = vsub.f32 %v1029_v27, %v1029_v27 }
  0xa8   : > { %5255 = vmatpush.msk.msrb.mxu3 %vm6938_vm8, %v12425_v14  ;;  %5243 = vmatpush.msk.msrb.mxu0 %vm7046_vm3, %v12425_v14  ;;  %v12791_v46 = vsel %vm7300_vm12, 4294967295, %v12790_v46  ;;  %v12419_v60 = vand.u32 4294901760, %v7240_v0  ;;  %vm770_vm4 = vcmp.lt.s32.totalorder %v511_v42, %v6020_v11  ;;  %v7319_v7 = vsub.f32 %v1124_v31, %v7265_v63 }
  0xa9   : > { %1659 = vmatpush.msrb.mxu1 %v1658_v12  ;;  %1739 = vmatpush.msrb.mxu2 %v7107_v8  ;;  %12792 = vst [vmem:[#allocation18_spill] sm:$0xff] %v12791_v46  ;;  %v1028_v12 = vsel %vm7258_vm10, 0.0625, %v12422_v16  ;;  %vm12793_vm8 = vcmp.ge.s32.totalorder %v542_v36, %v6011_v4  ;;  %v12794_v27 = vmov 0  ;;  %v1673_v40 = vand.u32 4294901760, %v1672_v33 }
  0xaa   : > { %5256 = vmatpush.msk.msrb.mxu3 %vm6990_vm14, %v12425_v14  ;;  %5244 = vmatpush.msk.msrb.mxu0 %vm7063_vm15, %v12425_v14  ;;  %vm7325_vm13 = vmand %vm12793_vm8, %vm801_vm7  ;;  %v541_v45 = vadd.s32 496, %v6005_v1  ;;  %vm12796_vm5 = vnez %v12774_v34  ;;  %v1678_v31 = vand.u32 4294901760, %v1677_v52  ;;  %v1683_v36 = vand.u32 4294901760, %v7285_v53 }
  0xab   : > { %v12795_v27 = vsel %vm7325_vm13, 4294967295, %v12794_v27  ;;  %1664 = vmatpush.msrb.mxu1 %v1663_v29  ;;  %1741 = vmatpush.msrb.mxu2 %v7154_v3  ;;  %v7338_v15 = vsub.f32 %v1028_v12, %v1028_v12  ;;  %v1027_v29 = vsel %vm7300_vm12, 0.0625, %v12422_v16  ;;  %v1688_v33 = vand.u32 4294901760, %v7290_v19 }
  0xac   : > { %5257 = vmatpush.msk.msrb.mxu3 %vm7011_vm11, %v12425_v14  ;;  %5245 = vmatpush.msk.msrb.mxu0 %vm12796_vm5, %v12425_v14  ;;  %v1692_v38 = vsub.f32 %v7238_v49, %v12416_v47  ;;  %vm12797_vm8 = vcmp.ge.s32.totalorder %v511_v42, %v6011_v4  ;;  %v12798_v52 = vmov 0  ;;  %v540_v53 = vadd.s32 488, %v6005_v1 }
  0xad   : > { %1669 = vmatpush.msrb.mxu1 %v1668_v23  ;;  %1743 = vmatpush.msrb.mxu2 %v7172_v37  ;;  %vm7352_vm7 = vmand %vm12797_vm8, %vm770_vm4  ;;  %v1057_v23 = vsel %vm7325_vm13, 0.0625, %v12422_v16  ;;  %v7369_v42 = vsub.f32 %v7240_v0, %v12419_v60  ;;  %v12430_v19 = vand.u32 4294901760, %v7319_v7  ;;  %v12427_v12 = vand.u32 4294901760, %v7294_v62 }
  0xae   : > { %v12799_v52 = vsel %vm7352_vm7, 4294967295, %v12798_v52  ;;  %5258 = vmatpush.msk.msrb.mxu3 %vm7028_vm9, %v12425_v14  ;;  %5246 = vmatpush.msk.msrb.mxu0 %vm7144_vm2, %v12425_v14  ;;  %v7375_v20 = vsub.f32 %v1027_v29, %v1027_v29  ;;  %v539_v21 = vadd.s32 480, %v6005_v1  ;;  %v1026_v29 = vsel %vm7352_vm7, 0.0625, %v12422_v16 }
  0xaf   : > { %1674 = vmatpush.msrb.mxu1 %v1673_v40  ;;  %1745 = vmatpush.msrb.mxu2 %v7174_v35  ;;  %v7390_v60 = vsub.f32 %v1057_v23, %v1057_v23  ;;  %v538_v17 = vadd.s32 472, %v6005_v1  ;;  %v1693_v18 = vand.u32 4294901760, %v1692_v38  ;;  %v537_v47 = vadd.s32 464, %v6005_v1 }
  0xb0   : > { %5259 = vmatpush.msk.msrb.mxu3 %vm7046_vm3, %v12425_v14  ;;  %5247 = vmatpush.msk.msrb.mxu0 %vm7160_vm1, %v12425_v14  ;;  %v1698_v23 = vand.u32 4294901760, %v7369_v42  ;;  %v1639_v38 = vsub.f32 %v7319_v7, %v12430_v19  ;;  %v12801_v16 = vand.u32 4294901760, %v7304_v5  ;;  %vm12802_vm4 = vcmp.lt.s32.totalorder %v541_v45, %v6020_v11 }
  0xb1   : > { %12800 = vst [vmem:[#allocation19_spill] sm:$0xff] %v7390_v60  ;;  %1679 = vmatpush.msrb.mxu1 %v1678_v31  ;;  %1747 = vmatpush.msrb.mxu2 %v7176_v56  ;;  %v1702_v31 = vsub.f32 %v7294_v62, %v12427_v12  ;;  %vm12803_vm8 = vcmp.ge.s32.totalorder %v541_v45, %v6011_v4  ;;  %v12808_v45 = vand.u32 4294901760, %v7338_v15  ;;  %v12811_v19 = vmov 0 }
  0xb2   : > { %5260 = vmatpush.msk.msrb.mxu3 %vm7063_vm15, %v12425_v14  ;;  %5248 = vmatpush.msk.msrb.mxu0 %vm7191_vm0, %v12425_v14  ;;  %v7413_v40 = vsub.f32 %v7304_v5, %v12801_v16  ;;  %vm7419_vm15 = vmand %vm12803_vm8, %vm12802_vm4  ;;  %v12804_v14 = vmov 0  ;;  %v7424_v42 = vsub.f32 %v1026_v29, %v1026_v29  ;;  %v12807_v16 = vmov 0.0625  }
  0xb3   : > { %v12805_v14 = vsel %vm7419_vm15, 4294967295, %v12804_v14  ;;  %1684 = vmatpush.msrb.mxu1 %v1683_v36  ;;  %1749 = vmatpush.msrb.mxu2 %v7238_v49  ;;  %v7438_v36 = vsub.f32 %v7338_v15, %v12808_v45  ;;  %vm12809_vm4 = vcmp.lt.s32.totalorder %v540_v53, %v6020_v11  ;;  %vm12810_vm8 = vcmp.ge.s32.totalorder %v540_v53, %v6011_v4 }
  0xb4   : > { %12806 = vst [vmem:[#allocation20_spill] sm:$0xff] %v12805_v14  ;;  %5261 = vmatpush.msk.msrb.mxu3 %vm12796_vm5, %v12807_v16  ;;  %5249 = vmatpush.msk.msrb.mxu0 %vm7207_vm6, %v12807_v16  ;;  %vm7445_vm3 = vmand %vm12810_vm8, %vm12809_vm4  ;;  %vm797_vm5 = vcmp.lt.s32.totalorder %v538_v17, %v6020_v11  ;;  %v12813_v12 = vmov 0.0   ;;  %vm796_vm14 = vcmp.lt.s32.totalorder %v537_v47, %v6020_v11  ;;  %v536_v53 = vadd.s32 456, %v6005_v1 }
  0xb5   : > { %v12812_v19 = vsel %vm7445_vm3, 4294967295, %v12811_v19  ;;  %1689 = vmatpush.msrb.mxu1 %v1688_v33  ;;  %1751 = vmatpush.msrb.mxu2 %v7240_v0  ;;  %v1056_v45 = vsel %vm7419_vm15, 0.0625, %v12813_v12  ;;  %v1703_v33 = vand.u32 4294901760, %v1702_v31  ;;  %vm12814_vm4 = vcmp.lt.s32.totalorder %v539_v21, %v6020_v11 }
  0xb6   : > { %5262 = vmatpush.msk.msrb.mxu3 %vm7144_vm2, %v12807_v16  ;;  %5250 = vmatpush.msk.msrb.mxu0 %vm7258_vm10, %v12807_v16  ;;  %vm12815_vm8 = vcmp.ge.s32.totalorder %v539_v21, %v6011_v4  ;;  %v12816_v29 = vmov 0  ;;  %v1640_v39 = vand.u32 4294901760, %v1639_v38  ;;  %v1708_v2 = vand.u32 4294901760, %v7413_v40 }
  0xb7   : > { %vm7468_vm9 = vmand %vm12815_vm8, %vm12814_vm4  ;;  %1694 = vmatpush.msrb.mxu1 %v1693_v18  ;;  %1753 = vmatpush.msrb.mxu2 %v7294_v62  ;;  %v1055_v31 = vsel %vm7445_vm3, 0.0625, %v12813_v12  ;;  %vm12818_vm11 = vcmp.ge.s32.totalorder %v538_v17, %v6011_v4  ;;  %v12819_v21 = vmov 0  ;;  %v1713_v18 = vand.u32 4294901760, %v7438_v36 }
  0xb8   : > { %v12817_v29 = vsel %vm7468_vm9, 4294967295, %v12816_v29  ;;  %vm7482_vm4 = vmand %vm12818_vm11, %vm797_vm5  ;;  %5263 = vmatpush.msk.msrb.mxu3 %vm7160_vm1, %v12807_v16  ;;  %5251 = vmatpush.msk.msrb.mxu0 %vm7300_vm12, %v12807_v16  ;;  %v12821_v40 = vand.u32 4294901760, %v7375_v20  ;;  %v7497_v38 = vsub.f32 %v1056_v45, %v1056_v45  ;;  %v12456_v58 = vand.u32 4294901760, %v7424_v42 }
  0xb9   : > { %v12820_v21 = vsel %vm7482_vm4, 4294967295, %v12819_v21  ;;  %vm12822_vm11 = vcmp.ge.s32.totalorder %v537_v47, %v6011_v4  ;;  %1699 = vmatpush.msrb.mxu1 %v1698_v23  ;;  %1755 = vmatpush.msrb.mxu2 %v7304_v5  ;;  %v12825_v36 = vand.u32 4294901760, %v7390_v60  ;;  %v1054_v45 = vsel %vm7468_vm9, 0.0625, %v12813_v12 }
  0xba   : > { %v1717_v17 = vsub.f32 %v7375_v20, %v12821_v40  ;;  %vm7504_vm5 = vmand %vm12822_vm11, %vm796_vm14  ;;  %5264 = vmatpush.msk.msrb.mxu3 %vm7191_vm0, %v12807_v16  ;;  %5252 = vmatpush.msk.msrb.mxu0 %vm7352_vm7, %v12807_v16  ;;  %v7525_v47 = vsub.f32 %v1055_v31, %v1055_v31  ;;  %v1053_v23 = vsel %vm7482_vm4, 0.0625, %v12813_v12  ;;  %vm794_vm11 = vcmp.lt.s32.totalorder %v535_v54, %v6020_v11 }
  0xbb   : > { %v7512_v26 = vsub.f32 %v7390_v60, %v12825_v36  ;;  %1641 = vmatmul.f32.vlgmr.msrb.gmra.mxu0 %v1640_v39  ;;  %1704 = vmatpush.msrb.mxu1 %v1703_v33  ;;  %v1052_v40 = vsel %vm7504_vm5, 0.0625, %v12813_v12  ;;  %v533_v31 = vadd.s32 432, %v6005_v1  ;;  %v1722_v39 = vsub.f32 %v7424_v42, %v12456_v58 }
  0xbc   : > { %1757 = vmatpush.msrb.mxu2 %v7338_v15  ;;  %5265 = vmatpush.msk.msrb.mxu3 %vm7207_vm6, %v12807_v16  ;;  %v12458_v33 = vand.u32 4294901760, %v7497_v38  ;;  %v7546_v36 = vsub.f32 %v1054_v45, %v1054_v45  ;;  %vm12826_vm8 = vcmp.lt.s32.totalorder %v536_v53, %v6020_v11  ;;  %vm12827_vm1 = vcmp.ge.s32.totalorder %v536_v53, %v6011_v4 }
  0xbd   : > { %vm7552_vm14 = vmand %vm12827_vm1, %vm12826_vm8  ;;  %v12830_v60 = vand.u32 4294901760, %v6966_v22  ;;  %1709 = vmatpush.msrb.mxu1 %v1708_v2  ;;  %v1718_v24 = vand.u32 4294901760, %v1717_v17  ;;  %vm12831_vm6 = vcmp.ge.s32.totalorder %v535_v54, %v6011_v4  ;;  %v532_v58 = vadd.s32 424, %v6005_v1 }
  0xbe   : > { %vm7562_vm0 = vmand %vm12831_vm6, %vm794_vm11  ;;  %1759 = vmatpush.msrb.mxu2 %v7375_v20  ;;  %5266 = vmatpush.msk.msrb.mxu3 %vm7258_vm10, %v12807_v16  ;;  %v1893_v22 = vand.u32 4294901760, %v7512_v26  ;;  %v7575_v53 = vsub.f32 %v1052_v40, %v1052_v40  ;;  %vm12834_vm1 = vcmp.lt.s32.totalorder %v534_v10, %v6020_v11  ;;  %vm12835_vm6 = vcmp.ge.s32.totalorder %v534_v10, %v6011_v4 }
  0xbf   : > { %1793 = vmatpush.msra.mxu0 %v12830_v60  ;;  %v7573_v60 = vsub.f32 %v1053_v23, %v1053_v23  ;;  %vm7581_vm8 = vmand %vm12835_vm6, %vm12834_vm1  ;;  %v12838_v17 = vand.u32 4294901760, %v6968_v44  ;;  %1714 = vmatpush.msrb.mxu1 %v1713_v18  ;;  %v1051_v26 = vsel %vm7552_vm14, 0.0625, %v12813_v12  ;;  %vm662_vm11 = vcmp.ge.s32.totalorder %v533_v31, %v6011_v4 }
  0xc0   : > { %vm792_vm10 = vcmp.lt.s32.totalorder %v533_v31, %v6020_v11  ;;  %v531_v23 = vadd.s32 416, %v6005_v1  ;;  %1761 = vmatpush.msrb.mxu2 %v7424_v42  ;;  %5267 = vmatpush.msk.msrb.mxu3 %vm7300_vm12, %v12807_v16  ;;  %v1723_v10 = vand.u32 4294901760, %v1722_v39  ;;  %v1897_v44 = vsub.f32 %v7497_v38, %v12458_v33 }
  0xc1   : > { %1796 = vmatpush.msra.mxu0 %v12838_v17  ;;  %v1050_v40 = vsel %vm7562_vm0, 0.0625, %v12813_v12  ;;  %v12839_v17 = vand.u32 4294901760, %v7001_v55  ;;  %1764 = vmatmul.f32.vlgmr.msrb.gmra.mxu2 %v7319_v7  ;;  %v1049_v2 = vsel %vm7581_vm8, 0.0625, %v12813_v12  ;;  %v530_v39 = vadd.s32 408, %v6005_v1  ;;  %vm7627_vm1 = vmand %vm662_vm11, %vm792_vm10 }
  0xc2   : > { %5285 = vmatpush.msk.msra.mxu2 %vm7325_vm13, %v12807_v16  ;;  %1719 = vmatpush.msrb.mxu1 %v1718_v24  ;;  %v12840_v55 = vand.u32 4294901760, %v7525_v47  ;;  %v7620_v18 = vsub.f32 %v1051_v26, %v1051_v26  ;;  %v12843_v24 = vand.u32 4294901760, %v7077_v9  ;;  %v529_v26 = vadd.s32 400, %v6005_v1 }
  0xc3   : > { %1799 = vmatpush.msra.mxu0 %v12839_v17  ;;  %5268 = vmatpush.msk.msrb.mxu3 %vm7352_vm7, %v12807_v16  ;;  %v12844_v31 = vand.u32 4294901760, %v7319_v7  ;;  %v1898_v46 = vand.u32 4294901760, %v1897_v44  ;;  %v12845_v33 = vand.u32 4294901760, %v7546_v36  ;;  %vm12846_vm10 = vcmp.lt.s32.totalorder %v532_v58, %v6020_v11 }
  0xc4   : > { %v1902_v17 = vsub.f32 %v7525_v47, %v12840_v55  ;;  %v7636_v55 = vsub.f32 %v1050_v40, %v1050_v40  ;;  %5286 = vmatpush.msk.msra.mxu2 %vm7419_vm15, %v12807_v16  ;;  %v7649_v40 = vsub.f32 %v1049_v2, %v1049_v2  ;;  %vm12847_vm11 = vcmp.ge.s32.totalorder %v532_v58, %v6011_v4 }
  0xc5   : > { %1802 = vmatpush.msra.mxu0 %v12843_v24  ;;  %1787 = vmatmul.f32.vlgmr.msrb.gmra.mxu3 %v12844_v31  ;;  %v1907_v9 = vsub.f32 %v7546_v36, %v12845_v33  ;;  %vm7655_vm6 = vmand %vm12847_vm11, %vm12846_vm10  ;;  %v1048_v7 = vsel %vm7627_vm1, 0.0625, %v12813_v12  ;;  %v528_v33 = vadd.s32 392, %v6005_v1  ;;  %v12850_v2 = vand.u32 4294901760, %v7107_v8 }
  0xc6   : > { %1894 = vmatpush.msra.mxu3 %v1893_v22  ;;  %1724 = vmatpush.msrb.mxu1 %v1723_v10  ;;  %v1903_v58 = vand.u32 4294901760, %v1902_v17  ;;  %v12851_v44 = vand.u32 4294901760, %v7573_v60  ;;  %v12852_v10 = vand.u32 4294901760, %v7575_v53  ;;  %v12476_v14 = vand.u32 4294901760, %v7620_v18 }
  0xc7   : > { %1805 = vmatpush.msra.mxu0 %v12850_v2  ;;  %1726 = vmatmul.f32.vlgmr.msrb.gmra.mxu1 %v7265_v63  ;;  %vm12853_vm10 = vcmp.lt.s32.totalorder %v531_v23, %v6020_v11  ;;  %vm12854_vm11 = vcmp.ge.s32.totalorder %v531_v23, %v6011_v4  ;;  %vm12857_vm15 = vnez %v12749_v28  ;;  %v1047_v2 = vsel %vm7655_vm6, 0.0625, %v12813_v12 }
  0xc8   : > { %v1912_v22 = vsub.f32 %v7573_v60, %v12851_v44  ;;  %v1917_v31 = vsub.f32 %v7575_v53, %v12852_v10  ;;  %vm7679_vm13 = vmand %vm12854_vm11, %vm12853_vm10  ;;  %5269 = vmatpush.msk.msra.mxu1 %vm12857_vm15, %v12807_v16  ;;  %5287 = vmatpush.msk.msra.mxu2 %vm7445_vm3, %v12807_v16  ;;  %vm788_vm10 = vcmp.lt.s32.totalorder %v529_v26, %v6020_v11  ;;  %v12858_v23 = vand.u32 4294901760, %v7154_v3 }
  0xc9   : > { %1899 = vmatpush.msra.mxu3 %v1898_v46  ;;  %v1908_v28 = vand.u32 4294901760, %v1907_v9  ;;  %v7697_v44 = vsub.f32 %v1048_v7, %v1048_v7  ;;  %vm12859_vm15 = vcmp.lt.s32.totalorder %v530_v39, %v6020_v11  ;;  %vm12860_vm11 = vcmp.ge.s32.totalorder %v530_v39, %v6011_v4 }
  0xca   : > { %1808 = vmatpush.msra.mxu0 %v12858_v23  ;;  %vm7703_vm3 = vmand %vm12860_vm11, %vm12859_vm15  ;;  %v527_v17 = vadd.s32 384, %v6005_v1  ;;  %vm12863_vm7 = vnez %v12751_v30  ;;  %5288 = vmatpush.msk.msra.mxu2 %vm7468_vm9, %v12807_v16  ;;  %v12475_v3 = vand.u32 4294901760, %v7649_v40  ;;  %v1046_v46 = vsel %vm7679_vm13, 0.0625, %v12813_v12 }
  0xcb   : > { %5270 = vmatpush.msk.msra.mxu1 %vm12863_vm7, %v12807_v16  ;;  %vm787_vm11 = vcmp.lt.s32.totalorder %v528_v33, %v6020_v11  ;;  %1904 = vmatpush.msra.mxu3 %v1903_v58  ;;  %v12864_v39 = vand.u32 4294901760, %v7172_v37  ;;  %v1913_v30 = vand.u32 4294901760, %v1912_v22  ;;  %v1922_v9 = vsub.f32 %v7620_v18, %v12476_v14 }
  0xcc   : > { %v7725_v7 = vsub.f32 %v1047_v2, %v1047_v2  ;;  %vm12865_vm7 = vcmp.ge.s32.totalorder %v529_v26, %v6011_v4  ;;  %v12866_v23 = vmov 0  ;;  %vm12868_vm15 = vnez %v12755_v13  ;;  %5289 = vmatpush.msk.msra.mxu2 %vm7482_vm4, %v12807_v16 }
  0xcd   : > { %1811 = vmatpush.msra.mxu0 %v12864_v39  ;;  %vm7731_vm9 = vmand %vm12865_vm7, %vm788_vm10  ;;  %5271 = vmatpush.msk.msra.mxu1 %vm12868_vm15, %v12807_v16  ;;  %v1918_v37 = vand.u32 4294901760, %v1917_v31  ;;  %v12869_v58 = vand.u32 4294901760, %v7636_v55  ;;  %v1045_v26 = vsel %vm7703_vm3, 0.0625, %v12813_v12  ;;  %v12870_v2 = vand.u32 4294901760, %v7174_v35 }
  0xce   : > { %v12867_v23 = vsel %vm7731_vm9, 4294967295, %v12866_v23  ;;  %1909 = vmatpush.msra.mxu3 %v1908_v28  ;;  %v1936_v13 = vand.u32 4294901760, %v7697_v44  ;;  %v7750_v39 = vsub.f32 %v1046_v46, %v1046_v46  ;;  %vm12871_vm10 = vcmp.ge.s32.totalorder %v528_v33, %v6011_v4  ;;  %v1125_v28 = vld [vmem:[%s5999_s30 + $0x18] sm:$0xff]  ;;  %5290 = vmatpush.msk.msra.mxu2 %vm7504_vm5, %v12807_v16 }
  0xcf   : > { %v1927_v22 = vsub.f32 %v7636_v55, %v12869_v58  ;;  %1814 = vmatpush.msra.mxu0 %v12870_v2  ;;  %vm7756_vm15 = vmand %vm12871_vm10, %vm787_vm11  ;;  %v12872_v31 = vmov 0  ;;  %vm656_vm7 = vcmp.ge.s32.totalorder %v527_v17, %v6011_v4  ;;  %vm786_vm4 = vcmp.lt.s32.totalorder %v527_v17, %v6020_v11 }
  0xd0   : > { %v12873_v31 = vsel %vm7756_vm15, 4294967295, %v12872_v31  ;;  %vm12874_vm12 = vnez %v12759_v48  ;;  %v1932_v35 = vsub.f32 %v7649_v40, %v12475_v3  ;;  %v1044_v33 = vsel %vm7731_vm9, 0.0625, %v12813_v12  ;;  %1914 = vmatpush.msra.mxu3 %v1913_v30  ;;  %5291 = vmatpush.msk.msra.mxu2 %vm7552_vm14, %v12807_v16  ;;  %vm7791_vm11 = vmand %vm656_vm7, %vm786_vm4 }
  0xd1   : > { %5272 = vmatpush.msk.msra.mxu1 %vm12874_vm12, %v12807_v16  ;;  %v12875_v46 = vand.u32 4294901760, %v7176_v56  ;;  %v1923_v58 = vand.u32 4294901760, %v1922_v9  ;;  %v1941_v48 = vand.u32 4294901760, %v7725_v7  ;;  %v7778_v2 = vsub.f32 %v1045_v26, %v1045_v26 }
  0xd2   : > { %vm12876_vm12 = vnez %v12763_v50  ;;  %v1043_v30 = vsel %vm7756_vm15, 0.0625, %v12813_v12  ;;  %v12877_v56 = vmov 0  ;;  %v7795_v9 = vand.u32 4294901760, %v1125_v28  ;;  %1919 = vmatpush.msra.mxu3 %v1918_v37  ;;  %5292 = vmatpush.msk.msra.mxu2 %vm7562_vm0, %v12807_v16 }
  0xd3   : > { %1817 = vmatpush.msra.mxu0 %v12875_v46  ;;  %5273 = vmatpush.msk.msra.mxu1 %vm12876_vm12, %v12807_v16  ;;  %v12878_v56 = vsel %vm7791_vm11, 4294967295, %v12877_v56  ;;  %v12879_v50 = vand.u32 4294901760, %v7238_v49  ;;  %v1928_v26 = vand.u32 4294901760, %v1927_v22  ;;  %v1937_v46 = vsub.f32 %v7697_v44, %v1936_v13 }
  0xd4   : > { %v1946_v3 = vand.u32 4294901760, %v7750_v39  ;;  %v7803_v14 = vsub.f32 %v1044_v33, %v1044_v33  ;;  %vm12880_vm4 = vnez %v12765_v6  ;;  %v1933_v17 = vand.u32 4294901760, %v1932_v35  ;;  %1924 = vmatpush.msra.mxu3 %v1923_v58  ;;  %5293 = vmatpush.msk.msra.mxu2 %vm7581_vm8, %v12807_v16 }
  0xd5   : > { %1820 = vmatpush.msra.mxu0 %v12879_v50  ;;  %5274 = vmatpush.msk.msra.mxu1 %vm12880_vm4, %v12807_v16  ;;  %v12881_v49 = vand.u32 4294901760, %v7240_v0  ;;  %v1942_v37 = vsub.f32 %v7725_v7, %v1941_v48  ;;  %v1951_v22 = vand.u32 4294901760, %v7778_v2  ;;  %v7817_v33 = vsub.f32 %v1043_v30, %v1043_v30 }
  0xd6   : > { %v1042_v6 = vsel %vm7791_vm11, 0.0625, %v12813_v12  ;;  %vm12882_vm10 = vnez %v12769_v51  ;;  %v7829_v0 = vsub.f32 %v1125_v28, %v7795_v9  ;;  %1929 = vmatpush.msra.mxu3 %v1928_v26  ;;  %v12883_v35 = vand.u32 4294901760, %v7294_v62  ;;  %5294 = vmatpush.msk.msra.mxu2 %vm7627_vm1, %v12807_v16 }
  0xd7   : > { %1823 = vmatpush.msra.mxu0 %v12881_v49  ;;  %5275 = vmatpush.msk.msra.mxu1 %vm12882_vm10, %v12807_v16  ;;  %v1938_v58 = vand.u32 4294901760, %v1937_v46  ;;  %v1947_v30 = vsub.f32 %v7750_v39, %v1946_v3  ;;  %v1956_v50 = vand.u32 4294901760, %v7803_v14  ;;  %vm12884_vm7 = vnez %v12772_v57 }
  0xd8   : > { %v7843_v51 = vsub.f32 %v1042_v6, %v1042_v6  ;;  %1934 = vmatpush.msra.mxu3 %v1933_v17  ;;  %v12885_v62 = vand.u32 4294901760, %v7304_v5  ;;  %v1943_v28 = vand.u32 4294901760, %v1942_v37  ;;  %v1952_v26 = vsub.f32 %v7778_v2, %v1951_v22  ;;  %5295 = vmatpush.msk.msra.mxu2 %vm7655_vm6, %v12807_v16 }
  0xd9   : > { %1826 = vmatpush.msra.mxu0 %v12883_v35  ;;  %5276 = vmatpush.msk.msra.mxu1 %vm12884_vm7, %v12807_v16  ;;  %v1961_v46 = vand.u32 4294901760, %v7817_v33  ;;  %vm12886_vm12 = vnez %v12774_v34  ;;  %v1883_v57 = vand.u32 4294901760, %v7829_v0  ;;  %v12887_v5 = vand.u32 4294901760, %v7338_v15 }
  0xda   : > { %1939 = vmatpush.msra.mxu3 %v1938_v58  ;;  %v1948_v17 = vand.u32 4294901760, %v1947_v30  ;;  %v1957_v49 = vsub.f32 %v7803_v14, %v1956_v50  ;;  %5296 = vmatpush.msk.msra.mxu2 %vm7679_vm13, %v12807_v16  ;;  %v1966_v34 = vand.u32 4294901760, %v7843_v51  ;;  %v12888_v37 = vand.u32 4294901760, %v7375_v20  ;;  %v12892_v30 = vld [vmem:[#allocation19_spill] sm:$0xff] }
  0xdb   : > { %1829 = vmatpush.msra.mxu0 %v12885_v62  ;;  %5277 = vmatpush.msk.msra.mxu1 %vm12886_vm12, %v12807_v16  ;;  %v1953_v15 = vand.u32 4294901760, %v1952_v26  ;;  %v1962_v6 = vsub.f32 %v7817_v33, %v1961_v46  ;;  %vm12889_vm4 = vnez %v12779_v61  ;;  %v1884_v41 = vsub.f32 %v7829_v0, %v1883_v57 }
  0xdc   : > { %1944 = vmatpush.msra.mxu3 %v1943_v28  ;;  %5297 = vmatpush.msk.msra.mxu2 %vm7703_vm3, %v12807_v16  ;;  %v12890_v20 = vand.u32 4294901760, %v7424_v42  ;;  %v1958_v35 = vand.u32 4294901760, %v1957_v49  ;;  %v1967_v61 = vsub.f32 %v7843_v51, %v1966_v34  ;;  %v12893_v42 = vld [vmem:[#allocation16_spill] sm:$0xff]  ;;  %v12897_v26 = vand.u32 4294901760, %v12892_v30 }
  0xdd   : > { %1832 = vmatpush.msra.mxu0 %v12887_v5  ;;  %5278 = vmatpush.msk.msra.mxu1 %vm7144_vm2, %v12807_v16  ;;  %vm12891_vm2 = vnez %v12783_v59  ;;  %v1963_v58 = vand.u32 4294901760, %v1962_v6  ;;  %vm12894_vm10 = vnez %v12893_v42  ;;  %v1885_v62 = vand.u32 4294901760, %v1884_v41  ;;  %v12895_v59 = vld [vmem:[#allocation17_spill] sm:$0xff]  ;;  %v12898_v5 = vld [vmem:[#allocation18_spill] sm:$0xff] }
  0xde   : > { %1949 = vmatpush.msra.mxu3 %v1948_v17  ;;  %5298 = vmatpush.msk.msra.mxu2 %vm7731_vm9, %v12807_v16  ;;  %vm12896_vm7 = vnez %v12895_v59  ;;  %v1968_v28 = vand.u32 4294901760, %v1967_v61  ;;  %vm12899_vm12 = vnez %v12898_v5  ;;  %v12900_v17 = vand.u32 4294901760, %v7497_v38 }
  0xdf   : > { %1835 = vmatpush.msra.mxu0 %v12888_v37  ;;  %5279 = vmatpush.msk.msra.mxu1 %vm12889_vm4, %v12807_v16  ;;  %vm12901_vm4 = vnez %v12795_v27  ;;  %v12903_v49 = vand.u32 4294901760, %v7525_v47  ;;  %v12908_v27 = vand.u32 4294901760, %v7573_v60  ;;  %v12912_v37 = vand.u32 4294901760, %v7620_v18 }
  0xe0   : > { %1954 = vmatpush.msra.mxu3 %v1953_v15  ;;  %5299 = vmatpush.msk.msra.mxu2 %vm7756_vm15, %v12807_v16  ;;  %v12918_v15 = vand.u32 4294901760, %v7649_v40  ;;  %v12919_v6 = vmov 0  ;;  %v12921_v41 = vmov 0  ;;  %v12925_v61 = vmov 0 }
  0xe1   : > { %1838 = vmatpush.msra.mxu0 %v12890_v20  ;;  %5280 = vmatpush.msk.msra.mxu1 %vm12891_vm2, %v12807_v16  ;;  %vm12902_vm2 = vnez %v12799_v52  ;;  %v558_v52 = vadd.s32 632, %v6005_v1  ;;  %v551_v20 = vadd.s32 576, %v6005_v1  ;;  %v12927_v42 = vmov 0 }
  0xe2   : > { %1840 = vmatmul.f32.vlgmr.msra.gmra.mxu0 %v7265_v63  ;;  %1959 = vmatpush.msra.mxu3 %v1958_v35  ;;  %v12923_v35 = vmov 0  ;;  %v12929_v59 = vmov 0 }
  0xe3   : > { %1976 = vmatpush.msrb.mxu0 %v12892_v30  ;;  %5281 = vmatpush.msk.msra.mxu1 %vm12894_vm10, %v12807_v16 }
  0xe4   : > { %5300 = vmatpush.msk.msra.mxu2 %vm7791_vm11, %v12807_v16  ;;  %1964 = vmatpush.msra.mxu3 %v1963_v58  ;;  %v549_v58 = vadd.s32 560, %v6005_v1 }
  0xe5   : > { %1978 = vmatpush.msrb.mxu0 %v7497_v38  ;;  %5282 = vmatpush.msk.msra.mxu1 %vm12896_vm7, %v12807_v16  ;;  %v12904_v38 = vld [vmem:[#allocation20_spill] sm:$0xff]  ;;  %vm12907_vm7 = vnez %v12812_v19  ;;  %v12910_v19 = vand.u32 4294901760, %v7575_v53 }
  0xe6   : > { %1886 = vmatmul.f32.vlgmr.msra.gmra.mxu2 %v1885_v62  ;;  %1969 = vmatpush.msra.mxu3 %v1968_v28  ;;  %vm12905_vm10 = vnez %v12904_v38  ;;  %v547_v28 = vadd.s32 544, %v6005_v1 }
  0xe7   : > { %1980 = vmatpush.msrb.mxu0 %v7525_v47  ;;  %2038 = vmatpush.msrb.mxu2 %v12897_v26  ;;  %v557_v47 = vadd.s32 624, %v6005_v1  ;;  %v546_v26 = vadd.s32 536, %v6005_v1 }
  0xe8   : > { %5283 = vmatpush.msk.msra.mxu1 %vm12899_vm12, %v12807_v16  ;;  %1971 = vmatmul.f32.vlgmr.msra.gmra.mxu3 %v7795_v9  ;;  %vm12909_vm12 = vnez %v12817_v29  ;;  %v12913_v29 = vmov 0 }
  0xe9   : > { %1982 = vmatpush.msrb.mxu0 %v7546_v36  ;;  %2041 = vmatpush.msrb.mxu2 %v12900_v17  ;;  %vm816_vm11 = vcmp.lt.s32.totalorder %v557_v47, %v6020_v11 }
  0xea   : > { %5317 = vmatpush.msk.msrb.mxu3 %vm12901_vm4, %v12807_v16  ;;  %5284 = vmatpush.msk.msra.mxu1 %vm12902_vm2, %v12807_v16  ;;  %vm817_vm2 = vcmp.lt.s32.totalorder %v558_v52, %v6020_v11 }
  0xeb   : > { %1984 = vmatpush.msrb.mxu0 %v7573_v60  ;;  %1861 = vmatmul.f32.vlgmr.msra.gmra.mxu1 %v7265_v63  ;;  %v12906_v63 = vand.u32 4294901760, %v7546_v36  ;;  %v556_v36 = vadd.s32 616, %v6005_v1  ;;  %v555_v60 = vadd.s32 608, %v6005_v1 }
  0xec   : > { %5301 = vmatpush.msk.msrb.mxu1 %vm12901_vm4, %v12807_v16  ;;  %2044 = vmatpush.msrb.mxu2 %v12903_v49  ;;  %vm687_vm4 = vcmp.ge.s32.totalorder %v558_v52, %v6011_v4 }
  0xed   : > { %5318 = vmatpush.msk.msrb.mxu3 %vm12905_vm10, %v12807_v16  ;;  %1986 = vmatpush.msrb.mxu0 %v7575_v53  ;;  %vm685_vm15 = vcmp.ge.s32.totalorder %v556_v36, %v6011_v4  ;;  %v554_v53 = vadd.s32 600, %v6005_v1 }
  0xee   : > { %5302 = vmatpush.msk.msrb.mxu1 %vm12905_vm10, %v12807_v16  ;;  %2047 = vmatpush.msrb.mxu2 %v12906_v63  ;;  %vm12911_vm10 = vnez %v12820_v21  ;;  %v12915_v21 = vand.u32 4294901760, %v7636_v55  ;;  %v12937_v63 = vmov 0 }
  0xef   : > { %5319 = vmatpush.msk.msrb.mxu3 %vm12907_vm7, %v12807_v16  ;;  %1988 = vmatpush.msrb.mxu0 %v7620_v18  ;;  %v12916_v18 = vmov 0 }
  0xf0   : > { %5303 = vmatpush.msk.msrb.mxu1 %vm12907_vm7, %v12807_v16  ;;  %2050 = vmatpush.msrb.mxu2 %v12908_v27  ;;  %vm7975_vm7 = vmand %vm687_vm4, %vm817_vm2  ;;  %vm684_vm4 = vcmp.ge.s32.totalorder %v555_v60, %v6011_v4  ;;  %vm814_vm2 = vcmp.lt.s32.totalorder %v555_v60, %v6020_v11  ;;  %v544_v60 = vadd.s32 520, %v6005_v1 }
  0xf1   : > { %5320 = vmatpush.msk.msrb.mxu3 %vm12909_vm12, %v12807_v16  ;;  %1990 = vmatpush.msrb.mxu0 %v7636_v55  ;;  %v12914_v29 = vsel %vm7975_vm7, 4294967295, %v12913_v29  ;;  %v1073_v43 = vsel %vm7975_vm7, 0.0625, %v12813_v12  ;;  %v553_v55 = vadd.s32 592, %v6005_v1 }
  0xf2   : > { %5304 = vmatpush.msk.msrb.mxu1 %vm12909_vm12, %v12807_v16  ;;  %2053 = vmatpush.msrb.mxu2 %v12910_v19  ;;  %vm686_vm12 = vcmp.ge.s32.totalorder %v557_v47, %v6011_v4  ;;  %v8029_v25 = vsub.f32 %v1073_v43, %v1073_v43  ;;  %v1126_v43 = vld [vmem:[%s5999_s30 + $0x20] sm:$0xff] }
  0xf3   : > { %5321 = vmatpush.msk.msrb.mxu3 %vm12911_vm10, %v12807_v16  ;;  %1992 = vmatpush.msrb.mxu0 %v7649_v40  ;;  %vm7999_vm9 = vmand %vm686_vm12, %vm816_vm11  ;;  %vm812_vm12 = vcmp.lt.s32.totalorder %v553_v55, %v6020_v11 }
  0xf4   : > { %5305 = vmatpush.msk.msrb.mxu1 %vm12911_vm10, %v12807_v16  ;;  %2056 = vmatpush.msrb.mxu2 %v12912_v37  ;;  %vm815_vm10 = vcmp.lt.s32.totalorder %v556_v36, %v6020_v11  ;;  %v12917_v18 = vsel %vm7999_vm9, 4294967295, %v12916_v18  ;;  %vm8020_vm11 = vmand %vm684_vm4, %vm814_vm2  ;;  %v1072_v40 = vsel %vm7999_vm9, 0.0625, %v12813_v12  ;;  %vm680_vm2 = vcmp.ge.s32.totalorder %v551_v20, %v6011_v4 }
  0xf5   : > { %5322 = vmatpush.msk.msrb.mxu3 %vm7504_vm5, %v12807_v16  ;;  %1994 = vmatpush.msrb.mxu0 %v7697_v44  ;;  %v12922_v41 = vsel %vm8020_vm11, 4294967295, %v12921_v41  ;;  %v552_v44 = vadd.s32 584, %v6005_v1  ;;  %v8068_v54 = vsub.f32 %v1072_v40, %v1072_v40 }
  0xf6   : > { %5306 = vmatpush.msk.msrb.mxu1 %vm7504_vm5, %v12807_v16  ;;  %2059 = vmatpush.msrb.mxu2 %v12915_v21  ;;  %vm8012_vm5 = vmand %vm685_vm15, %vm815_vm10  ;;  %vm813_vm15 = vcmp.lt.s32.totalorder %v554_v53, %v6020_v11  ;;  %v12942_v21 = vmov 0 }
  0xf7   : > { %5323 = vmatpush.msk.msrb.mxu3 %vm7552_vm14, %v12807_v16  ;;  %1996 = vmatpush.msrb.mxu0 %v7725_v7  ;;  %v12920_v6 = vsel %vm8012_vm5, 4294967295, %v12919_v6  ;;  %v1071_v45 = vsel %vm8012_vm5, 0.0625, %v12813_v12  ;;  %v12511_v7 = vand.u32 4294901760, %v8029_v25  ;;  %vm811_vm4 = vcmp.lt.s32.totalorder %v552_v44, %v6020_v11 }
  0xf8   : > { %5307 = vmatpush.msk.msrb.mxu1 %vm7552_vm14, %v12807_v16  ;;  %2062 = vmatpush.msrb.mxu2 %v12918_v15  ;;  %vm683_vm14 = vcmp.ge.s32.totalorder %v554_v53, %v6011_v4  ;;  %v12507_v30 = vand.u32 4294901760, %v8068_v54  ;;  %v543_v53 = vadd.s32 512, %v6005_v1 }
  0xf9   : > { %5324 = vmatpush.msk.msrb.mxu3 %vm7562_vm0, %v12807_v16  ;;  %1998 = vmatpush.msrb.mxu0 %v7750_v39  ;;  %vm8059_vm10 = vmand %vm683_vm14, %vm813_vm15  ;;  %vm810_vm14 = vcmp.lt.s32.totalorder %v551_v20, %v6020_v11  ;;  %v12950_v20 = vmov 0 }
  0xfa   : > { %5308 = vmatpush.msk.msrb.mxu1 %vm7562_vm0, %v12807_v16  ;;  %2065 = vmatpush.msrb.mxu2 %v1936_v13  ;;  %vm682_vm0 = vcmp.ge.s32.totalorder %v553_v55, %v6011_v4  ;;  %v1070_v13 = vsel %vm8020_vm11, 0.0625, %v12813_v12  ;;  %v12924_v35 = vsel %vm8059_vm10, 4294967295, %v12923_v35  ;;  %v1069_v39 = vsel %vm8059_vm10, 0.0625, %v12813_v12 }
  0xfb   : > { %5325 = vmatpush.msk.msrb.mxu3 %vm7581_vm8, %v12807_v16  ;;  %2000 = vmatpush.msrb.mxu0 %v7778_v2  ;;  %v8083_v32 = vsub.f32 %v1070_v13, %v1070_v13  ;;  %v548_v2 = vadd.s32 552, %v6005_v1  ;;  %v8131_v62 = vsub.f32 %v1069_v39, %v1069_v39  ;;  %v2142_v5 = vsub.f32 %v8068_v54, %v12507_v30 }
  0xfc   : > { %5309 = vmatpush.msk.msrb.mxu1 %vm7581_vm8, %v12807_v16  ;;  %2068 = vmatpush.msrb.mxu2 %v1941_v48  ;;  %v8071_v48 = vsub.f32 %v1071_v45, %v1071_v45  ;;  %vm8075_vm8 = vmand %vm682_vm0, %vm812_vm12  ;;  %vm678_vm12 = vcmp.ge.s32.totalorder %v549_v58, %v6011_v4  ;;  %v12947_v45 = vmov 0  ;;  %v8319_v39 = vand.u32 4294901760, %v1126_v43 }
  0xfd   : > { %5326 = vmatpush.msk.msrb.mxu3 %vm7627_vm1, %v12807_v16  ;;  %2002 = vmatpush.msrb.mxu0 %v7803_v14  ;;  %v12926_v61 = vsel %vm8075_vm8, 4294967295, %v12925_v61  ;;  %v1068_v24 = vsel %vm8075_vm8, 0.0625, %v12813_v12  ;;  %v12505_v14 = vand.u32 4294901760, %v8083_v32  ;;  %v12503_v38 = vand.u32 4294901760, %v8131_v62 }
  0xfe   : > { %5310 = vmatpush.msk.msrb.mxu1 %vm7627_vm1, %v12807_v16  ;;  %2071 = vmatpush.msrb.mxu2 %v1946_v3  ;;  %vm681_vm1 = vcmp.ge.s32.totalorder %v552_v44, %v6011_v4  ;;  %v550_v3 = vadd.s32 568, %v6005_v1  ;;  %v12506_v8 = vand.u32 4294901760, %v8071_v48  ;;  %v585_v30 = vadd.s32 848, %v6005_v1 }
  0xff   : > { %5327 = vmatpush.msk.msrb.mxu3 %vm7655_vm6, %v12807_v16  ;;  %2004 = vmatpush.msrb.mxu0 %v7817_v33  ;;  %v12932_v33 = vmov 0  ;;  %v8211_v49 = vsub.f32 %v8083_v32, %v12505_v14 }
 0x100   : > { %5311 = vmatpush.msk.msrb.mxu1 %vm7655_vm6, %v12807_v16  ;;  %2074 = vmatpush.msrb.mxu2 %v1951_v22  ;;  %v8114_v22 = vsub.f32 %v8029_v25, %v12511_v7  ;;  %vm8121_vm6 = vmand %vm681_vm1, %vm811_vm4  ;;  %vm679_vm15 = vcmp.ge.s32.totalorder %v550_v3, %v6011_v4  ;;  %vm809_vm0 = vcmp.lt.s32.totalorder %v550_v3, %v6020_v11 }
 0x101   : > { %5328 = vmatpush.msk.msrb.mxu3 %vm7679_vm13, %v12807_v16  ;;  %2006 = vmatpush.msrb.mxu0 %v7843_v51  ;;  %v12928_v42 = vsel %vm8121_vm6, 4294967295, %v12927_v42  ;;  %vm808_vm1 = vcmp.lt.s32.totalorder %v549_v58, %v6020_v11  ;;  %vm12931_vm4 = vnez %v12867_v23  ;;  %v1067_v10 = vsel %vm8121_vm6, 0.0625, %v12813_v12 }
 0x102   : > { %2009 = vmatmul.f32.vlgmr.msrb.gmra.mxu0 %v7829_v0  ;;  %5312 = vmatpush.msk.msrb.mxu1 %vm7679_vm13, %v12807_v16  ;;  %vm8137_vm13 = vmand %vm680_vm2, %vm810_vm14  ;;  %vm807_vm2 = vcmp.lt.s32.totalorder %v548_v2, %v6020_v11  ;;  %v2138_v23 = vand.u32 4294901760, %v8114_v22  ;;  %v545_v51 = vadd.s32 528, %v6005_v1  ;;  %v8214_v52 = vsub.f32 %v1067_v10, %v1067_v10 }
 0x103   : > { %2077 = vmatpush.msrb.mxu2 %v1956_v50  ;;  %5329 = vmatpush.msk.msrb.mxu3 %vm7703_vm3, %v12807_v16  ;;  %v12930_v59 = vsel %vm8137_vm13, 4294967295, %v12929_v59  ;;  %v8150_v50 = vsub.f32 %v1068_v24, %v1068_v24  ;;  %vm8175_vm14 = vmand %vm679_vm15, %vm809_vm0  ;;  %v2157_v0 = vsub.f32 %v8131_v62, %v12503_v38  ;;  %v574_v24 = vadd.s32 760, %v6005_v1 }
 0x104   : > { %5333 = vmatpush.msk.msra.mxu0 %vm7975_vm7, %v12807_v16  ;;  %5313 = vmatpush.msk.msrb.mxu1 %vm7703_vm3, %v12807_v16  ;;  %vm677_vm3 = vcmp.ge.s32.totalorder %v548_v2, %v6011_v4  ;;  %v12933_v33 = vsel %vm8175_vm14, 4294967295, %v12932_v33  ;;  %vm8196_vm15 = vmand %vm678_vm12, %vm808_vm1  ;;  %vm674_vm12 = vcmp.ge.s32.totalorder %v545_v51, %v6011_v4  ;;  %vm804_vm1 = vcmp.lt.s32.totalorder %v545_v51, %v6020_v11 }
 0x105   : > { %2080 = vmatpush.msrb.mxu2 %v1961_v46  ;;  %5330 = vmatpush.msk.msrb.mxu3 %vm12931_vm4, %v12807_v16  ;;  %v1066_v46 = vsel %vm8137_vm13, 0.0625, %v12813_v12  ;;  %vm8220_vm0 = vmand %vm677_vm3, %vm807_vm2  ;;  %v12496_v27 = vand.u32 4294901760, %v8150_v50  ;;  %vm12939_vm3 = vnez %v12878_v56  ;;  %v1064_v36 = vsel %vm8196_vm15, 0.0625, %v12813_v12 }
 0x106   : > { %5334 = vmatpush.msk.msra.mxu0 %vm7999_vm9, %v12807_v16  ;;  %5314 = vmatpush.msk.msrb.mxu1 %vm12931_vm4, %v12807_v16  ;;  %vm12934_vm4 = vnez %v12873_v31  ;;  %v12938_v63 = vsel %vm8220_vm0, 4294967295, %v12937_v63  ;;  %v8229_v47 = vsub.f32 %v1066_v46, %v1066_v46  ;;  %v1065_v31 = vsel %vm8175_vm14, 0.0625, %v12813_v12 }
 0x107   : > { %2083 = vmatpush.msrb.mxu2 %v1966_v34  ;;  %5331 = vmatpush.msk.msrb.mxu3 %vm12934_vm4, %v12807_v16  ;;  %v2147_v34 = vsub.f32 %v8071_v48, %v12506_v8  ;;  %v1063_v19 = vsel %vm8220_vm0, 0.0625, %v12813_v12  ;;  %vm12940_vm2 = vcmp.lt.s32.totalorder %v547_v28, %v6020_v11  ;;  %v2153_v56 = vand.u32 4294901760, %v8211_v49 }
 0x108   : > { %5335 = vmatpush.msk.msra.mxu0 %vm8012_vm5, %v12807_v16  ;;  %2085 = vmatmul.f32.vlgmr.msrb.gmra.mxu2 %v7795_v9  ;;  %v12493_v55 = vand.u32 4294901760, %v8214_v52  ;;  %v8278_v15 = vsub.f32 %v1065_v31, %v1065_v31  ;;  %v8280_v40 = vsub.f32 %v1064_v36, %v1064_v36  ;;  %v12492_v44 = vand.u32 4294901760, %v8229_v47 }
 0x109   : > { %2221 = vmatpush.msra.mxu2 %v8029_v25  ;;  %5315 = vmatpush.msk.msrb.mxu1 %vm12934_vm4, %v12807_v16  ;;  %v2148_v37 = vand.u32 4294901760, %v2147_v34  ;;  %vm12941_vm4 = vcmp.ge.s32.totalorder %v547_v28, %v6011_v4  ;;  %v8298_v13 = vsub.f32 %v1063_v19, %v1063_v19  ;;  %v2158_v46 = vand.u32 4294901760, %v2157_v0 }
 0x10a   : > { %5332 = vmatpush.msk.msrb.mxu3 %vm12939_vm3, %v12807_v16  ;;  %5336 = vmatpush.msk.msra.mxu0 %vm8020_vm11, %v12807_v16  ;;  %vm8265_vm0 = vmand %vm12941_vm4, %vm12940_vm2  ;;  %vm12946_vm2 = vcmp.ge.s32.totalorder %v546_v26, %v6011_v4  ;;  %v2167_v2 = vsub.f32 %v8214_v52, %v12493_v55  ;;  %v12491_v22 = vand.u32 4294901760, %v8278_v15  ;;  %v12490_v10 = vand.u32 4294901760, %v8280_v40 }
 0x10b   : > { %2106 = vmatmul.f32.vlgmr.msrb.gmra.mxu3 %v7795_v9  ;;  %2223 = vmatpush.msra.mxu2 %v8068_v54  ;;  %v2143_v9 = vand.u32 4294901760, %v2142_v5  ;;  %v12943_v21 = vsel %vm8265_vm0, 4294967295, %v12942_v21  ;;  %v1062_v3 = vsel %vm8265_vm0, 0.0625, %v12813_v12  ;;  %v12489_v5 = vand.u32 4294901760, %v8298_v13 }
 0x10c   : > { %5349 = vmatpush.msk.msra.mxu3 %vm7975_vm7, %v12807_v16  ;;  %5316 = vmatpush.msk.msrb.mxu1 %vm12939_vm3, %v12807_v16  ;;  %12944 = vst [vmem:[#allocation19_spill] sm:$0xff] %v12943_v21  ;;  %vm12945_vm3 = vcmp.lt.s32.totalorder %v546_v26, %v6020_v11  ;;  %vm803_vm7 = vcmp.lt.s32.totalorder %v544_v60, %v6020_v11  ;;  %v12957_v49 = vmov 0  ;;  %v573_v36 = vadd.s32 752, %v6005_v1 }
 0x10d   : > { %5337 = vmatpush.msk.msra.mxu0 %vm8059_vm10, %v12807_v16  ;;  %2032 = vmatmul.f32.vlgmr.msrb.gmra.mxu1 %v1883_v57  ;;  %vm8286_vm4 = vmand %vm12946_vm2, %vm12945_vm3  ;;  %v2162_v57 = vsub.f32 %v8150_v50, %v12496_v27  ;;  %vm673_vm2 = vcmp.ge.s32.totalorder %v544_v60, %v6011_v4  ;;  %v8343_v26 = vsub.f32 %v1062_v3, %v1062_v3  ;;  %v572_v3 = vadd.s32 744, %v6005_v1 }
 0x10e   : > { %v12948_v45 = vsel %vm8286_vm4, 4294967295, %v12947_v45  ;;  %2139 = vmatpush.msra.mxu1 %v2138_v23  ;;  %2225 = vmatpush.msra.mxu2 %v8071_v48  ;;  %vm8304_vm3 = vmand %vm674_vm12, %vm804_vm1  ;;  %v1061_v58 = vsel %vm8286_vm4, 0.0625, %v12813_v12  ;;  %vm802_vm1 = vcmp.lt.s32.totalorder %v543_v53, %v6020_v11  ;;  %v12953_v23 = vmov 0 }
 0x10f   : > { %12949 = vst [vmem:[#allocation16_spill] sm:$0xff] %v12948_v45  ;;  %v12951_v20 = vsel %vm8304_vm3, 4294967295, %v12950_v20  ;;  %5350 = vmatpush.msk.msra.mxu3 %vm7999_vm9, %v12807_v16  ;;  %5338 = vmatpush.msk.msra.mxu0 %vm8075_vm8, %v12807_v16  ;;  %v1060_v28 = vsel %vm8304_vm3, 0.0625, %v12813_v12  ;;  %vm8349_vm12 = vmand %vm673_vm2, %vm803_vm7  ;;  %v2172_v51 = vsub.f32 %v8229_v47, %v12492_v44  ;;  %v8363_v34 = vsub.f32 %v1061_v58, %v1061_v58 }
 0x110   : > { %12952 = vst [vmem:[#allocation17_spill] sm:$0xff] %v12951_v20  ;;  %2144 = vmatpush.msra.mxu1 %v2143_v9  ;;  %2227 = vmatpush.msra.mxu2 %v8083_v32  ;;  %v12954_v23 = vsel %vm8349_vm12, 4294967295, %v12953_v23  ;;  %vm12956_vm7 = vcmp.ge.s32.totalorder %v543_v53, %v6011_v4  ;;  %v8374_v31 = vsub.f32 %v1126_v43, %v8319_v39  ;;  %v2163_v19 = vand.u32 4294901760, %v2162_v57 }
 0x111   : > { %5351 = vmatpush.msk.msra.mxu3 %vm8012_vm5, %v12807_v16  ;;  %5339 = vmatpush.msk.msra.mxu0 %vm8121_vm6, %v12807_v16  ;;  %12955 = vst [vmem:[#allocation18_spill] sm:$0xff] %v12954_v23  ;;  %vm8369_vm2 = vmand %vm12956_vm7, %vm802_vm1  ;;  %v8378_v60 = vsub.f32 %v1060_v28, %v1060_v28  ;;  %vm833_vm5 = vcmp.lt.s32.totalorder %v574_v24, %v6020_v11  ;;  %v2168_v9 = vand.u32 4294901760, %v2167_v2  ;;  %v1059_v43 = vsel %vm8349_vm12, 0.0625, %v12813_v12 }
 0x112   : > { %2149 = vmatpush.msra.mxu1 %v2148_v37  ;;  %2229 = vmatpush.msra.mxu2 %v8131_v62  ;;  %v12958_v49 = vsel %vm8369_vm2, 4294967295, %v12957_v49  ;;  %v2177_v37 = vsub.f32 %v8278_v15, %v12491_v22  ;;  %v8394_v53 = vsub.f32 %v8280_v40, %v12490_v10  ;;  %v12502_v0 = vand.u32 4294901760, %v8343_v26 }
 0x113   : > { %5352 = vmatpush.msk.msra.mxu3 %vm8020_vm11, %v12807_v16  ;;  %5340 = vmatpush.msk.msra.mxu0 %vm8137_vm13, %v12807_v16  ;;  %vm703_vm11 = vcmp.ge.s32.totalorder %v574_v24, %v6011_v4  ;;  %v1058_v57 = vsel %vm8369_vm2, 0.0625, %v12813_v12  ;;  %v12504_v58 = vand.u32 4294901760, %v8374_v31  ;;  %v12498_v2 = vand.u32 4294901760, %v8363_v34 }
 0x114   : > { %2154 = vmatpush.msra.mxu1 %v2153_v56  ;;  %2231 = vmatpush.msra.mxu2 %v8150_v50  ;;  %v8403_v56 = vsub.f32 %v8298_v13, %v12489_v5  ;;  %vm8422_vm1 = vmand %vm703_vm11, %vm833_vm5  ;;  %v12959_v28 = vmov 0  ;;  %vm702_vm7 = vcmp.ge.s32.totalorder %v573_v36, %v6011_v4  ;;  %v8429_v5 = vsub.f32 %v1059_v43, %v1059_v43 }
 0x115   : > { %5353 = vmatpush.msk.msra.mxu3 %vm8059_vm10, %v12807_v16  ;;  %5341 = vmatpush.msk.msra.mxu0 %vm8175_vm14, %v12807_v16  ;;  %v12960_v28 = vsel %vm8422_vm1, 4294967295, %v12959_v28  ;;  %v12497_v10 = vand.u32 4294901760, %v8378_v60  ;;  %v571_v22 = vadd.s32 736, %v6005_v1  ;;  %vm12961_vm5 = vnez %v12938_v63 }
 0x116   : > { %2159 = vmatpush.msra.mxu1 %v2158_v46  ;;  %2233 = vmatpush.msra.mxu2 %v8214_v52  ;;  %v2173_v46 = vand.u32 4294901760, %v2172_v51  ;;  %v2178_v24 = vand.u32 4294901760, %v2177_v37  ;;  %v8440_v44 = vsub.f32 %v1058_v57, %v1058_v57  ;;  %v570_v51 = vadd.s32 728, %v6005_v1 }
 0x117   : > { %5354 = vmatpush.msk.msra.mxu3 %vm8075_vm8, %v12807_v16  ;;  %5342 = vmatpush.msk.msra.mxu0 %vm8196_vm15, %v12807_v16  ;;  %vm832_vm8 = vcmp.lt.s32.totalorder %v573_v36, %v6020_v11  ;;  %v1089_v43 = vsel %vm8422_vm1, 0.0625, %v12813_v12  ;;  %v12962_v55 = vmov 0  ;;  %vm831_vm10 = vcmp.lt.s32.totalorder %v572_v3, %v6020_v11 }
 0x118   : > { %2164 = vmatpush.msra.mxu1 %v2163_v19  ;;  %2235 = vmatpush.msra.mxu2 %v8229_v47  ;;  %v2183_v19 = vand.u32 4294901760, %v8394_v53  ;;  %vm8451_vm11 = vmand %vm702_vm7, %vm832_vm8  ;;  %v2188_v36 = vand.u32 4294901760, %v8403_v56  ;;  %v2129_v37 = vsub.f32 %v8374_v31, %v12504_v58  ;;  %v2192_v53 = vsub.f32 %v8343_v26, %v12502_v0 }
 0x119   : > { %5355 = vmatpush.msk.msra.mxu3 %vm8121_vm6, %v12807_v16  ;;  %5343 = vmatpush.msk.msra.mxu0 %vm12961_vm5, %v12807_v16  ;;  %v12963_v55 = vsel %vm8451_vm11, 4294967295, %v12962_v55  ;;  %vm701_vm6 = vcmp.ge.s32.totalorder %v572_v3, %v6011_v4  ;;  %v8474_v57 = vsub.f32 %v8363_v34, %v12498_v2  ;;  %v8480_v56 = vsub.f32 %v8378_v60, %v12497_v10 }
 0x11a   : > { %2169 = vmatpush.msra.mxu1 %v2168_v9  ;;  %2237 = vmatpush.msra.mxu2 %v8278_v15  ;;  %12964 = vst [vmem:[#allocation20_spill] sm:$0xff] %v12963_v55  ;;  %v569_v9 = vadd.s32 720, %v6005_v1  ;;  %v12510_v27 = vand.u32 4294901760, %v8429_v5  ;;  %v1088_v10 = vsel %vm8451_vm11, 0.0625, %v12813_v12  ;;  %vm8500_vm8 = vmand %vm701_vm6, %vm831_vm10  ;;  %v12965_v2 = vmov 0 }
 0x11b   : > { %5356 = vmatpush.msk.msra.mxu3 %vm8137_vm13, %v12807_v16  ;;  %5344 = vmatpush.msk.msra.mxu0 %vm8265_vm0, %v12807_v16  ;;  %v12966_v2 = vsel %vm8500_vm8, 4294967295, %v12965_v2  ;;  %v568_v0 = vadd.s32 712, %v6005_v1  ;;  %v2193_v3 = vand.u32 4294901760, %v2192_v53  ;;  %vm12967_vm10 = vcmp.lt.s32.totalorder %v571_v22, %v6020_v11 }
 0x11c   : > { %2174 = vmatpush.msra.mxu1 %v2173_v46  ;;  %2239 = vmatpush.msra.mxu2 %v8280_v40  ;;  %v8491_v46 = vsub.f32 %v1089_v43, %v1089_v43  ;;  %v12509_v43 = vand.u32 4294901760, %v8440_v44  ;;  %vm828_vm9 = vcmp.lt.s32.totalorder %v569_v9, %v6020_v11  ;;  %vm12968_vm6 = vcmp.ge.s32.totalorder %v571_v22, %v6011_v4 }
 0x11d   : > { %5357 = vmatpush.msk.msra.mxu3 %vm8175_vm14, %v12807_v16  ;;  %5345 = vmatpush.msk.msra.mxu0 %vm8286_vm4, %v12807_v16  ;;  %vm829_vm14 = vcmp.lt.s32.totalorder %v570_v51, %v6020_v11  ;;  %vm8521_vm7 = vmand %vm12968_vm6, %vm12967_vm10  ;;  %v567_v38 = vadd.s32 704, %v6005_v1  ;;  %v2130_v58 = vand.u32 4294901760, %v2129_v37  ;;  %v2198_v14 = vand.u32 4294901760, %v8474_v57 }
 0x11e   : > { %2179 = vmatpush.msra.mxu1 %v2178_v24  ;;  %2241 = vmatpush.msra.mxu2 %v8298_v13  ;;  %v12969_v24 = vmov 0  ;;  %v1087_v53 = vsel %vm8500_vm8, 0.0625, %v12813_v12  ;;  %vm12971_vm13 = vcmp.ge.s32.totalorder %v570_v51, %v6011_v4  ;;  %v12972_v22 = vmov 0 }
 0x11f   : > { %5358 = vmatpush.msk.msra.mxu3 %vm8196_vm15, %v12807_v16  ;;  %5346 = vmatpush.msk.msra.mxu0 %vm8304_vm3, %v12807_v16  ;;  %v12970_v24 = vsel %vm8521_vm7, 4294967295, %v12969_v24  ;;  %vm8535_vm10 = vmand %vm12971_vm13, %vm829_vm14  ;;  %v566_v8 = vadd.s32 696, %v6005_v1  ;;  %v2207_v51 = vsub.f32 %v8429_v5, %v12510_v27  ;;  %v8550_v37 = vsub.f32 %v1088_v10, %v1088_v10 }
 0x120   : > { %2184 = vmatpush.msra.mxu1 %v2183_v19  ;;  %2243 = vmatpush.msra.mxu2 %v8343_v26  ;;  %v12973_v22 = vsel %vm8535_vm10, 4294967295, %v12972_v22  ;;  %v2203_v19 = vand.u32 4294901760, %v8480_v56  ;;  %v12516_v57 = vand.u32 4294901760, %v8491_v46  ;;  %vm12974_vm13 = vcmp.ge.s32.totalorder %v569_v9, %v6011_v4 }
 0x121   : > { %5359 = vmatpush.msk.msra.mxu3 %vm12961_vm5, %v12807_v16  ;;  %5347 = vmatpush.msk.msra.mxu0 %vm8349_vm12, %v12807_v16  ;;  %vm8557_vm14 = vmand %vm12974_vm13, %vm828_vm9  ;;  %v8565_v56 = vsub.f32 %v8440_v44, %v12509_v43  ;;  %v1086_v10 = vsel %vm8521_vm7, 0.0625, %v12813_v12  ;;  %v8578_v9 = vsub.f32 %v1087_v53, %v1087_v53  ;;  %vm826_vm13 = vcmp.lt.s32.totalorder %v567_v38, %v6020_v11 }
 0x122   : > { %2189 = vmatpush.msra.mxu1 %v2188_v36  ;;  %2245 = vmatpush.msra.mxu2 %v8363_v34  ;;  %v1085_v36 = vsel %vm8535_vm10, 0.0625, %v12813_v12  ;;  %v1084_v43 = vsel %vm8557_vm14, 0.0625, %v12813_v12  ;;  %v565_v53 = vadd.s32 688, %v6005_v1  ;;  %v8599_v27 = vsub.f32 %v1086_v10, %v1086_v10 }
 0x123   : > { %5360 = vmatpush.msk.msra.mxu3 %vm8265_vm0, %v12807_v16  ;;  %5348 = vmatpush.msk.msra.mxu0 %vm8369_vm2, %v12807_v16  ;;  %vm12977_vm6 = vcmp.lt.s32.totalorder %v568_v0, %v6020_v11  ;;  %vm12978_vm5 = vcmp.ge.s32.totalorder %v568_v0, %v6011_v4  ;;  %v12981_v21 = vand.u32 4294901760, %v8029_v25  ;;  %v2208_v45 = vand.u32 4294901760, %v2207_v51 }
 0x124   : > { %2131 = vmatmul.f32.vlgmr.msra.gmra.mxu0 %v2130_v58  ;;  %2194 = vmatpush.msra.mxu1 %v2193_v3  ;;  %v2382_v58 = vsub.f32 %v8491_v46, %v12516_v57  ;;  %v12518_v3 = vand.u32 4294901760, %v8550_v37  ;;  %vm8605_vm9 = vmand %vm12978_vm5, %vm12977_vm6  ;;  %v564_v57 = vadd.s32 680, %v6005_v1  ;;  %v2213_v25 = vand.u32 4294901760, %v8565_v56 }
 0x125   : > { %2247 = vmatpush.msra.mxu2 %v8378_v60  ;;  %5361 = vmatpush.msk.msra.mxu3 %vm8286_vm4, %v12807_v16  ;;  %vm12982_vm4 = vcmp.ge.s32.totalorder %v567_v38, %v6011_v4  ;;  %v8628_v0 = vsub.f32 %v1084_v43, %v1084_v43  ;;  %vm12986_vm5 = vcmp.ge.s32.totalorder %v566_v8, %v6011_v4  ;;  %v12989_v51 = vand.u32 4294901760, %v8068_v54 }
 0x126   : > { %2283 = vmatpush.msrb.mxu0 %v12981_v21  ;;  %2199 = vmatpush.msra.mxu1 %v2198_v14  ;;  %vm8615_vm0 = vmand %vm12982_vm4, %vm826_vm13  ;;  %v8626_v21 = vsub.f32 %v1085_v36, %v1085_v36  ;;  %vm12985_vm4 = vcmp.lt.s32.totalorder %v566_v8, %v6020_v11  ;;  %v1083_v56 = vsel %vm8605_vm9, 0.0625, %v12813_v12  ;;  %vm694_vm13 = vcmp.ge.s32.totalorder %v565_v53, %v6011_v4 }
 0x127   : > { %2249 = vmatpush.msra.mxu2 %v8429_v5  ;;  %5362 = vmatpush.msk.msra.mxu3 %vm8304_vm3, %v12807_v16  ;;  %vm8634_vm6 = vmand %vm12986_vm5, %vm12985_vm4  ;;  %vm824_vm3 = vcmp.lt.s32.totalorder %v565_v53, %v6020_v11  ;;  %v563_v43 = vadd.s32 672, %v6005_v1  ;;  %v2383_v8 = vand.u32 4294901760, %v2382_v58  ;;  %v2387_v54 = vsub.f32 %v8550_v37, %v12518_v3 }
 0x128   : > { %2286 = vmatpush.msrb.mxu0 %v12989_v51  ;;  %2204 = vmatpush.msra.mxu1 %v2203_v19  ;;  %v1082_v36 = vsel %vm8615_vm0, 0.0625, %v12813_v12  ;;  %v12990_v51 = vand.u32 4294901760, %v8071_v48  ;;  %v1081_v14 = vsel %vm8634_vm6, 0.0625, %v12813_v12  ;;  %v562_v58 = vadd.s32 664, %v6005_v1  ;;  %vm8680_vm4 = vmand %vm694_vm13, %vm824_vm3 }
 0x129   : > { %2251 = vmatpush.msra.mxu2 %v8440_v44  ;;  %5363 = vmatpush.msk.msra.mxu3 %vm8349_vm12, %v12807_v16  ;;  %v12991_v48 = vand.u32 4294901760, %v8578_v9  ;;  %v8673_v19 = vsub.f32 %v1083_v56, %v1083_v56  ;;  %v561_v56 = vadd.s32 656, %v6005_v1  ;;  %v12995_v53 = vand.u32 4294901760, %v8374_v31 }
 0x12a   : > { %2289 = vmatpush.msrb.mxu0 %v12990_v51  ;;  %2254 = vmatmul.f32.vlgmr.msra.gmra.mxu2 %v8374_v31  ;;  %v2388_v23 = vand.u32 4294901760, %v2387_v54  ;;  %v12996_v3 = vand.u32 4294901760, %v8599_v27  ;;  %vm12997_vm3 = vcmp.lt.s32.totalorder %v564_v57, %v6020_v11  ;;  %vm12998_vm13 = vcmp.ge.s32.totalorder %v564_v57, %v6011_v4 }
 0x12b   : > { %5381 = vmatpush.msk.msrb.mxu2 %vm8422_vm1, %v12807_v16  ;;  %2209 = vmatpush.msra.mxu1 %v2208_v45  ;;  %v2392_v51 = vsub.f32 %v8578_v9, %v12991_v48  ;;  %v12994_v45 = vand.u32 4294901760, %v8083_v32  ;;  %v8689_v48 = vsub.f32 %v1082_v36, %v1082_v36  ;;  %v8702_v36 = vsub.f32 %v1081_v14, %v1081_v14  ;;  %vm8708_vm5 = vmand %vm12998_vm13, %vm12997_vm3 }
 0x12c   : > { %5364 = vmatpush.msk.msra.mxu3 %vm8369_vm2, %v12807_v16  ;;  %v2397_v32 = vsub.f32 %v8599_v27, %v12996_v3  ;;  %v1080_v31 = vsel %vm8680_vm4, 0.0625, %v12813_v12  ;;  %v560_v3 = vadd.s32 648, %v6005_v1  ;;  %v13001_v14 = vand.u32 4294901760, %v8131_v62 }
 0x12d   : > { %2292 = vmatpush.msrb.mxu0 %v12994_v45  ;;  %2277 = vmatmul.f32.vlgmr.msra.gmra.mxu3 %v12995_v53  ;;  %v2393_v57 = vand.u32 4294901760, %v2392_v51  ;;  %v13002_v54 = vand.u32 4294901760, %v8626_v21  ;;  %v12536_v55 = vand.u32 4294901760, %v8673_v19  ;;  %vm13004_vm3 = vcmp.lt.s32.totalorder %v563_v43, %v6020_v11 }
 0x12e   : > { %5382 = vmatpush.msk.msrb.mxu2 %vm8451_vm11, %v12807_v16  ;;  %2384 = vmatpush.msrb.mxu3 %v2383_v8  ;;  %v13003_v8 = vand.u32 4294901760, %v8628_v0  ;;  %vm13005_vm13 = vcmp.ge.s32.totalorder %v563_v43, %v6011_v4  ;;  %vm13008_vm11 = vnez %v12914_v29  ;;  %v13009_v43 = vand.u32 4294901760, %v8150_v50 }
 0x12f   : > { %2214 = vmatpush.msra.mxu1 %v2213_v25  ;;  %2295 = vmatpush.msrb.mxu0 %v13001_v14  ;;  %v2402_v25 = vsub.f32 %v8626_v21, %v13002_v54  ;;  %vm8732_vm1 = vmand %vm13005_vm13, %vm13004_vm3  ;;  %v1079_v14 = vsel %vm8708_vm5, 0.0625, %v12813_v12  ;;  %vm820_vm3 = vcmp.lt.s32.totalorder %v561_v56, %v6020_v11  ;;  %v2398_v29 = vand.u32 4294901760, %v2397_v32 }
 0x130   : > { %2216 = vmatmul.f32.vlgmr.msra.gmra.mxu1 %v8319_v39  ;;  %v2407_v53 = vsub.f32 %v8628_v0, %v13003_v8  ;;  %5383 = vmatpush.msk.msrb.mxu2 %vm8500_vm8, %v12807_v16  ;;  %v8750_v54 = vsub.f32 %v1080_v31, %v1080_v31  ;;  %vm13011_vm13 = vcmp.ge.s32.totalorder %v562_v58, %v6011_v4  ;;  %v559_v51 = vadd.s32 640, %v6005_v1 }
 0x131   : > { %5365 = vmatpush.msk.msrb.mxu1 %vm13008_vm11, %v12807_v16  ;;  %2389 = vmatpush.msrb.mxu3 %v2388_v23  ;;  %vm13010_vm11 = vcmp.lt.s32.totalorder %v562_v58, %v6020_v11  ;;  %vm13014_vm2 = vnez %v12917_v18  ;;  %v12535_v50 = vand.u32 4294901760, %v8702_v36  ;;  %v1078_v23 = vsel %vm8732_vm1, 0.0625, %v12813_v12 }
 0x132   : > { %2298 = vmatpush.msrb.mxu0 %v13009_v43  ;;  %vm8756_vm8 = vmand %vm13011_vm13, %vm13010_vm11  ;;  %5384 = vmatpush.msk.msrb.mxu2 %vm8521_vm7, %v12807_v16  ;;  %vm819_vm13 = vcmp.lt.s32.totalorder %v560_v3, %v6020_v11  ;;  %v13015_v58 = vand.u32 4294901760, %v8214_v52  ;;  %v2403_v18 = vand.u32 4294901760, %v2402_v25  ;;  %v2412_v32 = vsub.f32 %v8673_v19, %v12536_v55 }
 0x133   : > { %5366 = vmatpush.msk.msrb.mxu1 %vm13014_vm2, %v12807_v16  ;;  %2394 = vmatpush.msrb.mxu3 %v2393_v57  ;;  %v8778_v31 = vsub.f32 %v1079_v14, %v1079_v14  ;;  %vm13016_vm2 = vcmp.ge.s32.totalorder %v561_v56, %v6011_v4  ;;  %vm13019_vm11 = vnez %v12920_v6  ;;  %v2408_v52 = vand.u32 4294901760, %v2407_v53 }
 0x134   : > { %2301 = vmatpush.msrb.mxu0 %v13015_v58  ;;  %vm8784_vm7 = vmand %vm13016_vm2, %vm820_vm3  ;;  %5385 = vmatpush.msk.msrb.mxu2 %vm8535_vm10, %v12807_v16  ;;  %v13020_v57 = vand.u32 4294901760, %v8689_v48  ;;  %v1077_v56 = vsel %vm8756_vm8, 0.0625, %v12813_v12  ;;  %v13021_v14 = vand.u32 4294901760, %v8229_v47  ;;  %v2426_v6 = vand.u32 4294901760, %v8750_v54 }
 0x135   : > { %5367 = vmatpush.msk.msrb.mxu1 %vm13019_vm11, %v12807_v16  ;;  %2399 = vmatpush.msrb.mxu3 %v2398_v29  ;;  %v8803_v58 = vsub.f32 %v1078_v23, %v1078_v23  ;;  %vm13022_vm3 = vcmp.ge.s32.totalorder %v560_v3, %v6011_v4  ;;  %v13023_v53 = vmov 0  ;;  %vm688_vm2 = vcmp.ge.s32.totalorder %v559_v51, %v6011_v4  ;;  %v1127_v29 = vld [vmem:[%s5999_s30 + $0x28] sm:$0xff] }
 0x136   : > { %v2417_v25 = vsub.f32 %v8689_v48, %v13020_v57  ;;  %2304 = vmatpush.msrb.mxu0 %v13021_v14  ;;  %vm8809_vm11 = vmand %vm13022_vm3, %vm819_vm13  ;;  %vm818_vm10 = vcmp.lt.s32.totalorder %v559_v51, %v6020_v11  ;;  %vm13025_vm12 = vnez %v12922_v41  ;;  %5386 = vmatpush.msk.msrb.mxu2 %vm8557_vm14, %v12807_v16  ;;  %v2422_v47 = vsub.f32 %v8702_v36, %v12535_v50 }
 0x137   : > { %v13024_v53 = vsel %vm8809_vm11, 4294967295, %v13023_v53  ;;  %5368 = vmatpush.msk.msrb.mxu1 %vm13025_vm12, %v12807_v16  ;;  %v1076_v3 = vsel %vm8784_vm7, 0.0625, %v12813_v12  ;;  %2404 = vmatpush.msrb.mxu3 %v2403_v18  ;;  %v13026_v23 = vand.u32 4294901760, %v8278_v15  ;;  %v2413_v57 = vand.u32 4294901760, %v2412_v32  ;;  %vm8844_vm13 = vmand %vm688_vm2, %vm818_vm10 }
 0x138   : > { %v2431_v41 = vand.u32 4294901760, %v8778_v31  ;;  %v8831_v14 = vsub.f32 %v1077_v56, %v1077_v56  ;;  %vm13027_vm12 = vnez %v12924_v35  ;;  %5387 = vmatpush.msk.msrb.mxu2 %vm8605_vm9, %v12807_v16  ;;  %v1075_v18 = vsel %vm8809_vm11, 0.0625, %v12813_v12 }
 0x139   : > { %2307 = vmatpush.msrb.mxu0 %v13026_v23  ;;  %5369 = vmatpush.msk.msrb.mxu1 %vm13027_vm12, %v12807_v16  ;;  %v13028_v15 = vmov 0  ;;  %v8848_v32 = vand.u32 4294901760, %v1127_v29  ;;  %v13030_v35 = vand.u32 4294901760, %v8280_v40  ;;  %v2418_v56 = vand.u32 4294901760, %v2417_v25 }
 0x13a   : > { %v13029_v15 = vsel %vm8844_vm13, 4294967295, %v13028_v15  ;;  %2409 = vmatpush.msrb.mxu3 %v2408_v52  ;;  %v2427_v23 = vsub.f32 %v8750_v54, %v2426_v6  ;;  %v2436_v50 = vand.u32 4294901760, %v8803_v58  ;;  %v8856_v55 = vsub.f32 %v1076_v3, %v1076_v3  ;;  %5388 = vmatpush.msk.msrb.mxu2 %vm8615_vm0, %v12807_v16 }
 0x13b   : > { %2310 = vmatpush.msrb.mxu0 %v13030_v35  ;;  %vm13031_vm10 = vnez %v12926_v61  ;;  %v2423_v51 = vand.u32 4294901760, %v2422_v47  ;;  %v13032_v40 = vand.u32 4294901760, %v8298_v13  ;;  %v2432_v52 = vsub.f32 %v8778_v31, %v2431_v41 }
 0x13c   : > { %5370 = vmatpush.msk.msrb.mxu1 %vm13031_vm10, %v12807_v16  ;;  %2414 = vmatpush.msrb.mxu3 %v2413_v57  ;;  %v2441_v25 = vand.u32 4294901760, %v8831_v14  ;;  %v8870_v3 = vsub.f32 %v1075_v18, %v1075_v18  ;;  %v1074_v61 = vsel %vm8844_vm13, 0.0625, %v12813_v12  ;;  %vm13033_vm3 = vnez %v12928_v42 }
 0x13d   : > { %2313 = vmatpush.msrb.mxu0 %v13032_v40  ;;  %5389 = vmatpush.msk.msrb.mxu2 %vm8634_vm6, %v12807_v16  ;;  %v8882_v13 = vsub.f32 %v1127_v29, %v8848_v32  ;;  %v13034_v47 = vand.u32 4294901760, %v8343_v26  ;;  %v2428_v57 = vand.u32 4294901760, %v2427_v23  ;;  %v2437_v18 = vsub.f32 %v8803_v58, %v2436_v50 }
 0x13e   : > { %5371 = vmatpush.msk.msrb.mxu1 %vm13033_vm3, %v12807_v16  ;;  %2419 = vmatpush.msrb.mxu3 %v2418_v56  ;;  %v2446_v35 = vand.u32 4294901760, %v8856_v55  ;;  %vm13035_vm2 = vnez %v12930_v59  ;;  %v8896_v42 = vsub.f32 %v1074_v61, %v1074_v61  ;;  %v13036_v26 = vand.u32 4294901760, %v8363_v34 }
 0x13f   : > { %2316 = vmatpush.msrb.mxu0 %v13034_v47  ;;  %5390 = vmatpush.msk.msrb.mxu2 %vm8680_vm4, %v12807_v16  ;;  %v2433_v29 = vand.u32 4294901760, %v2432_v52  ;;  %v2442_v56 = vsub.f32 %v8831_v14, %v2441_v25  ;;  %v2451_v23 = vand.u32 4294901760, %v8870_v3  ;;  %vm13037_vm12 = vnez %v12933_v33 }
 0x140   : > { %5372 = vmatpush.msk.msrb.mxu1 %vm13035_vm2, %v12807_v16  ;;  %2424 = vmatpush.msrb.mxu3 %v2423_v51  ;;  %v2373_v59 = vand.u32 4294901760, %v8882_v13  ;;  %v13038_v34 = vand.u32 4294901760, %v8378_v60  ;;  %v2438_v51 = vand.u32 4294901760, %v2437_v18  ;;  %v2447_v40 = vsub.f32 %v8856_v55, %v2446_v35 }
 0x141   : > { %2319 = vmatpush.msrb.mxu0 %v13036_v26  ;;  %5391 = vmatpush.msk.msrb.mxu2 %vm8708_vm5, %v12807_v16  ;;  %v2456_v33 = vand.u32 4294901760, %v8896_v42  ;;  %v13039_v52 = vand.u32 4294901760, %v8429_v5  ;;  %v2443_v60 = vand.u32 4294901760, %v2442_v56  ;;  %v2452_v61 = vsub.f32 %v8870_v3, %v2451_v23 }
 0x142   : > { %5373 = vmatpush.msk.msrb.mxu1 %vm13037_vm12, %v12807_v16  ;;  %2429 = vmatpush.msrb.mxu3 %v2428_v57  ;;  %vm13040_vm10 = vnez %v12938_v63  ;;  %v2374_v17 = vsub.f32 %v8882_v13, %v2373_v59  ;;  %v13041_v5 = vand.u32 4294901760, %v8440_v44  ;;  %v2448_v47 = vand.u32 4294901760, %v2447_v40  ;;  %v13042_v57 = vld [vmem:[#allocation19_spill] sm:$0xff]  ;;  %v13044_v44 = vld [vmem:[#allocation16_spill] sm:$0xff] }
 0x143   : > { %2322 = vmatpush.msrb.mxu0 %v13038_v34  ;;  %5392 = vmatpush.msk.msrb.mxu2 %vm8732_vm1, %v12807_v16  ;;  %v2457_v63 = vsub.f32 %v8896_v42, %v2456_v33  ;;  %v2453_v18 = vand.u32 4294901760, %v2452_v61  ;;  %vm13045_vm3 = vnez %v13044_v44  ;;  %v13048_v34 = vand.u32 4294901760, %v8491_v46 }
 0x144   : > { %5374 = vmatpush.msk.msrb.mxu1 %vm8196_vm15, %v12807_v16  ;;  %2434 = vmatpush.msrb.mxu3 %v2433_v29  ;;  %vm13043_vm15 = vnez %v13042_v57  ;;  %v2375_v26 = vand.u32 4294901760, %v2374_v17  ;;  %v13046_v29 = vld [vmem:[#allocation17_spill] sm:$0xff]  ;;  %v13051_v40 = vand.u32 4294901760, %v8550_v37  ;;  %v13070_v61 = vmov 0 }
 0x145   : > { %2325 = vmatpush.msrb.mxu0 %v13039_v52  ;;  %5393 = vmatpush.msk.msrb.mxu2 %vm8756_vm8, %v12807_v16  ;;  %vm13047_vm2 = vnez %v13046_v29  ;;  %v2458_v56 = vand.u32 4294901760, %v2457_v63  ;;  %v13055_v52 = vld [vmem:[#allocation20_spill] sm:$0xff]  ;;  %v13074_v38 = vmov 0  ;;  %v581_v57 = vadd.s32 816, %v6005_v1 }
 0x146   : > { %5375 = vmatpush.msk.msrb.mxu1 %vm13040_vm10, %v12807_v16  ;;  %2439 = vmatpush.msrb.mxu3 %v2438_v51  ;;  %v13049_v51 = vld [vmem:[#allocation18_spill] sm:$0xff]  ;;  %vm13052_vm10 = vnez %v12960_v28  ;;  %v588_v28 = vadd.s32 872, %v6005_v1  ;;  %v580_v44 = vadd.s32 808, %v6005_v1  ;;  %v13081_v29 = vmov 0 }
 0x147   : > { %2328 = vmatpush.msrb.mxu0 %v13041_v5  ;;  %5394 = vmatpush.msk.msrb.mxu2 %vm8784_vm7, %v12807_v16  ;;  %vm13050_vm12 = vnez %v13049_v51  ;;  %v577_v51 = vadd.s32 784, %v6005_v1 }
 0x148   : > { %2330 = vmatmul.f32.vlgmr.msrb.gmra.mxu0 %v8319_v39  ;;  %5376 = vmatpush.msk.msrb.mxu1 %vm13043_vm15, %v12807_v16  ;;  %vm13053_vm15 = vnez %v12958_v49  ;;  %v13059_v49 = vand.u32 4294901760, %v8626_v21 }
 0x149   : > { %2444 = vmatpush.msrb.mxu3 %v2443_v60  ;;  %2466 = vmatpush.msra.mxu0 %v8491_v46  ;;  %v13054_v46 = vand.u32 4294901760, %v8578_v9  ;;  %v13067_v60 = vmov 0 }
 0x14a   : > { %5377 = vmatpush.msk.msrb.mxu1 %vm13045_vm3, %v12807_v16  ;;  %5395 = vmatpush.msk.msrb.mxu2 %vm8809_vm11, %v12807_v16  ;;  %vm13056_vm3 = vnez %v13055_v52 }
 0x14b   : > { %2449 = vmatpush.msrb.mxu3 %v2448_v47  ;;  %2468 = vmatpush.msra.mxu0 %v8550_v37  ;;  %v590_v37 = vadd.s32 888, %v6005_v1  ;;  %v13077_v47 = vmov 0 }
 0x14c   : > { %5378 = vmatpush.msk.msrb.mxu1 %vm13047_vm2, %v12807_v16  ;;  %5396 = vmatpush.msk.msrb.mxu2 %vm8844_vm13, %v12807_v16  ;;  %vm13058_vm2 = vnez %v12966_v2  ;;  %v13061_v2 = vand.u32 4294901760, %v8628_v0 }
 0x14d   : > { %2454 = vmatpush.msrb.mxu3 %v2453_v18  ;;  %2470 = vmatpush.msra.mxu0 %v8578_v9  ;;  %v13063_v9 = vmov 0  ;;  %v13079_v18 = vmov 0 }
 0x14e   : > { %2376 = vmatmul.f32.vlgmr.msrb.gmra.mxu2 %v2375_v26  ;;  %5379 = vmatpush.msk.msrb.mxu1 %vm13050_vm12, %v12807_v16  ;;  %vm719_vm12 = vcmp.ge.s32.totalorder %v590_v37, %v6011_v4 }
 0x14f   : > { %2528 = vmatpush.msra.mxu2 %v13048_v34  ;;  %2459 = vmatpush.msrb.mxu3 %v2458_v56  ;;  %v578_v34 = vadd.s32 792, %v6005_v1 }
 0x150   : > { %2472 = vmatpush.msra.mxu0 %v8599_v27  ;;  %2461 = vmatmul.f32.vlgmr.msrb.gmra.mxu3 %v8848_v32 }
 0x151   : > { %2531 = vmatpush.msra.mxu2 %v13051_v40  ;;  %5413 = vmatpush.msk.msra.mxu3 %vm13052_vm10, %v12807_v16 }
 0x152   : > { %5380 = vmatpush.msk.msrb.mxu1 %vm13053_vm15, %v12807_v16  ;;  %2474 = vmatpush.msra.mxu0 %v8626_v21  ;;  %vm13060_vm15 = vnez %v12970_v24  ;;  %v13065_v24 = vand.u32 4294901760, %v8673_v19  ;;  %v13066_v21 = vand.u32 4294901760, %v8689_v48 }
 0x153   : > { %2351 = vmatmul.f32.vlgmr.msrb.gmra.mxu1 %v8319_v39  ;;  %2534 = vmatpush.msra.mxu2 %v13054_v46  ;;  %v13057_v39 = vand.u32 4294901760, %v8599_v27  ;;  %v589_v27 = vadd.s32 880, %v6005_v1 }
 0x154   : > { %5397 = vmatpush.msk.msra.mxu1 %vm13052_vm10, %v12807_v16  ;;  %5414 = vmatpush.msk.msra.mxu3 %vm13056_vm3, %v12807_v16  ;;  %vm849_vm10 = vcmp.lt.s32.totalorder %v590_v37, %v6020_v11 }
 0x155   : > { %2476 = vmatpush.msra.mxu0 %v8628_v0  ;;  %2537 = vmatpush.msra.mxu2 %v13057_v39  ;;  %vm848_vm13 = vcmp.lt.s32.totalorder %v589_v27, %v6020_v11 }
 0x156   : > { %5398 = vmatpush.msk.msra.mxu1 %vm13056_vm3, %v12807_v16  ;;  %5415 = vmatpush.msk.msra.mxu3 %vm13058_vm2, %v12807_v16  ;;  %vm13062_vm3 = vnez %v12973_v22  ;;  %v587_v22 = vadd.s32 864, %v6005_v1 }
 0x157   : > { %2478 = vmatpush.msra.mxu0 %v8673_v19  ;;  %2540 = vmatpush.msra.mxu2 %v13059_v49  ;;  %v586_v19 = vadd.s32 856, %v6005_v1  ;;  %v13089_v49 = vmov 0 }
 0x158   : > { %5399 = vmatpush.msk.msra.mxu1 %vm13058_vm2, %v12807_v16  ;;  %5416 = vmatpush.msk.msra.mxu3 %vm13060_vm15, %v12807_v16  ;;  %vm9022_vm2 = vmand %vm719_vm12, %vm849_vm10  ;;  %vm717_vm12 = vcmp.ge.s32.totalorder %v588_v28, %v6011_v4  ;;  %vm847_vm10 = vcmp.lt.s32.totalorder %v588_v28, %v6020_v11  ;;  %v576_v28 = vadd.s32 776, %v6005_v1 }
 0x159   : > { %2480 = vmatpush.msra.mxu0 %v8689_v48  ;;  %2543 = vmatpush.msra.mxu2 %v13061_v2  ;;  %v13064_v9 = vsel %vm9022_vm2, 4294967295, %v13063_v9  ;;  %v1105_v0 = vsel %vm9022_vm2, 0.0625, %v12813_v12  ;;  %v13069_v48 = vand.u32 4294901760, %v8702_v36 }
 0x15a   : > { %5400 = vmatpush.msk.msra.mxu1 %vm13060_vm15, %v12807_v16  ;;  %5417 = vmatpush.msk.msra.mxu3 %vm13062_vm3, %v12807_v16  ;;  %vm718_vm15 = vcmp.ge.s32.totalorder %v589_v27, %v6011_v4  ;;  %v9071_v17 = vsub.f32 %v1105_v0, %v1105_v0 }
 0x15b   : > { %2482 = vmatpush.msra.mxu0 %v8702_v36  ;;  %2546 = vmatpush.msra.mxu2 %v13065_v24  ;;  %v584_v36 = vadd.s32 840, %v6005_v1 }
 0x15c   : > { %5401 = vmatpush.msk.msra.mxu1 %vm13062_vm3, %v12807_v16  ;;  %5418 = vmatpush.msk.msra.mxu3 %vm8557_vm14, %v12807_v16  ;;  %vm9053_vm3 = vmand %vm718_vm15, %vm848_vm13  ;;  %vm716_vm13 = vcmp.ge.s32.totalorder %v587_v22, %v6011_v4  ;;  %vm846_vm15 = vcmp.lt.s32.totalorder %v587_v22, %v6020_v11  ;;  %v13094_v22 = vmov 0 }
 0x15d   : > { %2484 = vmatpush.msra.mxu0 %v8750_v54  ;;  %2549 = vmatpush.msra.mxu2 %v13066_v21  ;;  %v13068_v60 = vsel %vm9053_vm3, 4294967295, %v13067_v60  ;;  %v1104_v7 = vsel %vm9053_vm3, 0.0625, %v12813_v12  ;;  %vm9102_vm11 = vmand %vm716_vm13, %vm846_vm15  ;;  %v13072_v54 = vmov 0  ;;  %vm843_vm15 = vcmp.lt.s32.totalorder %v584_v36, %v6020_v11  ;;  %v1128_v21 = vld [vmem:[%s5999_s30 + $0x30] sm:$0xff] }
 0x15e   : > { %5402 = vmatpush.msk.msra.mxu1 %vm8557_vm14, %v12807_v16  ;;  %5419 = vmatpush.msk.msra.mxu3 %vm8605_vm9, %v12807_v16  ;;  %vm9063_vm14 = vmand %vm717_vm12, %vm847_vm10  ;;  %vm845_vm12 = vcmp.lt.s32.totalorder %v586_v19, %v6020_v11  ;;  %vm844_vm10 = vcmp.lt.s32.totalorder %v585_v30, %v6020_v11  ;;  %v13073_v54 = vsel %vm9102_vm11, 4294967295, %v13072_v54  ;;  %v1102_v20 = vsel %vm9102_vm11, 0.0625, %v12813_v12 }
 0x15f   : > { %2486 = vmatpush.msra.mxu0 %v8778_v31  ;;  %2552 = vmatpush.msra.mxu2 %v13069_v48  ;;  %v13071_v61 = vsel %vm9063_vm14, 4294967295, %v13070_v61  ;;  %v1103_v10 = vsel %vm9063_vm14, 0.0625, %v12813_v12  ;;  %v12569_v31 = vand.u32 4294901760, %v9071_v17  ;;  %v9169_v63 = vsub.f32 %v1102_v20, %v1102_v20 }
 0x160   : > { %5403 = vmatpush.msk.msra.mxu1 %vm8605_vm9, %v12807_v16  ;;  %5420 = vmatpush.msk.msra.mxu3 %vm8615_vm0, %v12807_v16  ;;  %vm715_vm9 = vcmp.ge.s32.totalorder %v586_v19, %v6011_v4  ;;  %v9123_v5 = vsub.f32 %v1103_v10, %v1103_v10  ;;  %v13099_v19 = vmov 0 }
 0x161   : > { %2488 = vmatpush.msra.mxu0 %v8803_v58  ;;  %2555 = vmatpush.msra.mxu2 %v2426_v6  ;;  %v583_v6 = vadd.s32 832, %v6005_v1  ;;  %v9159_v45 = vsub.f32 %v9071_v17, %v12569_v31  ;;  %v12563_v46 = vand.u32 4294901760, %v9169_v63  ;;  %v1237_v31 = vpop.f32.mrf.mxu1 }
 0x162   : > { %5404 = vmatpush.msk.msra.mxu1 %vm8615_vm0, %v12807_v16  ;;  %5421 = vmatpush.msk.msra.mxu3 %vm8634_vm6, %v12807_v16  ;;  %vm9111_vm0 = vmand %vm715_vm9, %vm845_vm12  ;;  %v12564_v62 = vand.u32 4294901760, %v9123_v5 }
 0x163   : > { %2490 = vmatpush.msra.mxu0 %v8831_v14  ;;  %2558 = vmatpush.msra.mxu2 %v2431_v41  ;;  %v13075_v38 = vsel %vm9111_vm0, 4294967295, %v13074_v38  ;;  %v9121_v41 = vsub.f32 %v1104_v7, %v1104_v7  ;;  %v1101_v58 = vsel %vm9111_vm0, 0.0625, %v12813_v12  ;;  %vm712_vm9 = vcmp.ge.s32.totalorder %v583_v6, %v6011_v4 }
 0x164   : > { %5405 = vmatpush.msk.msra.mxu1 %vm8634_vm6, %v12807_v16  ;;  %5422 = vmatpush.msk.msra.mxu3 %vm8680_vm4, %v12807_v16  ;;  %vm13076_vm6 = vcmp.ge.s32.totalorder %v585_v30, %v6011_v4  ;;  %vm842_vm12 = vcmp.lt.s32.totalorder %v583_v6, %v6020_v11  ;;  %v9186_v26 = vsub.f32 %v1101_v58, %v1101_v58  ;;  %v2628_v56 = vand.u32 4294901760, %v9159_v45 }
 0x165   : > { %2492 = vmatpush.msra.mxu0 %v8856_v55  ;;  %2561 = vmatpush.msra.mxu2 %v2436_v50  ;;  %vm9127_vm13 = vmand %vm13076_vm6, %vm844_vm10  ;;  %v582_v50 = vadd.s32 824, %v6005_v1  ;;  %v9248_v40 = vsub.f32 %v9123_v5, %v12564_v62  ;;  %v2642_v24 = vsub.f32 %v9169_v63, %v12563_v46  ;;  %v13103_v6 = vmov 0 }
 0x166   : > { %5406 = vmatpush.msk.msra.mxu1 %vm8680_vm4, %v12807_v16  ;;  %v13078_v47 = vsel %vm9127_vm13, 4294967295, %v13077_v47  ;;  %5423 = vmatpush.msk.msra.mxu3 %vm8708_vm5, %v12807_v16  ;;  %vm713_vm4 = vcmp.ge.s32.totalorder %v584_v36, %v6011_v4  ;;  %v1100_v14 = vsel %vm9127_vm13, 0.0625, %v12813_v12  ;;  %v12561_v37 = vand.u32 4294901760, %v9186_v26 }
 0x167   : > { %2494 = vmatpush.msra.mxu0 %v8870_v3  ;;  %2564 = vmatpush.msra.mxu2 %v2441_v25  ;;  %v12565_v25 = vand.u32 4294901760, %v9121_v41  ;;  %vm711_vm10 = vcmp.ge.s32.totalorder %v582_v50, %v6011_v4  ;;  %vm841_vm6 = vcmp.lt.s32.totalorder %v582_v50, %v6020_v11  ;;  %v9204_v55 = vsub.f32 %v1100_v14, %v1100_v14 }
 0x168   : > { %5407 = vmatpush.msk.msra.mxu1 %vm8708_vm5, %v12807_v16  ;;  %5424 = vmatpush.msk.msra.mxu3 %vm8732_vm1, %v12807_v16  ;;  %vm9175_vm5 = vmand %vm713_vm4, %vm843_vm15  ;;  %vm710_vm4 = vcmp.ge.s32.totalorder %v581_v57, %v6011_v4  ;;  %vm840_vm15 = vcmp.lt.s32.totalorder %v581_v57, %v6020_v11  ;;  %v13083_v3 = vmov 0  ;;  %v2647_v0 = vsub.f32 %v9186_v26, %v12561_v37 }
 0x169   : > { %2496 = vmatpush.msra.mxu0 %v8896_v42  ;;  %v13080_v18 = vsel %vm9175_vm5, 4294967295, %v13079_v18  ;;  %2567 = vmatpush.msra.mxu2 %v2446_v35  ;;  %v579_v35 = vadd.s32 800, %v6005_v1  ;;  %v1099_v8 = vsel %vm9175_vm5, 0.0625, %v12813_v12  ;;  %v2632_v43 = vsub.f32 %v9121_v41, %v12565_v25  ;;  %v1152_v25 = vpop.f32.mrf.mxu0 }
 0x16a   : > { %2499 = vmatmul.f32.vlgmr.msra.gmra.mxu0 %v8882_v13  ;;  %5408 = vmatpush.msk.msra.mxu1 %vm8732_vm1, %v12807_v16  ;;  %vm9192_vm1 = vmand %vm712_vm9, %vm842_vm12  ;;  %vm839_vm12 = vcmp.lt.s32.totalorder %v580_v44, %v6020_v11  ;;  %v13086_v42 = vmov 0  ;;  %v12553_v52 = vand.u32 4294901760, %v9204_v55  ;;  %v2643_v20 = vand.u32 4294901760, %v2642_v24 }
 0x16b   : > { %5425 = vmatpush.msk.msra.mxu3 %vm8756_vm8, %v12807_v16  ;;  %v13082_v29 = vsel %vm9192_vm1, 4294967295, %v13081_v29  ;;  %5429 = vmatpush.msk.msrb.mxu0 %vm9022_vm2, %v12807_v16  ;;  %v2633_v2 = vand.u32 4294901760, %v2632_v43  ;;  %vm13093_vm9 = vcmp.ge.s32.totalorder %v579_v35, %v6011_v4  ;;  %v606_v14 = vadd.s32 1016, %v6005_v1 }
 0x16c   : > { %5409 = vmatpush.msk.msra.mxu1 %vm8756_vm8, %v12807_v16  ;;  %2570 = vmatpush.msra.mxu2 %v2451_v23  ;;  %vm9227_vm8 = vmand %vm711_vm10, %vm841_vm6  ;;  %v1098_v23 = vsel %vm9192_vm1, 0.0625, %v12813_v12  ;;  %vm13092_vm6 = vcmp.lt.s32.totalorder %v579_v35, %v6020_v11  ;;  %v9344_v48 = vsub.f32 %v9204_v55, %v12553_v52  ;;  %v13115_v52 = vmov 0 }
 0x16d   : > { %5426 = vmatpush.msk.msra.mxu3 %vm8784_vm7, %v12807_v16  ;;  %5430 = vmatpush.msk.msrb.mxu0 %vm9053_vm3, %v12807_v16  ;;  %v13084_v3 = vsel %vm9227_vm8, 4294967295, %v13083_v3  ;;  %vm9256_vm10 = vmand %vm710_vm4, %vm840_vm15  ;;  %v9273_v39 = vsub.f32 %v1098_v23, %v1098_v23  ;;  %vm13088_vm4 = vcmp.ge.s32.totalorder %v580_v44, %v6011_v4  ;;  %v1097_v27 = vsel %vm9227_vm8, 0.0625, %v12813_v12 }
 0x16e   : > { %5410 = vmatpush.msk.msra.mxu1 %vm8784_vm7, %v12807_v16  ;;  %2573 = vmatpush.msra.mxu2 %v2456_v33  ;;  %vm13085_vm7 = vnez %v13024_v53  ;;  %v13087_v42 = vsel %vm9256_vm10, 4294967295, %v13086_v42  ;;  %v9264_v33 = vsub.f32 %v1099_v8, %v1099_v8  ;;  %vm9279_vm15 = vmand %vm13088_vm4, %vm839_vm12  ;;  %v1096_v53 = vsel %vm9256_vm10, 0.0625, %v12813_v12 }
 0x16f   : > { %5427 = vmatpush.msk.msra.mxu3 %vm13085_vm7, %v12807_v16  ;;  %5431 = vmatpush.msk.msrb.mxu0 %vm9063_vm14, %v12807_v16  ;;  %v13090_v49 = vsel %vm9279_vm15, 4294967295, %v13089_v49  ;;  %vm836_vm4 = vcmp.lt.s32.totalorder %v577_v51, %v6020_v11  ;;  %vm9309_vm10 = vmand %vm13093_vm9, %vm13092_vm6  ;;  %vm13097_vm9 = vcmp.lt.s32.totalorder %v578_v34, %v6020_v11  ;;  %vm13098_vm6 = vcmp.ge.s32.totalorder %v578_v34, %v6011_v4 }
 0x170   : > { %2575 = vmatmul.f32.vlgmr.msra.gmra.mxu2 %v8848_v32  ;;  %5411 = vmatpush.msk.msra.mxu1 %vm13085_vm7, %v12807_v16  ;;  %vm13091_vm7 = vnez %v13029_v15  ;;  %v13095_v22 = vsel %vm9309_vm10, 4294967295, %v13094_v22  ;;  %vm9328_vm12 = vmand %vm13098_vm6, %vm13097_vm9  ;;  %v1095_v30 = vsel %vm9279_vm15, 0.0625, %v12813_v12  ;;  %v575_v15 = vadd.s32 768, %v6005_v1 }
 0x171   : > { %2711 = vmatpush.msrb.mxu2 %v9071_v17  ;;  %5428 = vmatpush.msk.msra.mxu3 %vm13091_vm7, %v12807_v16  ;;  %13096 = vst [vmem:[#allocation19_spill] sm:$0xff] %v13095_v22  ;;  %v13100_v19 = vsel %vm9328_vm12, 4294967295, %v13099_v19  ;;  %v12552_v7 = vand.u32 4294901760, %v9264_v33  ;;  %v9347_v10 = vsub.f32 %v1097_v27, %v1097_v27  ;;  %v9349_v36 = vsub.f32 %v1096_v53, %v1096_v53 }
 0x172   : > { %5432 = vmatpush.msk.msrb.mxu0 %vm9102_vm11, %v12807_v16  ;;  %2596 = vmatmul.f32.vlgmr.msra.gmra.mxu3 %v8848_v32  ;;  %v2638_v32 = vand.u32 4294901760, %v9248_v40  ;;  %13101 = vst [vmem:[#allocation16_spill] sm:$0xff] %v13100_v19  ;;  %v12551_v13 = vand.u32 4294901760, %v9273_v39  ;;  %vm705_vm6 = vcmp.ge.s32.totalorder %v576_v28, %v6011_v4  ;;  %v9371_v50 = vsub.f32 %v1095_v30, %v1095_v30 }
 0x173   : > { %2713 = vmatpush.msrb.mxu2 %v9121_v41  ;;  %5445 = vmatpush.msk.msrb.mxu3 %vm9022_vm2, %v12807_v16  ;;  %vm835_vm2 = vcmp.lt.s32.totalorder %v576_v28, %v6020_v11  ;;  %v1094_v58 = vsel %vm9309_vm10, 0.0625, %v12813_v12  ;;  %v1093_v57 = vsel %vm9328_vm12, 0.0625, %v12813_v12  ;;  %v2657_v44 = vsub.f32 %v9264_v33, %v12552_v7 }
 0x174   : > { %5412 = vmatpush.msk.msra.mxu1 %vm13091_vm7, %v12807_v16  ;;  %5433 = vmatpush.msk.msrb.mxu0 %vm9111_vm0, %v12807_v16  ;;  %vm13102_vm7 = vcmp.ge.s32.totalorder %v577_v51, %v6011_v4  ;;  %v12550_v35 = vand.u32 4294901760, %v9347_v10  ;;  %v13106_v8 = vmov 0  ;;  %v2648_v34 = vand.u32 4294901760, %v2647_v0 }
 0x175   : > { %2522 = vmatmul.f32.vlgmr.msra.gmra.mxu1 %v2373_v59  ;;  %vm9355_vm9 = vmand %vm13102_vm7, %vm836_vm4  ;;  %2715 = vmatpush.msrb.mxu2 %v9123_v5  ;;  %v9363_v59 = vand.u32 4294901760, %v1128_v21  ;;  %vm834_vm7 = vcmp.lt.s32.totalorder %v575_v15, %v6020_v11  ;;  %v2653_v23 = vand.u32 4294901760, %v9344_v48  ;;  %v2662_v51 = vsub.f32 %v9273_v39, %v12551_v13 }
 0x176   : > { %v13104_v6 = vsel %vm9355_vm9, 4294967295, %v13103_v6  ;;  %2629 = vmatpush.msrb.mxu1 %v2628_v56  ;;  %5446 = vmatpush.msk.msrb.mxu3 %vm9053_vm3, %v12807_v16  ;;  %v1092_v45 = vsel %vm9355_vm9, 0.0625, %v12813_v12  ;;  %v12549_v56 = vand.u32 4294901760, %v9349_v36  ;;  %vm9401_vm4 = vmand %vm705_vm6, %vm835_vm2  ;;  %v9419_v40 = vsub.f32 %v1094_v58, %v1094_v58 }
 0x177   : > { %13105 = vst [vmem:[#allocation17_spill] sm:$0xff] %v13104_v6  ;;  %5434 = vmatpush.msk.msrb.mxu0 %vm9127_vm13, %v12807_v16  ;;  %2717 = vmatpush.msrb.mxu2 %v9169_v63  ;;  %v13107_v8 = vsel %vm9401_vm4, 4294967295, %v13106_v8  ;;  %v9411_v43 = vsub.f32 %v1128_v21, %v9363_v59  ;;  %v12546_v27 = vand.u32 4294901760, %v9371_v50  ;;  %v9422_v53 = vsub.f32 %v1093_v57, %v1093_v57  ;;  %v1275_v6 = vpop.f32.mrf.mxu2 }
 0x178   : > { %2634 = vmatpush.msrb.mxu1 %v2633_v2  ;;  %5447 = vmatpush.msk.msrb.mxu3 %vm9063_vm14, %v12807_v16  ;;  %13108 = vst [vmem:[#allocation18_spill] sm:$0xff] %v13107_v8  ;;  %vm13109_vm2 = vcmp.ge.s32.totalorder %v575_v15, %v6011_v4  ;;  %v13110_v28 = vmov 0  ;;  %v9432_v2 = vsub.f32 %v1092_v45, %v1092_v45  ;;  %v1091_v24 = vsel %vm9401_vm4, 0.0625, %v12813_v12 }
 0x179   : > { %5435 = vmatpush.msk.msrb.mxu0 %vm9175_vm5, %v12807_v16  ;;  %2719 = vmatpush.msrb.mxu2 %v9186_v26  ;;  %vm9428_vm6 = vmand %vm13109_vm2, %vm834_vm7  ;;  %vm865_vm14 = vcmp.lt.s32.totalorder %v606_v14, %v6020_v11  ;;  %v605_v21 = vadd.s32 1008, %v6005_v1  ;;  %v2667_v0 = vsub.f32 %v9347_v10, %v12550_v35  ;;  %v9453_v30 = vsub.f32 %v9349_v36, %v12549_v56 }
 0x17a   : > { %2639 = vmatpush.msrb.mxu1 %v2638_v32  ;;  %5448 = vmatpush.msk.msrb.mxu3 %vm9102_vm11, %v12807_v16  ;;  %v13111_v28 = vsel %vm9428_vm6, 4294967295, %v13110_v28  ;;  %vm735_vm11 = vcmp.ge.s32.totalorder %v606_v14, %v6011_v4  ;;  %v2658_v32 = vand.u32 4294901760, %v2657_v44  ;;  %v2663_v15 = vand.u32 4294901760, %v2662_v51 }
 0x17b   : > { %5436 = vmatpush.msk.msrb.mxu0 %vm9192_vm1, %v12807_v16  ;;  %2721 = vmatpush.msrb.mxu2 %v9204_v55  ;;  %v12562_v48 = vand.u32 4294901760, %v9411_v43  ;;  %v604_v58 = vadd.s32 1000, %v6005_v1  ;;  %vm13112_vm7 = vnez %v13087_v42  ;;  %v9470_v57 = vsub.f32 %v9371_v50, %v12546_v27  ;;  %vm9480_vm2 = vmand %vm735_vm11, %vm865_vm14 }
 0x17c   : > { %2644 = vmatpush.msrb.mxu1 %v2643_v20  ;;  %5449 = vmatpush.msk.msrb.mxu3 %vm9111_vm0, %v12807_v16  ;;  %v1090_v20 = vsel %vm9428_vm6, 0.0625, %v12813_v12  ;;  %v12554_v45 = vand.u32 4294901760, %v9419_v40  ;;  %v12560_v44 = vand.u32 4294901760, %v9422_v53  ;;  %v13113_v51 = vmov 0 }
 0x17d   : > { %5437 = vmatpush.msk.msrb.mxu0 %vm9227_vm8, %v12807_v16  ;;  %2723 = vmatpush.msrb.mxu2 %v9264_v33  ;;  %v13114_v51 = vsel %vm9480_vm2, 4294967295, %v13113_v51  ;;  %v12557_v27 = vand.u32 4294901760, %v9432_v2  ;;  %vm864_vm0 = vcmp.lt.s32.totalorder %v605_v21, %v6020_v11  ;;  %v2668_v14 = vand.u32 4294901760, %v2667_v0 }
 0x17e   : > { %2649 = vmatpush.msrb.mxu1 %v2648_v34  ;;  %5450 = vmatpush.msk.msrb.mxu3 %vm9127_vm13, %v12807_v16  ;;  %v9474_v34 = vsub.f32 %v1091_v24, %v1091_v24  ;;  %vm734_vm13 = vcmp.ge.s32.totalorder %v605_v21, %v6011_v4  ;;  %v603_v24 = vadd.s32 992, %v6005_v1  ;;  %v9496_v56 = vsub.f32 %v1090_v20, %v1090_v20 }
 0x17f   : > { %5438 = vmatpush.msk.msrb.mxu0 %vm13112_vm7, %v12807_v16  ;;  %2725 = vmatpush.msrb.mxu2 %v9273_v39  ;;  %v602_v35 = vadd.s32 984, %v6005_v1  ;;  %v1121_v13 = vsel %vm9480_vm2, 0.0625, %v12813_v12  ;;  %v601_v7 = vadd.s32 976, %v6005_v1  ;;  %v2619_v0 = vsub.f32 %v9411_v43, %v12562_v48  ;;  %vm9528_vm11 = vmand %vm734_vm13, %vm864_vm0 }
 0x180   : > { %2654 = vmatpush.msrb.mxu1 %v2653_v23  ;;  %5451 = vmatpush.msk.msrb.mxu3 %vm9175_vm5, %v12807_v16  ;;  %v2673_v23 = vand.u32 4294901760, %v9453_v30  ;;  %v2682_v30 = vsub.f32 %v9419_v40, %v12554_v45  ;;  %v9522_v20 = vsub.f32 %v9422_v53, %v12560_v44  ;;  %v13116_v52 = vsel %vm9528_vm11, 4294967295, %v13115_v52 }
 0x181   : > { %5439 = vmatpush.msk.msrb.mxu0 %vm9279_vm15, %v12807_v16  ;;  %2727 = vmatpush.msrb.mxu2 %v9347_v10  ;;  %13117 = vst [vmem:[#allocation20_spill] sm:$0xff] %v13116_v52  ;;  %v12568_v45 = vand.u32 4294901760, %v9474_v34  ;;  %v9547_v21 = vsub.f32 %v1121_v13, %v1121_v13  ;;  %vm13118_vm0 = vcmp.lt.s32.totalorder %v604_v58, %v6020_v11  ;;  %v1120_v13 = vsel %vm9528_vm11, 0.0625, %v12813_v12 }
 0x182   : > { %2659 = vmatpush.msrb.mxu1 %v2658_v32  ;;  %5452 = vmatpush.msk.msrb.mxu3 %vm9192_vm1, %v12807_v16  ;;  %v2678_v32 = vand.u32 4294901760, %v9470_v57  ;;  %v9536_v57 = vsub.f32 %v9432_v2, %v12557_v27  ;;  %vm13119_vm13 = vcmp.ge.s32.totalorder %v604_v58, %v6011_v4  ;;  %v13120_v27 = vmov 0 }
 0x183   : > { %5440 = vmatpush.msk.msrb.mxu0 %vm9309_vm10, %v12807_v16  ;;  %2729 = vmatpush.msrb.mxu2 %v9349_v36  ;;  %vm9554_vm5 = vmand %vm13119_vm13, %vm13118_vm0  ;;  %vm861_vm1 = vcmp.lt.s32.totalorder %v602_v35, %v6020_v11  ;;  %vm860_vm3 = vcmp.lt.s32.totalorder %v601_v7, %v6020_v11  ;;  %v600_v58 = vadd.s32 968, %v6005_v1  ;;  %vm13122_vm0 = vcmp.lt.s32.totalorder %v603_v24, %v6020_v11 }
 0x184   : > { %2664 = vmatpush.msrb.mxu1 %v2663_v15  ;;  %5453 = vmatpush.msk.msrb.mxu3 %vm9227_vm8, %v12807_v16  ;;  %v12567_v15 = vand.u32 4294901760, %v9496_v56  ;;  %v13121_v27 = vsel %vm9554_vm5, 4294967295, %v13120_v27  ;;  %vm13123_vm13 = vcmp.ge.s32.totalorder %v603_v24, %v6011_v4  ;;  %v13124_v44 = vmov 0 }
 0x185   : > { %5441 = vmatpush.msk.msrb.mxu0 %vm9328_vm12, %v12807_v16  ;;  %2731 = vmatpush.msrb.mxu2 %v9371_v50  ;;  %vm9577_vm14 = vmand %vm13123_vm13, %vm13122_vm0  ;;  %v599_v37 = vadd.s32 960, %v6005_v1  ;;  %v2683_v48 = vand.u32 4294901760, %v2682_v30  ;;  %v2688_v46 = vand.u32 4294901760, %v9522_v20  ;;  %vm13126_vm8 = vcmp.ge.s32.totalorder %v602_v35, %v6011_v4 }
 0x186   : > { %2669 = vmatpush.msrb.mxu1 %v2668_v14  ;;  %5454 = vmatpush.msk.msrb.mxu3 %vm13112_vm7, %v12807_v16  ;;  %v2620_v14 = vand.u32 4294901760, %v2619_v0  ;;  %v13125_v44 = vsel %vm9577_vm14, 4294967295, %v13124_v44  ;;  %v1119_v0 = vsel %vm9554_vm5, 0.0625, %v12813_v12  ;;  %vm9591_vm0 = vmand %vm13126_vm8, %vm861_vm1  ;;  %v13127_v24 = vmov 0 }
 0x187   : > { %5442 = vmatpush.msk.msrb.mxu0 %vm9355_vm9, %v12807_v16  ;;  %2733 = vmatpush.msrb.mxu2 %v9419_v40  ;;  %v13128_v24 = vsel %vm9591_vm0, 4294967295, %v13127_v24  ;;  %v598_v62 = vadd.s32 952, %v6005_v1  ;;  %v2697_v35 = vsub.f32 %v9474_v34, %v12568_v45  ;;  %v9606_v30 = vsub.f32 %v1120_v13, %v1120_v13 }
 0x188   : > { %2674 = vmatpush.msrb.mxu1 %v2673_v23  ;;  %5455 = vmatpush.msk.msrb.mxu3 %vm9279_vm15, %v12807_v16  ;;  %v2693_v23 = vand.u32 4294901760, %v9536_v57  ;;  %v12574_v20 = vand.u32 4294901760, %v9547_v21  ;;  %vm13129_vm1 = vcmp.ge.s32.totalorder %v601_v7, %v6011_v4  ;;  %v9621_v57 = vsub.f32 %v9496_v56, %v12567_v15 }
 0x189   : > { %5443 = vmatpush.msk.msrb.mxu0 %vm9401_vm4, %v12807_v16  ;;  %vm9613_vm8 = vmand %vm13129_vm1, %vm860_vm3  ;;  %2735 = vmatpush.msrb.mxu2 %v9422_v53  ;;  %v1118_v13 = vsel %vm9577_vm14, 0.0625, %v12813_v12  ;;  %v9634_v7 = vsub.f32 %v1119_v0, %v1119_v0  ;;  %vm858_vm1 = vcmp.lt.s32.totalorder %v599_v37, %v6020_v11  ;;  %v597_v0 = vadd.s32 944, %v6005_v1 }
 0x18a   : > { %2679 = vmatpush.msrb.mxu1 %v2678_v32  ;;  %5456 = vmatpush.msk.msrb.mxu3 %vm9309_vm10, %v12807_v16  ;;  %v1117_v32 = vsel %vm9591_vm0, 0.0625, %v12813_v12  ;;  %v1116_v15 = vsel %vm9613_vm8, 0.0625, %v12813_v12  ;;  %v9655_v45 = vsub.f32 %v1118_v13, %v1118_v13  ;;  %vm13132_vm13 = vcmp.lt.s32.totalorder %v600_v58, %v6020_v11  ;;  %v1351_v13 = vpop.f32.mrf.mxu0 }
 0x18b   : > { %5444 = vmatpush.msk.msrb.mxu0 %vm9428_vm6, %v12807_v16  ;;  %2737 = vmatpush.msrb.mxu2 %v9432_v2  ;;  %vm13133_vm15 = vcmp.ge.s32.totalorder %v600_v58, %v6011_v4  ;;  %v13136_v22 = vand.u32 4294901760, %v9071_v17  ;;  %v2698_v19 = vand.u32 4294901760, %v2697_v35  ;;  %v2703_v17 = vand.u32 4294901760, %v9621_v57 }
 0x18c   : > { %2621 = vmatmul.f32.vlgmr.msrb.gmra.mxu0 %v2620_v14  ;;  %2684 = vmatpush.msrb.mxu1 %v2683_v48  ;;  %v2872_v48 = vsub.f32 %v9547_v21, %v12574_v20  ;;  %v12576_v14 = vand.u32 4294901760, %v9606_v30  ;;  %vm9661_vm3 = vmand %vm13133_vm15, %vm13132_vm13  ;;  %v596_v20 = vadd.s32 936, %v6005_v1  ;;  %v9684_v58 = vsub.f32 %v1116_v15, %v1116_v15 }
 0x18d   : > { %5457 = vmatpush.msk.msrb.mxu3 %vm9328_vm12, %v12807_v16  ;;  %2773 = vmatpush.msra.mxu0 %v13136_v22  ;;  %vm13137_vm12 = vcmp.ge.s32.totalorder %v599_v37, %v6011_v4  ;;  %v9682_v22 = vsub.f32 %v1117_v32, %v1117_v32  ;;  %vm13140_vm15 = vcmp.lt.s32.totalorder %v598_v62, %v6020_v11  ;;  %v13144_v35 = vand.u32 4294901760, %v9121_v41 }
 0x18e   : > { %2689 = vmatpush.msrb.mxu1 %v2688_v46  ;;  %vm9671_vm10 = vmand %vm13137_vm12, %vm858_vm1  ;;  %2739 = vmatpush.msrb.mxu2 %v9474_v34  ;;  %vm13141_vm12 = vcmp.ge.s32.totalorder %v598_v62, %v6011_v4  ;;  %v1115_v57 = vsel %vm9661_vm3, 0.0625, %v12813_v12  ;;  %vm726_vm1 = vcmp.ge.s32.totalorder %v597_v0, %v6011_v4  ;;  %v595_v15 = vadd.s32 928, %v6005_v1 }
 0x18f   : > { %5458 = vmatpush.msk.msrb.mxu3 %vm9355_vm9, %v12807_v16  ;;  %vm9690_vm13 = vmand %vm13141_vm12, %vm13140_vm15  ;;  %2776 = vmatpush.msra.mxu0 %v13144_v35  ;;  %vm856_vm9 = vcmp.lt.s32.totalorder %v597_v0, %v6020_v11  ;;  %v2873_v62 = vand.u32 4294901760, %v2872_v48  ;;  %v2877_v41 = vsub.f32 %v9606_v30, %v12576_v14  ;;  %v1114_v32 = vsel %vm9671_vm10, 0.0625, %v12813_v12 }
 0x190   : > { %2694 = vmatpush.msrb.mxu1 %v2693_v23  ;;  %2741 = vmatpush.msrb.mxu2 %v9496_v56  ;;  %v13145_v35 = vand.u32 4294901760, %v9123_v5  ;;  %v1113_v46 = vsel %vm9690_vm13, 0.0625, %v12813_v12  ;;  %v594_v48 = vadd.s32 920, %v6005_v1  ;;  %v13146_v5 = vand.u32 4294901760, %v9634_v7  ;;  %vm9736_vm15 = vmand %vm726_vm1, %vm856_vm9 }
 0x191   : > { %5459 = vmatpush.msk.msrb.mxu3 %vm9401_vm4, %v12807_v16  ;;  %2744 = vmatmul.f32.vlgmr.msrb.gmra.mxu2 %v9411_v43  ;;  %v9729_v23 = vsub.f32 %v1115_v57, %v1115_v57  ;;  %v593_v57 = vadd.s32 912, %v6005_v1  ;;  %v13150_v0 = vand.u32 4294901760, %v9411_v43  ;;  %v2878_v8 = vand.u32 4294901760, %v2877_v41 }
 0x192   : > { %2779 = vmatpush.msra.mxu0 %v13145_v35  ;;  %5477 = vmatpush.msk.msra.mxu2 %vm9480_vm2, %v12807_v16  ;;  %v2882_v35 = vsub.f32 %v9634_v7, %v13146_v5  ;;  %v9745_v5 = vsub.f32 %v1114_v32, %v1114_v32  ;;  %v13151_v14 = vand.u32 4294901760, %v9655_v45  ;;  %v9758_v32 = vsub.f32 %v1113_v46, %v1113_v46 }
 0x193   : > { %2699 = vmatpush.msrb.mxu1 %v2698_v19  ;;  %5460 = vmatpush.msk.msrb.mxu3 %vm9428_vm6, %v12807_v16  ;;  %v13149_v19 = vand.u32 4294901760, %v9169_v63  ;;  %vm13152_vm9 = vcmp.lt.s32.totalorder %v596_v20, %v6020_v11  ;;  %vm13153_vm1 = vcmp.ge.s32.totalorder %v596_v20, %v6011_v4  ;;  %v1112_v43 = vsel %vm9736_vm15, 0.0625, %v12813_v12 }
 0x194   : > { %2767 = vmatmul.f32.vlgmr.msrb.gmra.mxu3 %v13150_v0  ;;  %5478 = vmatpush.msk.msra.mxu2 %vm9528_vm11, %v12807_v16  ;;  %v2887_v63 = vsub.f32 %v9655_v45, %v13151_v14  ;;  %vm9764_vm12 = vmand %vm13153_vm1, %vm13152_vm9  ;;  %v592_v14 = vadd.s32 904, %v6005_v1  ;;  %v13156_v46 = vand.u32 4294901760, %v9186_v26  ;;  %v2883_v20 = vand.u32 4294901760, %v2882_v35 }
 0x195   : > { %2782 = vmatpush.msra.mxu0 %v13149_v19  ;;  %2874 = vmatpush.msra.mxu3 %v2873_v62  ;;  %v13157_v41 = vand.u32 4294901760, %v9682_v22  ;;  %v13158_v62 = vand.u32 4294901760, %v9684_v58  ;;  %v2901_v52 = vand.u32 4294901760, %v9729_v23  ;;  %vm13159_vm9 = vcmp.lt.s32.totalorder %v595_v15, %v6020_v11  ;;  %v1520_v19 = vpop.f32.mrf.mxu0 }
 0x196   : > { %2704 = vmatpush.msrb.mxu1 %v2703_v17  ;;  %vm13160_vm1 = vcmp.ge.s32.totalorder %v595_v15, %v6011_v4  ;;  %vm13163_vm11 = vnez %v13064_v9  ;;  %5479 = vmatpush.msk.msra.mxu2 %vm9554_vm5, %v12807_v16  ;;  %v13164_v15 = vand.u32 4294901760, %v9204_v55  ;;  %v2888_v9 = vand.u32 4294901760, %v2887_v63 }
 0x197   : > { %2785 = vmatpush.msra.mxu0 %v13156_v46  ;;  %2706 = vmatmul.f32.vlgmr.msrb.gmra.mxu1 %v9363_v59  ;;  %v2892_v17 = vsub.f32 %v9682_v22, %v13157_v41  ;;  %v2897_v0 = vsub.f32 %v9684_v58, %v13158_v62  ;;  %vm9788_vm2 = vmand %vm13160_vm1, %vm13159_vm9  ;;  %v1111_v46 = vsel %vm9764_vm12, 0.0625, %v12813_v12  ;;  %vm852_vm9 = vcmp.lt.s32.totalorder %v593_v57, %v6020_v11 }
 0x198   : > { %5461 = vmatpush.msk.msra.mxu1 %vm13163_vm11, %v12807_v16  ;;  %2879 = vmatpush.msra.mxu3 %v2878_v8  ;;  %v9806_v41 = vsub.f32 %v1112_v43, %v1112_v43  ;;  %vm13165_vm11 = vcmp.lt.s32.totalorder %v594_v48, %v6020_v11  ;;  %vm13166_vm1 = vcmp.ge.s32.totalorder %v594_v48, %v6011_v4  ;;  %v591_v35 = vadd.s32 896, %v6005_v1 }
 0x199   : > { %2788 = vmatpush.msra.mxu0 %v13164_v15  ;;  %vm9812_vm5 = vmand %vm13166_vm1, %vm13165_vm11  ;;  %vm13169_vm6 = vnez %v13068_v60  ;;  %5480 = vmatpush.msk.msra.mxu2 %vm9577_vm14, %v12807_v16  ;;  %v12593_v55 = vand.u32 4294901760, %v9758_v32  ;;  %v1110_v8 = vsel %vm9788_vm2, 0.0625, %v12813_v12  ;;  %vm851_vm1 = vcmp.lt.s32.totalorder %v592_v14, %v6020_v11 }
 0x19a   : > { %5462 = vmatpush.msk.msra.mxu1 %vm13169_vm6, %v12807_v16  ;;  %2884 = vmatpush.msra.mxu3 %v2883_v20  ;;  %v13170_v48 = vand.u32 4294901760, %v9264_v33  ;;  %v2893_v60 = vand.u32 4294901760, %v2892_v17  ;;  %v2902_v63 = vsub.f32 %v9729_v23, %v2901_v52  ;;  %v9834_v43 = vsub.f32 %v1111_v46, %v1111_v46 }
 0x19b   : > { %vm13171_vm6 = vcmp.ge.s32.totalorder %v593_v57, %v6011_v4  ;;  %vm13174_vm11 = vnez %v13071_v61  ;;  %5481 = vmatpush.msk.msra.mxu2 %vm9591_vm0, %v12807_v16  ;;  %v2898_v33 = vand.u32 4294901760, %v2897_v0  ;;  %v13175_v20 = vand.u32 4294901760, %v9745_v5 }
 0x19c   : > { %2791 = vmatpush.msra.mxu0 %v13170_v48  ;;  %vm9840_vm14 = vmand %vm13171_vm6, %vm852_vm9  ;;  %5463 = vmatpush.msk.msra.mxu1 %vm13174_vm11, %v12807_v16  ;;  %v1109_v57 = vsel %vm9812_vm5, 0.0625, %v12813_v12  ;;  %v13176_v46 = vand.u32 4294901760, %v9273_v39  ;;  %v2916_v61 = vand.u32 4294901760, %v9806_v41  ;;  %v9859_v48 = vsub.f32 %v1110_v8, %v1110_v8 }
 0x19d   : > { %v2907_v17 = vsub.f32 %v9745_v5, %v13175_v20  ;;  %2889 = vmatpush.msra.mxu3 %v2888_v9  ;;  %vm13177_vm9 = vcmp.ge.s32.totalorder %v592_v14, %v6011_v4  ;;  %vm720_vm6 = vcmp.ge.s32.totalorder %v591_v35, %v6011_v4  ;;  %vm850_vm0 = vcmp.lt.s32.totalorder %v591_v35, %v6020_v11  ;;  %v1129_v9 = vld [vmem:[%s5999_s30 + $0x38] sm:$0xff] }
 0x19e   : > { %2794 = vmatpush.msra.mxu0 %v13176_v46  ;;  %vm9865_vm11 = vmand %vm13177_vm9, %vm851_vm1  ;;  %vm13180_vm4 = vnez %v13073_v54  ;;  %5482 = vmatpush.msk.msra.mxu2 %vm9613_vm8, %v12807_v16  ;;  %v2912_v39 = vsub.f32 %v9758_v32, %v12593_v55  ;;  %v1108_v14 = vsel %vm9840_vm14, 0.0625, %v12813_v12  ;;  %v13181_v11 = vand.u32 4294901760, %v9347_v10 }
 0x19f   : > { %5464 = vmatpush.msk.msra.mxu1 %vm13180_vm4, %v12807_v16  ;;  %2894 = vmatpush.msra.mxu3 %v2893_v60  ;;  %v2903_v8 = vand.u32 4294901760, %v2902_v63  ;;  %v2921_v54 = vand.u32 4294901760, %v9834_v43  ;;  %v9887_v20 = vsub.f32 %v1109_v57, %v1109_v57  ;;  %vm13182_vm4 = vnez %v13075_v38  ;;  %vm9900_vm1 = vmand %vm720_vm6, %vm850_vm0 }
 0x1a0   : > { %2797 = vmatpush.msra.mxu0 %v13181_v11  ;;  %5483 = vmatpush.msk.msra.mxu2 %vm9661_vm3, %v12807_v16  ;;  %v1107_v60 = vsel %vm9865_vm11, 0.0625, %v12813_v12  ;;  %v9904_v63 = vand.u32 4294901760, %v1129_v9  ;;  %v13185_v38 = vand.u32 4294901760, %v9349_v36  ;;  %v2908_v57 = vand.u32 4294901760, %v2907_v17 }
 0x1a1   : > { %5465 = vmatpush.msk.msra.mxu1 %vm13182_vm4, %v12807_v16  ;;  %2899 = vmatpush.msra.mxu3 %v2898_v33  ;;  %v2917_v46 = vsub.f32 %v9806_v41, %v2916_v61  ;;  %v2926_v11 = vand.u32 4294901760, %v9859_v48  ;;  %v9912_v55 = vsub.f32 %v1108_v14, %v1108_v14  ;;  %vm13186_vm0 = vnez %v13078_v47 }
 0x1a2   : > { %2800 = vmatpush.msra.mxu0 %v13185_v38  ;;  %5484 = vmatpush.msk.msra.mxu2 %vm9671_vm10, %v12807_v16  ;;  %v2913_v4 = vand.u32 4294901760, %v2912_v39  ;;  %v13187_v36 = vand.u32 4294901760, %v9371_v50  ;;  %v2922_v35 = vsub.f32 %v9834_v43, %v2921_v54  ;;  %v2931_v33 = vand.u32 4294901760, %v9887_v20 }
 0x1a3   : > { %5466 = vmatpush.msk.msra.mxu1 %vm13186_vm0, %v12807_v16  ;;  %2904 = vmatpush.msra.mxu3 %v2903_v8  ;;  %v9926_v17 = vsub.f32 %v1107_v60, %v1107_v60  ;;  %v1106_v47 = vsel %vm9900_vm1, 0.0625, %v12813_v12  ;;  %vm13188_vm9 = vnez %v13080_v18  ;;  %v9938_v50 = vsub.f32 %v1129_v9, %v9904_v63 }
 0x1a4   : > { %2803 = vmatpush.msra.mxu0 %v13187_v36  ;;  %5485 = vmatpush.msk.msra.mxu2 %vm9690_vm13, %v12807_v16  ;;  %v13189_v39 = vand.u32 4294901760, %v9419_v40  ;;  %v2918_v14 = vand.u32 4294901760, %v2917_v46  ;;  %v2927_v8 = vsub.f32 %v9859_v48, %v2926_v11  ;;  %v2936_v60 = vand.u32 4294901760, %v9912_v55 }
 0x1a5   : > { %5467 = vmatpush.msk.msra.mxu1 %vm13188_vm9, %v12807_v16  ;;  %2909 = vmatpush.msra.mxu3 %v2908_v57  ;;  %vm13190_vm6 = vnez %v13082_v29  ;;  %v9952_v18 = vsub.f32 %v1106_v47, %v1106_v47  ;;  %v13191_v40 = vand.u32 4294901760, %v9422_v53  ;;  %v2923_v9 = vand.u32 4294901760, %v2922_v35 }
 0x1a6   : > { %2806 = vmatpush.msra.mxu0 %v13189_v39  ;;  %5486 = vmatpush.msk.msra.mxu2 %vm9736_vm15, %v12807_v16  ;;  %v2932_v38 = vsub.f32 %v9887_v20, %v2931_v33  ;;  %v2941_v57 = vand.u32 4294901760, %v9926_v17  ;;  %vm13192_vm4 = vnez %v13084_v3  ;;  %v2863_v29 = vand.u32 4294901760, %v9938_v50  ;;  %v13197_v39 = vld [vmem:[#allocation19_spill] sm:$0xff] }
 0x1a7   : > { %5468 = vmatpush.msk.msra.mxu1 %vm13190_vm6, %v12807_v16  ;;  %2914 = vmatpush.msra.mxu3 %v2913_v4  ;;  %v13193_v53 = vand.u32 4294901760, %v9432_v2  ;;  %v2928_v46 = vand.u32 4294901760, %v2927_v8  ;;  %v2937_v4 = vsub.f32 %v9912_v55, %v2936_v60  ;;  %v2946_v3 = vand.u32 4294901760, %v9952_v18 }
 0x1a8   : > { %2809 = vmatpush.msra.mxu0 %v13191_v40  ;;  %5487 = vmatpush.msk.msra.mxu2 %vm9764_vm12, %v12807_v16  ;;  %v13194_v36 = vand.u32 4294901760, %v9474_v34  ;;  %v2933_v2 = vand.u32 4294901760, %v2932_v38  ;;  %v2942_v35 = vsub.f32 %v9926_v17, %v2941_v57  ;;  %vm13195_vm0 = vnez %v13090_v49  ;;  %v13201_v40 = vld [vmem:[#allocation17_spill] sm:$0xff] }
 0x1a9   : > { %5469 = vmatpush.msk.msra.mxu1 %vm13192_vm4, %v12807_v16  ;;  %2919 = vmatpush.msra.mxu3 %v2918_v14  ;;  %v2864_v42 = vsub.f32 %v9938_v50, %v2863_v29  ;;  %v13196_v34 = vand.u32 4294901760, %v9496_v56  ;;  %v2938_v47 = vand.u32 4294901760, %v2937_v4  ;;  %v2947_v49 = vsub.f32 %v9952_v18, %v2946_v3  ;;  %v13199_v56 = vld [vmem:[#allocation16_spill] sm:$0xff] }
 0x1aa   : > { %2812 = vmatpush.msra.mxu0 %v13193_v53  ;;  %5488 = vmatpush.msk.msra.mxu2 %vm9788_vm2, %v12807_v16  ;;  %v2943_v14 = vand.u32 4294901760, %v2942_v35  ;;  %vm13200_vm9 = vnez %v13199_v56  ;;  %vm13202_vm6 = vnez %v13201_v40  ;;  %v13203_v38 = vand.u32 4294901760, %v9547_v21  ;;  %v13204_v53 = vld [vmem:[#allocation18_spill] sm:$0xff] }
 0x1ab   : > { %5470 = vmatpush.msk.msra.mxu1 %vm13112_vm7, %v12807_v16  ;;  %2924 = vmatpush.msra.mxu3 %v2923_v9  ;;  %vm13198_vm7 = vnez %v13197_v39  ;;  %v2865_v8 = vand.u32 4294901760, %v2864_v42  ;;  %v2948_v9 = vand.u32 4294901760, %v2947_v49  ;;  %vm13205_vm4 = vnez %v13204_v53  ;;  %v3096_v53 = vld [vmem:[%s12364_s1 + $0x30] sm:$0xff] }
 0x1ac   : > { %2815 = vmatpush.msra.mxu0 %v13194_v36  ;;  %5489 = vmatpush.msk.msra.mxu2 %vm9812_vm5, %v12807_v16 }
 0x1ad   : > { %5471 = vmatpush.msk.msra.mxu1 %vm13195_vm0, %v12807_v16  ;;  %2929 = vmatpush.msra.mxu3 %v2928_v46  ;;  %v13206_v46 = vand.u32 4294901760, %v9606_v30  ;;  %vm13207_vm0 = vnez %v13114_v51 }
 0x1ae   : > { %2818 = vmatpush.msra.mxu0 %v13196_v34  ;;  %5490 = vmatpush.msk.msra.mxu2 %vm9840_vm14, %v12807_v16 }
 0x1af   : > { %2820 = vmatmul.f32.vlgmr.msra.gmra.mxu0 %v9363_v59  ;;  %5472 = vmatpush.msk.msra.mxu1 %vm13198_vm7, %v12807_v16  ;;  %vm13208_vm7 = vnez %v13111_v28  ;;  %v13212_v28 = vand.u32 4294901760, %v9655_v45 }
 0x1b0   : > { %2934 = vmatpush.msra.mxu3 %v2933_v2  ;;  %2956 = vmatpush.msrb.mxu0 %v9547_v21  ;;  %v13209_v21 = vand.u32 4294901760, %v9634_v7 }
 0x1b1   : > { %5473 = vmatpush.msk.msra.mxu1 %vm13200_vm9, %v12807_v16  ;;  %5491 = vmatpush.msk.msra.mxu2 %vm9865_vm11, %v12807_v16 }
 0x1b2   : > { %2939 = vmatpush.msra.mxu3 %v2938_v47  ;;  %2958 = vmatpush.msrb.mxu0 %v9606_v30  ;;  %v13210_v30 = vld [vmem:[#allocation20_spill] sm:$0xff] }
 0x1b3   : > { %5474 = vmatpush.msk.msra.mxu1 %vm13202_vm6, %v12807_v16  ;;  %5492 = vmatpush.msk.msra.mxu2 %vm9900_vm1, %v12807_v16  ;;  %vm13211_vm9 = vnez %v13210_v30  ;;  %vm13213_vm6 = vnez %v13121_v27  ;;  %v13218_v27 = vand.u32 4294901760, %v9745_v5 }
 0x1b4   : > { %2944 = vmatpush.msra.mxu3 %v2943_v14  ;;  %2960 = vmatpush.msrb.mxu0 %v9634_v7 }
 0x1b5   : > { %2866 = vmatmul.f32.vlgmr.msra.gmra.mxu2 %v2865_v8  ;;  %5475 = vmatpush.msk.msra.mxu1 %vm13205_vm4, %v12807_v16  ;;  %vm13215_vm4 = vnez %v13125_v44  ;;  %v1238_v44 = vadd.f32 %v1237_v31, %v1152_v25 }
 0x1b6   : > { %3018 = vmatpush.msrb.mxu2 %v13203_v38  ;;  %2949 = vmatpush.msra.mxu3 %v2948_v9  ;;  %v3097_v38 = vld [vmem:[%s12364_s1 + $0x38] sm:$0xff] }
 0x1b7   : > { %2962 = vmatpush.msrb.mxu0 %v9655_v45  ;;  %2951 = vmatmul.f32.vlgmr.msra.gmra.mxu3 %v9904_v63  ;;  %v13216_v45 = vand.u32 4294901760, %v9684_v58  ;;  %v1276_v51 = vadd.f32 %v1275_v6, %v1238_v44 }
 0x1b8   : > { %3021 = vmatpush.msrb.mxu2 %v13206_v46  ;;  %5509 = vmatpush.msk.msrb.mxu3 %vm13207_vm0, %v12807_v16  ;;  %v10180_v46 = vand.u32 4294901760, %v3097_v38 }
 0x1b9   : > { %5476 = vmatpush.msk.msra.mxu1 %vm13208_vm7, %v12807_v16  ;;  %2964 = vmatpush.msrb.mxu0 %v9682_v22 }
 0x1ba   : > { %2841 = vmatmul.f32.vlgmr.msra.gmra.mxu1 %v9363_v59  ;;  %3024 = vmatpush.msrb.mxu2 %v13209_v21  ;;  %v13214_v59 = vand.u32 4294901760, %v9682_v22  ;;  %v10182_v21 = vand.u32 4294901760, %v3096_v53 }
 0x1bb   : > { %5493 = vmatpush.msk.msrb.mxu1 %vm13207_vm0, %v12807_v16  ;;  %5510 = vmatpush.msk.msrb.mxu3 %vm13211_vm9, %v12807_v16  ;;  %vm13217_vm0 = vnez %v13128_v24  ;;  %v1298_v24 = vpop.f32.mrf.mxu3 }
 0x1bc   : > { %2966 = vmatpush.msrb.mxu0 %v9684_v58  ;;  %3027 = vmatpush.msrb.mxu2 %v13212_v28  ;;  %v1299_v7 = vadd.f32 %v1298_v24, %v1276_v51  ;;  %v1372_v58 = vpop.f32.mrf.mxu1  ;;  %v10185_v28 = vsub.f32 %v3097_v38, %v10180_v46 }
 0x1bd   : > { %5494 = vmatpush.msk.msrb.mxu1 %vm13211_vm9, %v12807_v16  ;;  %5511 = vmatpush.msk.msrb.mxu3 %vm13213_vm6, %v12807_v16 }
 0x1be   : > { %2968 = vmatpush.msrb.mxu0 %v9729_v23  ;;  %3030 = vmatpush.msrb.mxu2 %v13214_v59  ;;  %v1352_v22 = vadd.f32 %v1351_v13, %v1299_v7  ;;  %v1397_v23 = vpop.f32.mrf.mxu2  ;;  %v10188_v59 = vsub.f32 %v3096_v53, %v10182_v21 }
 0x1bf   : > { %5495 = vmatpush.msk.msrb.mxu1 %vm13213_vm6, %v12807_v16  ;;  %5512 = vmatpush.msk.msrb.mxu3 %vm13215_vm4, %v12807_v16 }
 0x1c0   : > { %2970 = vmatpush.msrb.mxu0 %v9745_v5  ;;  %3033 = vmatpush.msrb.mxu2 %v13216_v45  ;;  %v1373_v37 = vadd.f32 %v1372_v58, %v1352_v22  ;;  %v3095_v22 = vld [vmem:[%s12364_s1 + $0x28] sm:$0xff] }
 0x1c1   : > { %5496 = vmatpush.msk.msrb.mxu1 %vm13215_vm4, %v12807_v16  ;;  %5513 = vmatpush.msk.msrb.mxu3 %vm13217_vm0, %v12807_v16  ;;  %v10207_v58 = vand.u32 4294901760, %v3095_v22 }
 0x1c2   : > { %2972 = vmatpush.msrb.mxu0 %v9758_v32  ;;  %3036 = vmatpush.msrb.mxu2 %v2901_v52  ;;  %v13219_v52 = vand.u32 4294901760, %v9758_v32  ;;  %v1398_v5 = vadd.f32 %v1397_v23, %v1373_v37  ;;  %v3094_v23 = vld [vmem:[%s12364_s1 + $0x20] sm:$0xff] }
 0x1c3   : > { %5497 = vmatpush.msk.msrb.mxu1 %vm13217_vm0, %v12807_v16  ;;  %5514 = vmatpush.msk.msrb.mxu3 %vm9613_vm8, %v12807_v16  ;;  %v1482_v32 = vpop.f32.mrf.mxu3 }
 0x1c4   : > { %2974 = vmatpush.msrb.mxu0 %v9806_v41  ;;  %3039 = vmatpush.msrb.mxu2 %v13218_v27  ;;  %v1483_v26 = vadd.f32 %v1482_v32, %v1398_v5  ;;  %v1543_v41 = vpop.f32.mrf.mxu1  ;;  %v3145_v27 = vand.u32 4294901760, %v10185_v28  ;;  %v10213_v32 = vsub.f32 %v3095_v22, %v10207_v58 }
 0x1c5   : > { %5498 = vmatpush.msk.msrb.mxu1 %vm9613_vm8, %v12807_v16  ;;  %5515 = vmatpush.msk.msrb.mxu3 %vm9661_vm3, %v12807_v16 }
 0x1c6   : > { %2976 = vmatpush.msrb.mxu0 %v9834_v43  ;;  %3042 = vmatpush.msrb.mxu2 %v13219_v52  ;;  %v1521_v62 = vadd.f32 %v1520_v19, %v1483_v26  ;;  %v1596_v43 = vpop.f32.mrf.mxu2  ;;  %v3151_v52 = vand.u32 4294901760, %v10188_v59  ;;  %v3146_v44 = vsub.f32 %v10185_v28, %v3145_v27  ;;  %v10215_v19 = vand.u32 4294901760, %v3094_v23  ;;  %v3093_v26 = vld [vmem:[%s12364_s1 + $0x18] sm:$0xff] }
 0x1c7   : > { %5499 = vmatpush.msk.msrb.mxu1 %vm9661_vm3, %v12807_v16  ;;  %5516 = vmatpush.msk.msrb.mxu3 %vm9671_vm10, %v12807_v16 }
 0x1c8   : > { %2978 = vmatpush.msrb.mxu0 %v9859_v48  ;;  %3045 = vmatpush.msrb.mxu2 %v2916_v61  ;;  %v1642_v48 = vpop.f32.mrf.mxu0  ;;  %v3152_v6 = vsub.f32 %v10188_v59, %v3151_v52  ;;  %v3147_v7 = vand.u32 4294901760, %v3146_v44 }
 0x1c9   : > { %5500 = vmatpush.msk.msrb.mxu1 %vm9671_vm10, %v12807_v16  ;;  %5517 = vmatpush.msk.msrb.mxu3 %vm9690_vm13, %v12807_v16  ;;  %vm3345_vm10 = vcmask 1043456  }
 0x1ca   : > { %2980 = vmatpush.msrb.mxu0 %v9887_v20  ;;  %3048 = vmatpush.msrb.mxu2 %v2921_v54  ;;  %v3153_v13 = vand.u32 4294901760, %v3152_v6 }
 0x1cb   : > { %5501 = vmatpush.msk.msrb.mxu1 %vm9690_vm13, %v12807_v16  ;;  %5518 = vmatpush.msk.msrb.mxu3 %vm9736_vm15, %v12807_v16  ;;  %v1617_v61 = vpop.f32.mrf.mxu3 }
 0x1cc   : > { %2982 = vmatpush.msrb.mxu0 %v9912_v55  ;;  %3051 = vmatpush.msrb.mxu2 %v2926_v11  ;;  %v1544_v55 = vadd.f32 %v1543_v41, %v1521_v62  ;;  %v3157_v41 = vand.u32 4294901760, %v10213_v32  ;;  %v10224_v62 = vsub.f32 %v3094_v23, %v10215_v19 }
 0x1cd   : > { %5502 = vmatpush.msk.msrb.mxu1 %vm9736_vm15, %v12807_v16  ;;  %5519 = vmatpush.msk.msrb.mxu3 %vm9764_vm12, %v12807_v16 }
 0x1ce   : > { %2984 = vmatpush.msrb.mxu0 %v9926_v17  ;;  %3054 = vmatpush.msrb.mxu2 %v2931_v33  ;;  %v1597_v15 = vadd.f32 %v1596_v43, %v1544_v55  ;;  %v1765_v10 = vpop.f32.mrf.mxu2  ;;  %v10226_v55 = vand.u32 4294901760, %v3093_v26 }
 0x1cf   : > { %5503 = vmatpush.msk.msrb.mxu1 %vm9764_vm12, %v12807_v16  ;;  %5520 = vmatpush.msk.msrb.mxu3 %vm9788_vm2, %v12807_v16 }
 0x1d0   : > { %2986 = vmatpush.msrb.mxu0 %v9952_v18  ;;  %3057 = vmatpush.msrb.mxu2 %v2936_v60  ;;  %v1618_v0 = vadd.f32 %v1617_v61, %v1597_v15  ;;  %v1841_v33 = vpop.f32.mrf.mxu0  ;;  %v3092_v15 = vld [vmem:[%s12364_s1 + $0x10] sm:$0xff] }
 0x1d1   : > { %2989 = vmatmul.f32.vlgmr.msrb.gmra.mxu0 %v9938_v50  ;;  %5504 = vmatpush.msk.msrb.mxu1 %vm9788_vm2, %v12807_v16  ;;  %vm3341_vm2 = vcmask 31744  }
 0x1d2   : > { %5521 = vmatpush.msk.msrb.mxu3 %vm9812_vm5, %v12807_v16  ;;  %3060 = vmatpush.msrb.mxu2 %v2941_v57  ;;  %v1643_v54 = vadd.f32 %v1642_v48, %v1618_v0  ;;  %v3158_v48 = vsub.f32 %v10213_v32, %v3157_v41  ;;  %v3163_v0 = vand.u32 4294901760, %v10224_v62 }
 0x1d3   : > { %5505 = vmatpush.msk.msrb.mxu1 %vm9812_vm5, %v12807_v16  ;;  %v1788_v11 = vpop.f32.mrf.mxu3  ;;  %3111 = vmatpush.msra.mxu0 %v10180_v46  ;;  %vm12595_vm5 = vcmask 523264  }
 0x1d4   : > { %5522 = vmatpush.msk.msrb.mxu3 %vm9840_vm14, %v12807_v16  ;;  %3063 = vmatpush.msrb.mxu2 %v2946_v3 }
 0x1d5   : > { %5506 = vmatpush.msk.msrb.mxu1 %vm9840_vm14, %v12807_v16  ;;  %3065 = vmatmul.f32.vlgmr.msrb.gmra.mxu2 %v9904_v63 }
 0x1d6   : > { %5523 = vmatpush.msk.msrb.mxu3 %vm9865_vm11, %v12807_v16  ;;  %v1887_v57 = vpop.f32.mrf.mxu2  ;;  %3206 = vmatpush.msra.mxu2 %v10185_v28 }
 0x1d7   : > { %5507 = vmatpush.msk.msrb.mxu1 %vm9865_vm11, %v12807_v16  ;;  %3113 = vmatpush.msra.mxu0 %v10182_v21 }
 0x1d8   : > { %5524 = vmatpush.msk.msrb.mxu3 %vm9900_vm1, %v12807_v16  ;;  %v2010_v3 = vpop.f32.mrf.mxu0  ;;  %3209 = vmatpush.msra.mxu2 %v10188_v59 }
 0x1d9   : > { %3086 = vmatmul.f32.vlgmr.msrb.gmra.mxu3 %v9904_v63  ;;  %5508 = vmatpush.msk.msrb.mxu1 %vm9900_vm1, %v12807_v16  ;;  %v1727_v16 = vpop.f32.mrf.mxu1 }
 0x1da   : > { %3012 = vmatmul.f32.vlgmr.msrb.gmra.mxu1 %v2863_v29  ;;  %v1728_v20 = vadd.f32 %v1727_v16, %v1643_v54  ;;  %3243 = vmatpush.msra.mxu3 %v10180_v46  ;;  %v3168_v16 = vsub.f32 %v3093_v26, %v10226_v55  ;;  %v10237_v54 = vand.u32 4294901760, %v3092_v15 }
 0x1db   : > { %v1972_v4 = vpop.f32.mrf.mxu3  ;;  %3148 = vmatpush.msra.mxu1 %v3147_v7  ;;  %3115 = vmatpush.msra.mxu0 %v10207_v58 }
 0x1dc   : > { %v1766_v63 = vadd.f32 %v1765_v10, %v1728_v20  ;;  %3245 = vmatpush.msra.mxu3 %v10182_v21  ;;  %3212 = vmatpush.msra.mxu2 %v10213_v32  ;;  %v3091_v20 = vld [vmem:[%s12364_s1 + $0x8] sm:$0xff]  ;;  %v3159_v10 = vand.u32 4294901760, %v3158_v48 }
 0x1dd   : > { %3154 = vmatpush.msra.mxu1 %v3153_v13  ;;  %3117 = vmatpush.msra.mxu0 %v10215_v19 }
 0x1de   : > { %v1789_v17 = vadd.f32 %v1788_v11, %v1766_v63  ;;  %v2086_v34 = vpop.f32.mrf.mxu2  ;;  %3247 = vmatpush.msra.mxu3 %v10207_v58  ;;  %3215 = vmatpush.msra.mxu2 %v10224_v62  ;;  %v3164_v63 = vsub.f32 %v10224_v62, %v3163_v0  ;;  %v3169_v11 = vand.u32 4294901760, %v3168_v16 }
 0x1df   : > { %3119 = vmatpush.msra.mxu0 %v10226_v55  ;;  %3160 = vmatpush.msra.mxu1 %v3159_v10 }
 0x1e0   : > { %v1842_v60 = vadd.f32 %v1841_v33, %v1789_v17  ;;  %v2132_v49 = vpop.f32.mrf.mxu0  ;;  %3249 = vmatpush.msra.mxu3 %v10215_v19  ;;  %v3174_v33 = vsub.f32 %v3092_v15, %v10237_v54  ;;  %3218 = vmatpush.msra.mxu2 %v3168_v16 }
 0x1e1   : > { %v1862_v50 = vpop.f32.mrf.mxu1  ;;  %3121 = vmatpush.msra.mxu0 %v10237_v54 }
 0x1e2   : > { %v1863_v18 = vadd.f32 %v1862_v50, %v1842_v60  ;;  %3251 = vmatpush.msra.mxu3 %v10226_v55  ;;  %v3122_v60 = vand.u32 4294901760, %v3091_v20  ;;  %3221 = vmatpush.msra.mxu2 %v3174_v33 }
 0x1e3   : > { %v2107_v39 = vpop.f32.mrf.mxu3 }
 0x1e4   : > { %v1888_v29 = vadd.f32 %v1887_v57, %v1863_v18  ;;  %v3090_v18 = vld [vmem:[%s12364_s1] sm:$0xff]  ;;  %3253 = vmatpush.msra.mxu3 %v10237_v54  ;;  %v3165_v57 = vand.u32 4294901760, %v3164_v63  ;;  %3123 = vmatpush.msra.mxu0 %v3122_v60 }
 0x1e6   : > { %v1973_v36 = vadd.f32 %v1972_v4, %v1888_v29  ;;  %v2255_v9 = vpop.f32.mrf.mxu2  ;;  %v3170_v29 = vsub.f32 %v3168_v16, %v3169_v11  ;;  %v3175_v4 = vand.u32 4294901760, %v3174_v33  ;;  %3255 = vmatpush.msra.mxu3 %v3122_v60  ;;  %3166 = vmatpush.msra.mxu1 %v3165_v57 }
 0x1e8   : > { %v2011_v35 = vadd.f32 %v2010_v3, %v1973_v36  ;;  %v2331_v31 = vpop.f32.mrf.mxu0  ;;  %v3124_v3 = vand.u32 4294901760, %v3090_v18 }
 0x1e9   : > { %v2033_v2 = vpop.f32.mrf.mxu1 }
 0x1ea   : > { %v2034_v42 = vadd.f32 %v2033_v2, %v2011_v35  ;;  %v3180_v2 = vsub.f32 %v3091_v20, %v3122_v60  ;;  %3125 = vmatpush.msra.mxu0 %v3124_v3  ;;  %3257 = vmatpush.msra.mxu3 %v3124_v3 }
 0x1eb   : > { %v2278_v45 = vpop.f32.mrf.mxu3 }
 0x1ec   : > { %v2087_v47 = vadd.f32 %v2086_v34, %v2034_v42  ;;  %v3171_v42 = vand.u32 4294901760, %v3170_v29  ;;  %v3176_v34 = vsub.f32 %v3174_v33, %v3175_v4  ;;  %3224 = vmatpush.msra.mxu2 %v3180_v2  ;;  %3276 = vmatpush.msrb.mxu0 %v3145_v27 }
 0x1ee   : > { %v2108_v14 = vadd.f32 %v2107_v39, %v2087_v47  ;;  %v2377_v5 = vpop.f32.mrf.mxu2  ;;  %v3186_v47 = vsub.f32 %v3090_v18, %v3124_v3  ;;  %v3181_v39 = vand.u32 4294901760, %v3180_v2  ;;  %3172 = vmatpush.msra.mxu1 %v3171_v42  ;;  %3280 = vmatpush.msrb.mxu0 %v3151_v52 }
 0x1f0   : > { %v2133_v8 = vadd.f32 %v2132_v49, %v2108_v14  ;;  %v2500_v50 = vpop.f32.mrf.mxu0  ;;  %v3177_v14 = vand.u32 4294901760, %v3176_v34  ;;  %3227 = vmatpush.msra.mxu2 %v3186_v47  ;;  %3284 = vmatpush.msrb.mxu0 %v3157_v41 }
 0x1f1   : > { %v2217_v56 = vpop.f32.mrf.mxu1 }
 0x1f2   : > { %v2218_v40 = vadd.f32 %v2217_v56, %v2133_v8  ;;  %v3187_v56 = vand.u32 4294901760, %v3186_v47  ;;  %3178 = vmatpush.msra.mxu1 %v3177_v14  ;;  %3288 = vmatpush.msrb.mxu0 %v3163_v0 }
 0x1f3   : > { %v2462_v61 = vpop.f32.mrf.mxu3 }
 0x1f4   : > { %v2256_v30 = vadd.f32 %v2255_v9, %v2218_v40  ;;  %v3182_v40 = vsub.f32 %v3180_v2, %v3181_v39  ;;  %v3188_v9 = vsub.f32 %v3186_v47, %v3187_v56  ;;  %3292 = vmatpush.msrb.mxu0 %v3169_v11 }
 0x1f6   : > { %v2279_v25 = vadd.f32 %v2278_v45, %v2256_v30  ;;  %v2576_v8 = vpop.f32.mrf.mxu2  ;;  %v3183_v38 = vand.u32 4294901760, %v3182_v40  ;;  %v3189_v30 = vand.u32 4294901760, %v3188_v9  ;;  %3296 = vmatpush.msrb.mxu0 %v3175_v4  ;;  %v13220_v40 = vld [vmem:[#allocation9_spill] sm:$0xff] }
 0x1f7   : > { %v286_v9 = vadd.s32 1, %v13220_v40 }
 0x1f8   : > { %v2332_v24 = vadd.f32 %v2331_v31, %v2279_v25  ;;  %3184 = vmatpush.msra.mxu1 %v3183_v38  ;;  %3300 = vmatpush.msrb.mxu0 %v3181_v39  ;;  %v13221_v38 = vld [vmem:[#allocation10_spill] sm:$0xff] }
 0x1f9   : > { %v2352_v51 = vpop.f32.mrf.mxu1 }
 0x1fa   : > { %v2353_v37 = vadd.f32 %v2352_v51, %v2332_v24  ;;  %3190 = vmatpush.msra.mxu1 %v3189_v30  ;;  %3304 = vmatpush.msrb.mxu0 %v3187_v56  ;;  %v10269_v30 = vmul.u32 16, %v13220_v40 }
 0x1fb   : > { %v2597_v45 = vpop.f32.mrf.mxu3 }
 0x1fc   : > { %v2378_v43 = vadd.f32 %v2377_v5, %v2353_v37  ;;  %3319 = vmatpush.msrb.mxu1 %v10180_v46 }
 0x1fe   : > { %v2463_v17 = vadd.f32 %v2462_v61, %v2378_v43  ;;  %3321 = vmatpush.msrb.mxu1 %v10182_v21 }
 0x200   : > { %v2501_v35 = vadd.f32 %v2500_v50, %v2463_v17  ;;  %3323 = vmatpush.msrb.mxu1 %v10207_v58 }
 0x201   : > { %v2523_v36 = vpop.f32.mrf.mxu1 }
 0x202   : > { %v2524_v49 = vadd.f32 %v2523_v36, %v2501_v35  ;;  %3325 = vmatpush.msrb.mxu1 %v10215_v19 }
 0x204   : > { %v2577_v53 = vadd.f32 %v2576_v8, %v2524_v49  ;;  %3327 = vmatpush.msrb.mxu1 %v10226_v55 }
 0x206   : > { %v2598_v28 = vadd.f32 %v2597_v45, %v2577_v53  ;;  %3329 = vmatpush.msrb.mxu1 %v10237_v54  ;;  %v3340_v54 = vld [vmem:[%s12365_s2] sm:$0xf]  ;;  %v285_v53 = vadd.s32 1, %v13221_v38  ;;  %v10271_v45 = vmul.u32 16, %v286_v9  ;;  %v5886_v9 = vmov 1.0  }
 0x207   : > { %v3347_v20 = vsel %vm3345_vm10, %v3340_v54, 0 }
 0x208   : > { %3331 = vmatpush.msrb.mxu1 %v3122_v60  ;;  %v3364_v10 = vand.u32 4294901760, %v3347_v20 }
 0x209   : > { %v2622_v31 = vpop.f32.mrf.mxu0 }
 0x20a   : > { %v2623_v25 = vadd.f32 %v2622_v31, %v2598_v28  ;;  %3333 = vmatpush.msrb.mxu1 %v3124_v3  ;;  %v3391_v63 = vsub.f32 %v3347_v20, %v3364_v10  ;;  %3365 = vmatpush.msrb.mxu2 %v3364_v10  ;;  %v13222_v31 = vld [vmem:[#allocation11_spill] sm:$0xff] }
 0x20b   : > { %v284_v28 = vadd.s32 1, %v13222_v31 }
 0x20c   : > { %v3392_v11 = vand.u32 4294901760, %v3391_v63 }
 0x20e   : > { %v3393_v33 = vsub.f32 %v3391_v63, %v3392_v11 }
 0x210   : > { %v3394_v17 = vand.u32 4294901760, %v3393_v33 }
 0x212   : > { %3395 = vmatpush.msrb.mxu3 %v3394_v17 }
 0x214   : > { %v2707_v27 = vpop.f32.mrf.mxu1  ;;  %v2745_v52 = vpop.f32.mrf.mxu2 }
 0x215   : > { %v2708_v59 = vadd.f32 %v2707_v27, %v2623_v25  ;;  %v13223_v27 = vld [vmem:[#allocation12_spill] sm:$0xff] }
 0x216   : > { %v283_v25 = vadd.s32 1, %v13223_v27 }
 0x217   : > { %v2746_v44 = vadd.f32 %v2745_v52, %v2708_v59  ;;  %v2768_v6 = vpop.f32.mrf.mxu3  ;;  %v10276_v59 = vmul.u32 16, %v13221_v38  ;;  %v10278_v52 = vmul.u32 16, %v285_v53 }
 0x219   : > { %v2769_v51 = vadd.f32 %v2768_v6, %v2746_v44  ;;  %v13224_v44 = vld [vmem:[#allocation13_spill] sm:$0xff] }
 0x21a   : > { %v282_v6 = vadd.s32 1, %v13224_v44 }
 0x22c   : > { %v2821_v46 = vpop.f32.mrf.mxu0 }
 0x22d   : > { %v2822_v21 = vadd.f32 %v2821_v46, %v2769_v51  ;;  %v10282_v46 = vmul.u32 16, %v13222_v31  ;;  %v10284_v51 = vmul.u32 16, %v284_v28 }
 0x237   : > { %v2842_v24 = vpop.f32.mrf.mxu1 }
 0x238   : > { %v2843_v7 = vadd.f32 %v2842_v24, %v2822_v21  ;;  %v2867_v13 = vpop.f32.mrf.mxu2  ;;  %v13225_v24 = vld [vmem:[#allocation8_spill] sm:$0xff]  ;;  %v10291_v21 = vmul.u32 16, %v13223_v27 }
 0x239   : > { %vm271_vm14 = vcmp.ge.s32.totalorder %v13225_v24, %v10269_v30  ;;  %vm351_vm8 = vcmp.lt.s32.totalorder %v13225_v24, %v10271_v45  ;;  %vm263_vm13 = vcmp.ge.s32.totalorder %v13225_v24, %v10276_v59  ;;  %vm343_vm15 = vcmp.lt.s32.totalorder %v13225_v24, %v10278_v52 }
 0x23a   : > { %v2868_v22 = vadd.f32 %v2867_v13, %v2843_v7  ;;  %v2952_v58 = vpop.f32.mrf.mxu3  ;;  %v10293_v7 = vmul.u32 16, %v283_v25  ;;  %vm10295_vm3 = vmand %vm271_vm14, %vm351_vm8  ;;  %vm255_vm11 = vcmp.ge.s32.totalorder %v13225_v24, %v10282_v46  ;;  %vm335_vm1 = vcmp.lt.s32.totalorder %v13225_v24, %v10284_v51 }
 0x23b   : > { %vm10314_vm12 = vmand %vm263_vm13, %vm343_vm15  ;;  %vm247_vm9 = vcmp.ge.s32.totalorder %v13225_v24, %v10291_v21 }
 0x23c   : > { %v2953_v23 = vadd.f32 %v2952_v58, %v2868_v22  ;;  %v13228_v22 = vld [vmem:[#allocation14_spill] sm:$0xff]  ;;  %vm10333_vm7 = vmand %vm255_vm11, %vm335_vm1  ;;  %vm327_vm6 = vcmp.lt.s32.totalorder %v13225_v24, %v10293_v7 }
 0x23d   : > { %v281_v58 = vadd.s32 1, %v13228_v22  ;;  %vm10356_vm4 = vmand %vm247_vm9, %vm327_vm6 }
 0x23e   : > { %v455_v33 = vsel %vm10356_vm4, 1.0, %v12813_v12 }
 0x24e   : > { %v2990_v37 = vpop.f32.mrf.mxu0 }
 0x24f   : > { %v2991_v5 = vadd.f32 %v2990_v37, %v2953_v23  ;;  %v479_v37 = vsel %vm10295_vm3, 1.0, %v12813_v12  ;;  %v10308_v23 = vmul.u32 16, %v13224_v44 }
 0x251   : > { %vm239_vm0 = vcmp.ge.s32.totalorder %v13225_v24, %v10308_v23 }
 0x257   : > { %v3013_v32 = vpop.f32.mrf.mxu1 }
 0x258   : > { %v3014_v19 = vadd.f32 %v3013_v32, %v2991_v5  ;;  %v3066_v26 = vpop.f32.mrf.mxu2  ;;  %v10310_v5 = vmul.u32 16, %v282_v6  ;;  %v10312_v32 = vsub.f32 %v479_v37, %v479_v37 }
 0x25a   : > { %v3067_v41 = vadd.f32 %v3066_v26, %v3014_v19  ;;  %v13231_v26 = vld [vmem:[#allocation15_spill] sm:$0xff]  ;;  %vm319_vm10 = vcmp.lt.s32.totalorder %v13225_v24, %v10310_v5 }
 0x25c   : > { %v3087_v62 = vpop.f32.mrf.mxu3 }
 0x25d   : > { %v3088_v55 = vadd.f32 %v3087_v62, %v3067_v41  ;;  %v280_v41 = vadd.s32 1, %v13231_v26  ;;  %v471_v62 = vsel %vm10314_vm12, 1.0, %v12813_v12 }
 0x25f   : > { %v3100_v43 = vsel %vm12595_vm5, %v3088_v55, 0  ;;  %v10327_v55 = vmul.u32 16, %v13228_v22  ;;  %v10457_v22 = vadd.s32 128, %v13225_v24 }
 0x260   : > { %v3126_v15 = vand.u32 4294901760, %v3100_v43 }
 0x261   : > { %vm231_vm14 = vcmp.ge.s32.totalorder %v13225_v24, %v10327_v55 }
 0x262   : > { %v3127_v61 = vsub.f32 %v3100_v43, %v3126_v15  ;;  %3192 = vmatmul.f32.vlgmr.msra.gmra.mxu1 %v3126_v15  ;;  %v3551_v43 = vand.u32 4294901760, %v10312_v32 }
 0x263   : > { %3489 = vmatpush.msra.mxu1 %v3364_v10 }
 0x264   : > { %3230 = vmatmul.f32.vlgmr.msra.gmra.mxu2 %v3127_v61  ;;  %v3128_v48 = vand.u32 4294901760, %v3127_v61  ;;  %v3552_v54 = vsub.f32 %v10312_v32, %v3551_v43 }
 0x265   : > { %3418 = vmatpush.msra.mxu2 %v3391_v63 }
 0x266   : > { %3261 = vmatmul.f32.vlgmr.msra.gmra.mxu3 %v3128_v48  ;;  %v3129_v0 = vsub.f32 %v3127_v61, %v3128_v48  ;;  %v10337_v48 = vmul.u32 16, %v281_v58  ;;  %v3553_v17 = vand.u32 4294901760, %v3552_v54 }
 0x267   : > { %3441 = vmatpush.msra.mxu3 %v3364_v10 }
 0x268   : > { %v3130_v16 = vand.u32 4294901760, %v3129_v0  ;;  %v463_v0 = vsel %vm10333_vm7, 1.0, %v12813_v12  ;;  %vm311_vm8 = vcmp.lt.s32.totalorder %v13225_v24, %v10337_v48 }
 0x269   : > { %v10353_v10 = vsub.f32 %v463_v0, %v463_v0  ;;  %vm10395_vm13 = vmand %vm231_vm14, %vm311_vm8  ;;  %vm352_vm14 = vcmp.lt.s32.totalorder %v10457_v22, %v10271_v45 }
 0x26a   : > { %3131 = vmatmul.f32.vlgmr.msra.gmra.mxu0 %v3130_v16  ;;  %3335 = vmatmul.f32.vlgmr.msrb.gmra.mxu1 %v3126_v15  ;;  %v10347_v16 = vmul.u32 16, %v13231_v26 }
 0x26b   : > { %3467 = vmatpush.msra.mxu0 %v3392_v11  ;;  %v10360_v11 = vmul.u32 16, %v280_v41  ;;  %5534 = vmatpush.msk.msrb.mxu1 %vm10295_vm3, %v5886_v9 }
 0x26c   : > { %vm223_vm15 = vcmp.ge.s32.totalorder %v13225_v24, %v10347_v16 }
 0x26d   : > { %vm303_vm11 = vcmp.lt.s32.totalorder %v13225_v24, %v10360_v11  ;;  %5535 = vmatpush.msk.msrb.mxu1 %vm10314_vm12, %v5886_v9 }
 0x26e   : > { %vm10416_vm1 = vmand %vm223_vm15, %vm303_vm11  ;;  %vm264_vm15 = vcmp.ge.s32.totalorder %v10457_v22, %v10276_v59  ;;  %vm344_vm11 = vcmp.lt.s32.totalorder %v10457_v22, %v10278_v52 }
 0x26f   : > { %5536 = vmatpush.msk.msrb.mxu1 %vm10333_vm7, %v5886_v9 }
 0x271   : > { %5537 = vmatpush.msk.msrb.mxu1 %vm10356_vm4, %v5886_v9 }
 0x272   : > { %3306 = vmatmul.f32.vlgmr.msrb.gmra.mxu0 %v3126_v15  ;;  %v10330_v15 = vsub.f32 %v471_v62, %v471_v62 }
 0x273   : > { %3604 = vmatpush.msrb.mxu0 %v10312_v32 }
 0x274   : > { %v3556_v20 = vand.u32 4294901760, %v10330_v15 }
 0x275   : > { %3606 = vmatpush.msrb.mxu0 %v10330_v15 }
 0x277   : > { %3608 = vmatpush.msrb.mxu0 %v10353_v10 }
 0x2df   : > { %v3193_v50 = vpop.f32.mrf.mxu1 }
 0x2e7   : > { %v3132_v60 = vpop.f32.mrf.mxu0  ;;  %v3231_v57 = vpop.f32.mrf.mxu2 }
 0x2e8   : > { %v3194_v18 = vadd.f32 %v3193_v50, %v3132_v60  ;;  %v3336_v35 = vpop.f32.mrf.mxu1  ;;  %v3557_v50 = vsub.f32 %v10330_v15, %v3556_v20  ;;  %v3561_v60 = vand.u32 4294901760, %v10353_v10 }
 0x2e9   : > { %v3262_v4 = vpop.f32.mrf.mxu3 }
 0x2ea   : > { %v3232_v29 = vadd.f32 %v3231_v57, %v3194_v18  ;;  %v10373_v18 = vsub.f32 %v455_v33, %v455_v33 }
 0x2ec   : > { %v3263_v3 = vadd.f32 %v3262_v4, %v3232_v29  ;;  %v279_v4 = vadd.s32 1, %v6005_v1  ;;  %3610 = vmatpush.msrb.mxu0 %v10373_v18 }
 0x2ee   : > { %v10425_v40 = vmul.u32 16, %v279_v4 }
 0x2ef   : > { %v3307_v36 = vpop.f32.mrf.mxu0 }
 0x2f0   : > { %v3308_v2 = vadd.f32 %v3307_v36, %v3263_v3  ;;  %v3558_v3 = vand.u32 4294901760, %v3557_v50  ;;  %v3562_v36 = vsub.f32 %v10353_v10, %v3561_v60  ;;  %vm295_vm6 = vcmp.lt.s32.totalorder %v13225_v24, %v10425_v40 }
 0x2f2   : > { %v3337_v42 = vadd.f32 %v3336_v35, %v3308_v2  ;;  %v3566_v2 = vand.u32 4294901760, %v10373_v18 }
 0x2f4   : > { %v3339_v34 = vmax.f32 %v3337_v42, 0.0 }
 0x2f6   : > { %v3343_v47 = vsel %vm3341_vm2, %v3339_v34, 0  ;;  %vm10376_vm2 = vmand %vm239_vm0, %vm319_vm10  ;;  %v439_v34 = vsel %vm10395_vm13, 1.0, %v12813_v12  ;;  %vm272_vm10 = vcmp.ge.s32.totalorder %v10457_v22, %v10269_v30 }
 0x2f7   : > { %v3366_v39 = vand.u32 4294901760, %v3343_v47  ;;  %v447_v29 = vsel %vm10376_vm2, 1.0, %v12813_v12  ;;  %vm10485_vm8 = vmand %vm272_vm10, %vm352_vm14  ;;  %5538 = vmatpush.msk.msrb.mxu1 %vm10376_vm2, %v5886_v9  ;;  %vm336_vm10 = vcmp.lt.s32.totalorder %v10457_v22, %v10284_v51 }
 0x2f8   : > { %v10392_v35 = vsub.f32 %v447_v29, %v447_v29  ;;  %v480_v33 = vsel %vm10485_vm8, 1.0, %v12813_v12 }
 0x2f9   : > { %v3367_v49 = vsub.f32 %v3343_v47, %v3366_v39  ;;  %3397 = vmatmul.f32.vlgmr.msrb.gmra.mxu3 %v3366_v39  ;;  %3469 = vmatmul.f32.vlgmr.msra.gmra.mxu0 %v3366_v39  ;;  %v10407_v47 = vmul.u32 16, %v6005_v1  ;;  %v431_v1 = vsel %vm10416_vm1, 1.0, %v12813_v12  ;;  %v10510_v29 = vsub.f32 %v480_v33, %v480_v33 }
 0x2fa   : > { %3491 = vmatmul.f32.vlgmr.msra.gmra.mxu1 %v3366_v39  ;;  %3554 = vmatpush.msrb.mxu3 %v3553_v17  ;;  %v3563_v39 = vand.u32 4294901760, %v3562_v36  ;;  %v10434_v28 = vsub.f32 %v431_v1, %v431_v1 }
 0x2fb   : > { %v3368_v14 = vand.u32 4294901760, %v3367_v49  ;;  %3612 = vmatpush.msrb.mxu0 %v10392_v35  ;;  %vm215_vm9 = vcmp.ge.s32.totalorder %v13225_v24, %v10407_v47  ;;  %5539 = vmatpush.msk.msrb.mxu1 %vm10395_vm13, %v5886_v9 }
 0x2fc   : > { %3559 = vmatpush.msrb.mxu3 %v3558_v3  ;;  %v3581_v44 = vand.u32 4294901760, %v10434_v28  ;;  %vm10452_vm0 = vmand %vm215_vm9, %vm295_vm6  ;;  %vm256_vm6 = vcmp.ge.s32.totalorder %v10457_v22, %v10282_v46 }
 0x2fd   : > { %v3369_v56 = vsub.f32 %v3367_v49, %v3368_v14  ;;  %v423_v58 = vsel %vm10452_vm0, 1.0, %v12813_v12  ;;  %vm10500_vm9 = vmand %vm264_vm15, %vm344_vm11  ;;  %vm248_vm15 = vcmp.ge.s32.totalorder %v10457_v22, %v10291_v21  ;;  %vm328_vm11 = vcmp.lt.s32.totalorder %v10457_v22, %v10293_v7  ;;  %5540 = vmatpush.msk.msrb.mxu1 %vm10416_vm1, %v5886_v9 }
 0x2fe   : > { %3564 = vmatpush.msrb.mxu3 %v3563_v39  ;;  %v3582_v26 = vsub.f32 %v10434_v28, %v3581_v44  ;;  %v10472_v41 = vsub.f32 %v423_v58, %v423_v58  ;;  %v472_v4 = vsel %vm10500_vm9, 1.0, %v12813_v12  ;;  %vm10531_vm14 = vmand %vm256_vm6, %vm336_vm10  ;;  %vm240_vm10 = vcmp.ge.s32.totalorder %v10457_v22, %v10308_v23 }
 0x2ff   : > { %v3370_v8 = vand.u32 4294901760, %v3369_v56  ;;  %v10413_v56 = vsub.f32 %v439_v34, %v439_v34  ;;  %v10523_v34 = vsub.f32 %v472_v4, %v472_v4  ;;  %vm10557_vm6 = vmand %vm248_vm15, %vm328_vm11  ;;  %vm320_vm15 = vcmp.lt.s32.totalorder %v10457_v22, %v10310_v5  ;;  %5541 = vmatpush.msk.msrb.mxu1 %vm10452_vm0, %v5886_v9 }
 0x300   : > { %v3583_v62 = vand.u32 4294901760, %v3582_v26  ;;  %v3586_v0 = vand.u32 4294901760, %v10472_v41  ;;  %v456_v26 = vsel %vm10557_vm6, 1.0, %v12813_v12  ;;  %vm232_vm11 = vcmp.ge.s32.totalorder %v10457_v22, %v10327_v55 }
 0x301   : > { %3371 = vmatmul.f32.vlgmr.msrb.gmra.mxu2 %v3370_v8  ;;  %3445 = vmatmul.f32.vlgmr.msra.gmra.mxu3 %v3368_v14  ;;  %v3571_v14 = vand.u32 4294901760, %v10392_v35  ;;  %v3576_v31 = vand.u32 4294901760, %v10413_v56 }
 0x302   : > { %5526 = vmatpush.msk.msrb.mxu2 %vm10295_vm3, %v5886_v9  ;;  %3614 = vmatpush.msrb.mxu0 %v10413_v56  ;;  %v3587_v50 = vsub.f32 %v10472_v41, %v3586_v0 }
 0x303   : > { %v3572_v53 = vsub.f32 %v10392_v35, %v3571_v14  ;;  %v3577_v25 = vsub.f32 %v10413_v56, %v3576_v31 }
 0x304   : > { %5527 = vmatpush.msk.msrb.mxu2 %vm10314_vm12, %v5886_v9  ;;  %3616 = vmatpush.msrb.mxu0 %v10434_v28  ;;  %v3588_v39 = vand.u32 4294901760, %v3587_v50 }
 0x305   : > { %v3573_v27 = vand.u32 4294901760, %v3572_v53  ;;  %v3578_v37 = vand.u32 4294901760, %v3577_v25  ;;  %v3745_v53 = vand.u32 4294901760, %v10523_v34 }
 0x306   : > { %5528 = vmatpush.msk.msrb.mxu2 %vm10333_vm7, %v5886_v9  ;;  %3618 = vmatpush.msrb.mxu0 %v10472_v41 }
 0x308   : > { %5529 = vmatpush.msk.msrb.mxu2 %vm10356_vm4, %v5886_v9  ;;  %5550 = vmatpush.msk.msra.mxu0 %vm10485_vm8, %v5886_v9 }
 0x309   : > { %3421 = vmatmul.f32.vlgmr.msra.gmra.mxu2 %v3367_v49  ;;  %v3567_v49 = vsub.f32 %v10373_v18, %v3566_v2 }
 0x30a   : > { %5530 = vmatpush.msk.msrb.mxu2 %vm10376_vm2, %v5886_v9  ;;  %5551 = vmatpush.msk.msra.mxu0 %vm10500_vm9, %v5886_v9 }
 0x30b   : > { %v3568_v38 = vand.u32 4294901760, %v3567_v49  ;;  %v3740_v49 = vand.u32 4294901760, %v10510_v29 }
 0x30c   : > { %5531 = vmatpush.msk.msrb.mxu2 %vm10395_vm13, %v5886_v9  ;;  %5552 = vmatpush.msk.msra.mxu0 %vm10531_vm14, %v5886_v9 }
 0x30d   : > { %3569 = vmatpush.msrb.mxu3 %v3568_v38  ;;  %v464_v38 = vsel %vm10531_vm14, 1.0, %v12813_v12 }
 0x30e   : > { %v10555_v25 = vsub.f32 %v464_v38, %v464_v38  ;;  %5532 = vmatpush.msk.msrb.mxu2 %vm10416_vm1, %v5886_v9  ;;  %5553 = vmatpush.msk.msra.mxu0 %vm10557_vm6, %v5886_v9 }
 0x30f   : > { %3574 = vmatpush.msrb.mxu3 %v3573_v27  ;;  %v3741_v27 = vsub.f32 %v10510_v29, %v3740_v49 }
 0x310   : > { %v12594_v33 = vand.u32 4294901760, %v10555_v25  ;;  %5533 = vmatpush.msk.msrb.mxu2 %vm10452_vm0, %v5886_v9  ;;  %v13271_v54 = vand.u32 4294901760, %v10555_v25 }
 0x311   : > { %3579 = vmatpush.msrb.mxu3 %v3578_v37  ;;  %v3746_v37 = vsub.f32 %v10523_v34, %v3745_v53  ;;  %v3742_v13 = vand.u32 4294901760, %v3741_v27 }
 0x312   : > { %3658 = vmatpush.msra.mxu2 %v3551_v43  ;;  %v3751_v19 = vsub.f32 %v10555_v25, %v12594_v33 }
 0x313   : > { %3584 = vmatpush.msrb.mxu3 %v3583_v62  ;;  %v10583_v62 = vsub.f32 %v456_v26, %v456_v26  ;;  %3743 = vmatpush.msra.mxu1 %v3742_v13 }
 0x314   : > { %v3752_v26 = vand.u32 4294901760, %v3751_v19  ;;  %3661 = vmatpush.msra.mxu2 %v3556_v20 }
 0x315   : > { %3589 = vmatpush.msrb.mxu3 %v3588_v39  ;;  %v3747_v39 = vand.u32 4294901760, %v3746_v37 }
 0x316   : > { %3664 = vmatpush.msra.mxu2 %v3561_v60 }
 0x317   : > { %5542 = vmatpush.msk.msra.mxu3 %vm10295_vm3, %v5886_v9  ;;  %vm10586_vm3 = vmand %vm240_vm10, %vm320_vm15  ;;  %vm312_vm10 = vcmp.lt.s32.totalorder %v10457_v22, %v10337_v48  ;;  %vm224_vm15 = vcmp.ge.s32.totalorder %v10457_v22, %v10347_v16  ;;  %3748 = vmatpush.msra.mxu1 %v3747_v39 }
 0x318   : > { %v448_v38 = vsel %vm10586_vm3, 1.0, %v12813_v12  ;;  %5554 = vmatpush.msk.msra.mxu0 %vm10586_vm3, %v5886_v9  ;;  %3667 = vmatpush.msra.mxu2 %v3566_v2 }
 0x319   : > { %5543 = vmatpush.msk.msra.mxu3 %vm10314_vm12, %v5886_v9  ;;  %vm10611_vm12 = vmand %vm232_vm11, %vm312_vm10  ;;  %vm304_vm11 = vcmp.lt.s32.totalorder %v10457_v22, %v10360_v11  ;;  %vm216_vm10 = vcmp.ge.s32.totalorder %v10457_v22, %v10407_v47  ;;  %3753 = vmatpush.msra.mxu1 %v3752_v26 }
 0x31a   : > { %v440_v32 = vsel %vm10611_vm12, 1.0, %v12813_v12  ;;  %5555 = vmatpush.msk.msra.mxu0 %vm10611_vm12, %v5886_v9  ;;  %3670 = vmatpush.msra.mxu2 %v3571_v14 }
 0x31b   : > { %5544 = vmatpush.msk.msra.mxu3 %vm10333_vm7, %v5886_v9  ;;  %v10633_v13 = vsub.f32 %v440_v32, %v440_v32  ;;  %vm10635_vm7 = vmand %vm224_vm15, %vm304_vm11  ;;  %vm296_vm15 = vcmp.lt.s32.totalorder %v10457_v22, %v10425_v40 }
 0x31c   : > { %v432_v20 = vsel %vm10635_vm7, 1.0, %v12813_v12  ;;  %5556 = vmatpush.msk.msra.mxu0 %vm10635_vm7, %v5886_v9  ;;  %3673 = vmatpush.msra.mxu2 %v3576_v31 }
 0x31d   : > { %5545 = vmatpush.msk.msra.mxu3 %vm10356_vm4, %v5886_v9  ;;  %v10655_v39 = vsub.f32 %v432_v20, %v432_v20  ;;  %v3765_v19 = vand.u32 4294901760, %v10633_v13  ;;  %vm10658_vm4 = vmand %vm216_vm10, %vm296_vm15 }
 0x31e   : > { %v424_v60 = vsel %vm10658_vm4, 1.0, %v12813_v12  ;;  %5557 = vmatpush.msk.msra.mxu0 %vm10658_vm4, %v5886_v9  ;;  %3676 = vmatpush.msra.mxu2 %v3581_v44 }
 0x31f   : > { %5546 = vmatpush.msk.msra.mxu3 %vm10376_vm2, %v5886_v9  ;;  %v3766_v57 = vsub.f32 %v10633_v13, %v3765_v19 }
 0x320   : > { %3679 = vmatpush.msra.mxu2 %v3586_v0 }
 0x321   : > { %5547 = vmatpush.msk.msra.mxu3 %vm10395_vm13, %v5886_v9  ;;  %v3767_v2 = vand.u32 4294901760, %v3766_v57 }
 0x323   : > { %5548 = vmatpush.msk.msra.mxu3 %vm10416_vm1, %v5886_v9 }
 0x325   : > { %5549 = vmatpush.msk.msra.mxu3 %vm10452_vm0, %v5886_v9 }
 0x376   : > { %v3470_v32 = vpop.f32.mrf.mxu0 }
 0x377   : > { %v3492_v26 = vpop.f32.mrf.mxu1 }
 0x37c   : > { %v3398_v3 = vpop.f32.mrf.mxu3 }
 0x384   : > { %v3372_v36 = vpop.f32.mrf.mxu2  ;;  %v3446_v33 = vpop.f32.mrf.mxu3 }
 0x385   : > { %v3399_v4 = vadd.f32 %v3398_v3, %v3372_v36  ;;  %v10608_v3 = vsub.f32 %v448_v38, %v448_v38  ;;  %v3755_v36 = vand.u32 4294901760, %v10583_v62  ;;  %v13256_v38 = vmov 0 }
 0x386   : > { %v13257_v38 = vsel %vm10635_vm7, 4294967295, %v13256_v38  ;;  %vm13262_vm7 = vcmask 523264  }
 0x387   : > { %v3756_v61 = vsub.f32 %v10583_v62, %v3755_v36  ;;  %v3760_v15 = vand.u32 4294901760, %v10608_v3 }
 0x389   : > { %v3757_v63 = vand.u32 4294901760, %v3756_v61  ;;  %v3761_v10 = vsub.f32 %v10608_v3, %v3760_v15 }
 0x38b   : > { %3758 = vmatpush.msra.mxu1 %v3757_v63  ;;  %v3762_v61 = vand.u32 4294901760, %v3761_v10  ;;  %v10713_v10 = vadd.s32 256, %v13225_v24 }
 0x38c   : > { %v3422_v37 = vpop.f32.mrf.mxu2 }
 0x38d   : > { %v3423_v43 = vadd.f32 %v3422_v37, %v3399_v4  ;;  %v13258_v37 = vmov 0  ;;  %3763 = vmatpush.msra.mxu1 %v3762_v61  ;;  %vm273_vm13 = vcmp.ge.s32.totalorder %v10713_v10, %v10269_v30  ;;  %vm353_vm1 = vcmp.lt.s32.totalorder %v10713_v10, %v10271_v45 }
 0x38e   : > { %v13259_v37 = vsel %vm10658_vm4, 4294967295, %v13258_v37  ;;  %vm10719_vm15 = vmand %vm273_vm13, %vm353_vm1  ;;  %vm265_vm5 = vcmp.ge.s32.totalorder %v10713_v10, %v10276_v59  ;;  %vm345_vm4 = vcmp.lt.s32.totalorder %v10713_v10, %v10278_v52  ;;  %vm257_vm13 = vcmp.ge.s32.totalorder %v10713_v10, %v10282_v46 }
 0x38f   : > { %v3447_v4 = vadd.f32 %v3446_v33, %v3423_v43  ;;  %v10679_v33 = vsub.f32 %v424_v60, %v424_v60  ;;  %v3770_v43 = vand.u32 4294901760, %v10655_v39  ;;  %3768 = vmatpush.msra.mxu1 %v3767_v2  ;;  %v481_v2 = vsel %vm10719_vm15, 1.0, %v12813_v12 }
 0x390   : > { %vm337_vm1 = vcmp.lt.s32.totalorder %v10713_v10, %v10284_v51 }
 0x391   : > { %v3471_v22 = vadd.f32 %v3470_v32, %v3447_v4  ;;  %v3771_v20 = vsub.f32 %v10655_v39, %v3770_v43  ;;  %v3775_v4 = vand.u32 4294901760, %v10679_v33 }
 0x393   : > { %v3493_v18 = vadd.f32 %v3492_v26, %v3471_v22  ;;  %v3772_v63 = vand.u32 4294901760, %v3771_v20  ;;  %v3776_v35 = vsub.f32 %v10679_v33, %v3775_v4 }
 0x395   : > { %v5525_v42 = vmul.f32 -1.442695, %v3493_v18  ;;  %v3777_v14 = vand.u32 4294901760, %v3776_v35  ;;  %3773 = vmatpush.msra.mxu1 %v3772_v63  ;;  %v10752_v63 = vsub.f32 %v481_v2, %v481_v2 }
 0x397   : > { %5774 = vpow2.f32 %v5525_v42  ;;  %3778 = vmatpush.msra.mxu1 %v3777_v14 }
 0x39d   : > { %v5775_v56 = vpop.eup %5774 }
 0x39e   : > { %v3498_v8 = vadd.f32 1.0, %v5775_v56 }
 0x3a0   : > { %5776 = vrcp.f32 %v3498_v8  ;;  %v3510_v60 = vand.u32 2147483648, %v3498_v8  ;;  %v3508_v57 = vand.u32 2147483647, %v3498_v8  ;;  %vm3504_vm0 = vweird.f32 %v3498_v8 }
 0x3a2   : > { %v3511_v44 = vor.u32 1.1754944e-38, %v3510_v60  ;;  %vm3509_vm10 = vcmp.eq.f32.partialorder %v3508_v57, 8.507059e+37 }
 0x3a6   : > { %v5777_v31 = vpop.eup %5776 }
 0x3a7   : > { %v3500_v32 = vmul.f32 %v5777_v31, %v3498_v8  ;;  %vm3505_vm2 = vweird.f32 %v5777_v31 }
 0x3a8   : > { %vm3506_vm11 = vmor %vm3504_vm0, %vm3505_vm2 }
 0x3a9   : > { %v3501_v6 = vsub.f32 1.0, %v3500_v32  ;;  %vm10733_vm2 = vmand %vm265_vm5, %vm345_vm4  ;;  %vm329_vm5 = vcmp.lt.s32.totalorder %v10713_v10, %v10293_v7 }
 0x3aa   : > { %v473_v35 = vsel %vm10733_vm2, 1.0, %v12813_v12  ;;  %vm10757_vm4 = vmand %vm257_vm13, %vm337_vm1  ;;  %vm233_vm1 = vcmp.ge.s32.totalorder %v10713_v10, %v10327_v55 }
 0x3ab   : > { %v3502_v22 = vmul.f32 %v5777_v31, %v3501_v6  ;;  %v10781_v32 = vsub.f32 %v473_v35, %v473_v35  ;;  %v3929_v6 = vand.u32 4294901760, %v10752_v63 }
 0x3ad   : > { %v3503_v28 = vadd.f32 %v5777_v31, %v3502_v22  ;;  %v3930_v17 = vsub.f32 %v10752_v63, %v3929_v6 }
 0x3af   : > { %v3507_v41 = vsel %vm3506_vm11, %v5777_v31, %v3503_v28  ;;  %vm241_vm11 = vcmp.ge.s32.totalorder %v10713_v10, %v10308_v23  ;;  %v3934_v28 = vand.u32 4294901760, %v10781_v32 }
 0x3b0   : > { %v3512_v26 = vsel %vm3509_vm10, %v3511_v44, %v3507_v41  ;;  %vm321_vm10 = vcmp.lt.s32.totalorder %v10713_v10, %v10310_v5 }
 0x3b1   : > { %v3515_v61 = vsel %vm13262_vm7, %v3512_v26, 0  ;;  %vm249_vm7 = vcmp.ge.s32.totalorder %v10713_v10, %v10291_v21  ;;  %vm10800_vm13 = vmand %vm241_vm11, %vm321_vm10  ;;  %vm297_vm10 = vcmp.lt.s32.totalorder %v10713_v10, %v10425_v40 }
 0x3b2   : > { %v10728_v18 = vand.u32 4294901760, %v3515_v61  ;;  %vm10770_vm0 = vmand %vm249_vm7, %vm329_vm5  ;;  %vm313_vm7 = vcmp.lt.s32.totalorder %v10713_v10, %v10337_v48  ;;  %vm305_vm5 = vcmp.lt.s32.totalorder %v10713_v10, %v10360_v11  ;;  %v449_v41 = vsel %vm10800_vm13, 1.0, %v12813_v12 }
 0x3b3   : > { %v457_v22 = vsel %vm10770_vm0, 1.0, %v12813_v12  ;;  %vm10831_vm11 = vmand %vm233_vm1, %vm313_vm7 }
 0x3b4   : > { %v10742_v42 = vsub.f32 %v3515_v61, %v10728_v18  ;;  %3591 = vmatmul.f32.vlgmr.msrb.gmra.mxu3 %v10728_v18  ;;  %v10826_v44 = vsub.f32 %v457_v22, %v457_v22 }
 0x3b5   : > { %5558 = vmatpush.msk.msrb.mxu3 %vm10485_vm8, %v5886_v9 }
 0x3b6   : > { %3621 = vmatmul.f32.vlgmr.msrb.gmra.mxu0 %v10742_v42  ;;  %v10763_v56 = vand.u32 4294901760, %v10742_v42  ;;  %v12612_v1 = vand.u32 4294901760, %v10826_v44  ;;  %v13303_v26 = vand.u32 4294901760, %v10826_v44 }
 0x3b7   : > { %5559 = vmatpush.msk.msrb.mxu3 %vm10500_vm9, %v5886_v9  ;;  %3847 = vmatpush.msrb.mxu0 %v3740_v49  ;;  %v465_v49 = vsel %vm10757_vm4, 1.0, %v12813_v12 }
 0x3b8   : > { %3644 = vmatmul.f32.vlgmr.msrb.gmra.mxu1 %v10763_v56  ;;  %v3536_v31 = vsub.f32 %v10742_v42, %v10763_v56 }
 0x3b9   : > { %5560 = vmatpush.msk.msrb.mxu3 %vm10531_vm14, %v5886_v9  ;;  %3850 = vmatpush.msrb.mxu0 %v3745_v53  ;;  %v10813_v53 = vsub.f32 %v465_v49, %v465_v49 }
 0x3ba   : > { %5566 = vmatpush.msk.msrb.mxu1 %vm10485_vm8, %v5886_v9  ;;  %v10795_v60 = vand.u32 4294901760, %v3536_v31  ;;  %vm225_vm8 = vcmp.ge.s32.totalorder %v10713_v10, %v10347_v16  ;;  %v3931_v31 = vand.u32 4294901760, %v3930_v17 }
 0x3bb   : > { %5561 = vmatpush.msk.msrb.mxu3 %vm10557_vm6, %v5886_v9  ;;  %3853 = vmatpush.msrb.mxu0 %v13271_v54  ;;  %vm10850_vm1 = vmand %vm225_vm8, %vm305_vm5  ;;  %v12614_v61 = vand.u32 4294901760, %v10813_v53 }
 0x3bc   : > { %5567 = vmatpush.msk.msrb.mxu1 %vm10500_vm9, %v5886_v9  ;;  %3538 = vmatmul.f32.vlgmr.msrb.gmra.mxu2 %v10795_v60  ;;  %vm217_vm9 = vcmp.ge.s32.totalorder %v10713_v10, %v10407_v47  ;;  %v441_v10 = vsel %vm10831_vm11, 1.0, %v12813_v12  ;;  %v433_v35 = vsel %vm10850_vm1, 1.0, %v12813_v12 }
 0x3bd   : > { %3702 = vmatmul.f32.vlgmr.msra.gmra.mxu3 %v10728_v18  ;;  %3793 = vmatpush.msrb.mxu2 %v10510_v29  ;;  %vm10868_vm7 = vmand %vm217_vm9, %vm297_vm10  ;;  %v3940_v58 = vsub.f32 %v10813_v53, %v12614_v61  ;;  %v10897_v49 = vsub.f32 %v441_v10, %v441_v10  ;;  %v10907_v54 = vsub.f32 %v433_v35, %v433_v35 }
 0x3be   : > { %5562 = vmatpush.msk.msrb.mxu3 %vm10586_vm3, %v5886_v9  ;;  %3856 = vmatpush.msrb.mxu0 %v3755_v36  ;;  %v10863_v36 = vsub.f32 %v449_v41, %v449_v41  ;;  %v3945_v41 = vsub.f32 %v10826_v44, %v12612_v1 }
 0x3bf   : > { %5568 = vmatpush.msk.msrb.mxu1 %vm10531_vm14, %v5886_v9  ;;  %3727 = vmatmul.f32.vlgmr.msra.gmra.mxu0 %v10795_v60  ;;  %vm13278_vm14 = vnez %v13257_v38  ;;  %v3941_v50 = vand.u32 4294901760, %v3940_v58  ;;  %v12607_v17 = vand.u32 4294901760, %v10907_v54 }
 0x3c0   : > { %3795 = vmatpush.msrb.mxu2 %v10523_v34  ;;  %5563 = vmatpush.msk.msrb.mxu3 %vm10611_vm12, %v5886_v9  ;;  %v3935_v34 = vsub.f32 %v10781_v32, %v3934_v28  ;;  %v12610_v22 = vand.u32 4294901760, %v10863_v36 }
 0x3c1   : > { %3859 = vmatpush.msrb.mxu0 %v3760_v15  ;;  %5569 = vmatpush.msk.msrb.mxu1 %vm10557_vm6, %v5886_v9  ;;  %v10887_v15 = vadd.s32 384, %v13225_v24  ;;  %vm13279_vm6 = vnez %v13259_v37  ;;  %v3960_v37 = vsub.f32 %v10907_v54, %v12607_v17 }
 0x3c2   : > { %3780 = vmatmul.f32.vlgmr.msra.gmra.mxu1 %v10728_v18  ;;  %3797 = vmatpush.msrb.mxu2 %v10555_v25  ;;  %v425_v25 = vsel %vm10868_vm7, 1.0, %v12813_v12  ;;  %v3950_v27 = vsub.f32 %v10863_v36, %v12610_v22 }
 0x3c3   : > { %5564 = vmatpush.msk.msrb.mxu3 %vm13278_vm14, %v5886_v9  ;;  %3862 = vmatpush.msrb.mxu0 %v3765_v19  ;;  %v3936_v19 = vand.u32 4294901760, %v3935_v34  ;;  %vm354_vm8 = vcmp.lt.s32.totalorder %v10887_v15, %v10271_v45  ;;  %vm346_vm5 = vcmp.lt.s32.totalorder %v10887_v15, %v10278_v52  ;;  %v13282_v34 = vmov 0 }
 0x3c4   : > { %5570 = vmatpush.msk.msrb.mxu1 %vm10586_vm3, %v5886_v9  ;;  %3799 = vmatpush.msrb.mxu2 %v10583_v62  ;;  %v10920_v62 = vsub.f32 %v425_v25, %v425_v25  ;;  %vm274_vm3 = vcmp.ge.s32.totalorder %v10887_v15, %v10269_v30 }
 0x3c5   : > { %5565 = vmatpush.msk.msrb.mxu3 %vm13279_vm6, %v5886_v9  ;;  %3865 = vmatpush.msrb.mxu0 %v3770_v43  ;;  %v12608_v43 = vand.u32 4294901760, %v10897_v49  ;;  %vm10943_vm9 = vmand %vm274_vm3, %vm354_vm8  ;;  %vm338_vm3 = vcmp.lt.s32.totalorder %v10887_v15, %v10284_v51  ;;  %vm330_vm8 = vcmp.lt.s32.totalorder %v10887_v15, %v10293_v7 }
 0x3c6   : > { %5571 = vmatpush.msk.msrb.mxu1 %vm10611_vm12, %v5886_v9  ;;  %3681 = vmatmul.f32.vlgmr.msra.gmra.mxu2 %v10728_v18  ;;  %vm266_vm12 = vcmp.ge.s32.totalorder %v10887_v15, %v10276_v59  ;;  %v12606_v10 = vand.u32 4294901760, %v10920_v62  ;;  %v482_v35 = vsel %vm10943_vm9, 1.0, %v12813_v12 }
 0x3c7   : > { %3932 = vmatpush.msra.mxu3 %v3931_v31  ;;  %3801 = vmatpush.msrb.mxu2 %v10608_v3  ;;  %v3955_v38 = vsub.f32 %v10897_v49, %v12608_v43  ;;  %vm10957_vm10 = vmand %vm266_vm12, %vm346_vm5  ;;  %vm242_vm5 = vcmp.ge.s32.totalorder %v10887_v15, %v10308_v23 }
 0x3c8   : > { %3833 = vmatmul.f32.vlgmr.msrb.gmra.mxu3 %v10763_v56  ;;  %3868 = vmatpush.msrb.mxu0 %v3775_v4  ;;  %v3946_v4 = vand.u32 4294901760, %v3945_v41  ;;  %v13283_v34 = vsel %vm10957_vm10, 4294967295, %v13282_v34  ;;  %v3965_v31 = vsub.f32 %v10920_v62, %v12606_v10  ;;  %v474_v58 = vsel %vm10957_vm10, 1.0, %v12813_v12 }
 0x3c9   : > { %5572 = vmatpush.msk.msrb.mxu1 %vm13278_vm14, %v5886_v9  ;;  %3937 = vmatpush.msra.mxu3 %v3936_v19  ;;  %vm258_vm14 = vcmp.ge.s32.totalorder %v10887_v15, %v10282_v46  ;;  %v3956_v25 = vand.u32 4294901760, %v3955_v38  ;;  %v10998_v19 = vsub.f32 %v482_v35, %v482_v35  ;;  %v3961_v41 = vand.u32 4294901760, %v3960_v37 }
 0x3ca   : > { %3982 = vmatpush.msra.mxu0 %v10752_v63  ;;  %3803 = vmatpush.msrb.mxu2 %v10633_v13  ;;  %v3951_v13 = vand.u32 4294901760, %v3950_v27  ;;  %vm10990_vm12 = vmand %vm258_vm14, %vm338_vm3  ;;  %vm13286_vm14 = vcmp.ge.s32.totalorder %v10887_v15, %v10291_v21  ;;  %v11019_v27 = vsub.f32 %v474_v58, %v474_v58  ;;  %vm234_vm10 = vcmp.ge.s32.totalorder %v10887_v15, %v10327_v55 }
 0x3cb   : > { %3870 = vmatmul.f32.vlgmr.msrb.gmra.mxu0 %v10728_v18  ;;  %5573 = vmatpush.msk.msrb.mxu1 %vm13279_vm6, %v5886_v9  ;;  %vm322_vm6 = vcmp.lt.s32.totalorder %v10887_v15, %v10310_v5  ;;  %vm11011_vm3 = vmand %vm13286_vm14, %vm330_vm8  ;;  %vm314_vm8 = vcmp.lt.s32.totalorder %v10887_v15, %v10337_v48  ;;  %v3966_v38 = vand.u32 4294901760, %v3965_v31  ;;  %v13291_v58 = vmov 0 }
 0x3cc   : > { %3942 = vmatpush.msra.mxu3 %v3941_v50  ;;  %3984 = vmatpush.msra.mxu0 %v10781_v32  ;;  %vm11032_vm14 = vmand %vm242_vm5, %vm322_vm6  ;;  %v458_v37 = vsel %vm11011_vm3, 1.0, %v12813_v12  ;;  %vm226_vm5 = vcmp.ge.s32.totalorder %v10887_v15, %v10347_v16  ;;  %v12611_v31 = vand.u32 4294901760, %v11019_v27  ;;  %v13300_v32 = vand.u32 4294901760, %v10813_v53 }
 0x3cd   : > { %5582 = vmatpush.msk.msra.mxu1 %vm10719_vm15, %v5886_v9  ;;  %3805 = vmatpush.msrb.mxu2 %v10655_v39  ;;  %v13284_v39 = vmov 0  ;;  %vm11049_vm6 = vmand %vm234_vm10, %vm314_vm8  ;;  %vm218_vm10 = vcmp.ge.s32.totalorder %v10887_v15, %v10407_v47  ;;  %vm298_vm8 = vcmp.lt.s32.totalorder %v10887_v15, %v10425_v40 }
 0x3ce   : > { %3891 = vmatmul.f32.vlgmr.msrb.gmra.mxu1 %v10728_v18  ;;  %3947 = vmatpush.msra.mxu3 %v3946_v4  ;;  %v13285_v39 = vsel %vm10990_vm12, 4294967295, %v13284_v39  ;;  %v13289_v4 = vmov 0  ;;  %v13292_v58 = vsel %vm11049_vm6, 4294967295, %v13291_v58 }
 0x3cf   : > { %3986 = vmatpush.msra.mxu0 %v10813_v53  ;;  %5583 = vmatpush.msk.msra.mxu1 %vm10733_vm2, %v5886_v9  ;;  %v13290_v4 = vsel %vm11032_vm14, 4294967295, %v13289_v4 }
 0x3d0   : > { %3807 = vmatpush.msrb.mxu2 %v10679_v33  ;;  %3952 = vmatpush.msra.mxu3 %v3951_v13  ;;  %v466_v33 = vsel %vm10990_vm12, 1.0, %v12813_v12  ;;  %v12609_v13 = vand.u32 4294901760, %v10998_v19  ;;  %vm306_vm12 = vcmp.lt.s32.totalorder %v10887_v15, %v10360_v11  ;;  %v4124_v15 = vsub.f32 %v11019_v27, %v12611_v31 }
 0x3d1   : > { %3988 = vmatpush.msra.mxu0 %v10826_v44  ;;  %5584 = vmatpush.msk.msra.mxu1 %vm10757_vm4, %v5886_v9  ;;  %v11047_v35 = vsub.f32 %v466_v33, %v466_v33  ;;  %v11068_v33 = vsub.f32 %v458_v37, %v458_v37  ;;  %v442_v37 = vsel %vm11049_vm6, 1.0, %v12813_v12 }
 0x3d2   : > { %5574 = vmatpush.msk.msra.mxu2 %vm10719_vm15, %v5886_v9  ;;  %3957 = vmatpush.msra.mxu3 %v3956_v25  ;;  %v450_v25 = vsel %vm11032_vm14, 1.0, %v12813_v12  ;;  %vm11086_vm14 = vmand %vm226_vm5, %vm306_vm12  ;;  %v4125_v20 = vand.u32 4294901760, %v4124_v15 }
 0x3d3   : > { %3810 = vmatmul.f32.vlgmr.msrb.gmra.mxu2 %v10742_v42  ;;  %3990 = vmatpush.msra.mxu0 %v10863_v36  ;;  %v11095_v17 = vsub.f32 %v450_v25, %v450_v25  ;;  %vm11104_vm12 = vmand %vm218_vm10, %vm298_vm8  ;;  %v4133_v25 = vand.u32 4294901760, %v11068_v33  ;;  %v434_v22 = vsel %vm11086_vm14, 1.0, %v12813_v12  ;;  %v13317_v3 = vand.u32 4294901760, %v11047_v35 }
 0x3d4   : > { %5575 = vmatpush.msk.msra.mxu2 %vm10733_vm2, %v5886_v9  ;;  %5585 = vmatpush.msk.msra.mxu1 %vm10770_vm0, %v5886_v9  ;;  %v426_v1 = vsel %vm11104_vm12, 1.0, %v12813_v12 }
 0x3d5   : > { %3962 = vmatpush.msra.mxu3 %v3961_v41  ;;  %3992 = vmatpush.msra.mxu0 %v10897_v49  ;;  %v4119_v41 = vsub.f32 %v10998_v19, %v12609_v13  ;;  %v11113_v13 = vsub.f32 %v442_v37, %v442_v37  ;;  %v12615_v37 = vand.u32 4294901760, %v11095_v17  ;;  %v11154_v15 = vsub.f32 %v426_v1, %v426_v1 }
 0x3d6   : > { %5576 = vmatpush.msk.msra.mxu2 %vm10757_vm4, %v5886_v9  ;;  %5586 = vmatpush.msk.msra.mxu1 %vm10800_vm13, %v5886_v9 }
 0x3d7   : > { %3967 = vmatpush.msra.mxu3 %v3966_v38  ;;  %3994 = vmatpush.msra.mxu0 %v10907_v54  ;;  %v12613_v38 = vand.u32 4294901760, %v11047_v35  ;;  %v4120_v31 = vand.u32 4294901760, %v4119_v41  ;;  %v11141_v41 = vsub.f32 %v434_v22, %v434_v22  ;;  %v4143_v61 = vand.u32 4294901760, %v11113_v13 }
 0x3d8   : > { %5577 = vmatpush.msk.msra.mxu2 %vm10770_vm0, %v5886_v9  ;;  %5587 = vmatpush.msk.msra.mxu1 %vm10831_vm11, %v5886_v9  ;;  %v4139_v22 = vsub.f32 %v11095_v17, %v12615_v37 }
 0x3d9   : > { %3969 = vmatmul.f32.vlgmr.msra.gmra.mxu3 %v10728_v18  ;;  %3996 = vmatpush.msra.mxu0 %v10920_v62  ;;  %v4129_v0 = vsub.f32 %v11047_v35, %v12613_v38  ;;  %v4134_v38 = vsub.f32 %v11068_v33, %v4133_v25  ;;  %v4148_v1 = vand.u32 4294901760, %v11141_v41 }
 0x3da   : > { %5578 = vmatpush.msk.msra.mxu2 %vm10800_vm13, %v5886_v9  ;;  %5590 = vmatpush.msk.msrb.mxu3 %vm10719_vm15, %v5886_v9  ;;  %vm13297_vm15 = vnez %v13283_v34  ;;  %v4140_v37 = vand.u32 4294901760, %v4139_v22  ;;  %v13309_v22 = vmov 0 }
 0x3db   : > { %5588 = vmatpush.msk.msra.mxu1 %vm10850_vm1, %v5886_v9  ;;  %3999 = vmatmul.f32.vlgmr.msra.gmra.mxu0 %v10742_v42  ;;  %v4130_v14 = vand.u32 4294901760, %v4129_v0  ;;  %v4135_v8 = vand.u32 4294901760, %v4134_v38  ;;  %v4144_v0 = vsub.f32 %v11113_v13, %v4143_v61  ;;  %v4149_v57 = vsub.f32 %v11141_v41, %v4148_v1 }
 0x3dc   : > { %5591 = vmatpush.msk.msrb.mxu3 %vm10733_vm2, %v5886_v9  ;;  %5598 = vmatpush.msk.msrb.mxu0 %vm10943_vm9, %v5886_v9  ;;  %vm13298_vm2 = vnez %v13285_v39  ;;  %v13327_v39 = vand.u32 4294901760, %v11095_v17 }
 0x3dd   : > { %5579 = vmatpush.msk.msra.mxu2 %vm10831_vm11, %v5886_v9  ;;  %5589 = vmatpush.msk.msra.mxu1 %vm10868_vm7, %v5886_v9  ;;  %v4145_v63 = vand.u32 4294901760, %v4144_v0  ;;  %v4150_v53 = vand.u32 4294901760, %v4149_v57  ;;  %v13312_v57 = vand.u32 4294901760, %v10897_v49  ;;  %v13315_v49 = vand.u32 4294901760, %v11019_v27 }
 0x3de   : > { %4022 = vmatmul.f32.vlgmr.msra.gmra.mxu1 %v10763_v56  ;;  %5592 = vmatpush.msk.msrb.mxu3 %vm10757_vm4, %v5886_v9  ;;  %vm13299_vm4 = vnez %v13290_v4 }
 0x3df   : > { %5599 = vmatpush.msk.msrb.mxu0 %vm13297_vm15, %v5886_v9  ;;  %4121 = vmatpush.msrb.mxu1 %v4120_v31  ;;  %v11170_v31 = vadd.s32 512, %v13225_v24 }
 0x3e0   : > { %5580 = vmatpush.msk.msra.mxu2 %vm10850_vm1, %v5886_v9  ;;  %5593 = vmatpush.msk.msrb.mxu3 %vm10770_vm0, %v5886_v9 }
 0x3e1   : > { %5600 = vmatpush.msk.msrb.mxu0 %vm13298_vm2, %v5886_v9  ;;  %4126 = vmatpush.msrb.mxu1 %v4125_v20  ;;  %v4153_v20 = vand.u32 4294901760, %v11154_v15  ;;  %vm275_vm0 = vcmp.ge.s32.totalorder %v11170_v31, %v10269_v30  ;;  %vm347_vm5 = vcmp.lt.s32.totalorder %v11170_v31, %v10278_v52  ;;  %vm339_vm8 = vcmp.lt.s32.totalorder %v11170_v31, %v10284_v51 }
 0x3e2   : > { %5581 = vmatpush.msk.msra.mxu2 %vm10868_vm7, %v5886_v9  ;;  %5594 = vmatpush.msk.msrb.mxu3 %vm10800_vm13, %v5886_v9  ;;  %vm355_vm13 = vcmp.lt.s32.totalorder %v11170_v31, %v10271_v45 }
 0x3e3   : > { %3916 = vmatmul.f32.vlgmr.msra.gmra.mxu2 %v10795_v60  ;;  %5601 = vmatpush.msk.msrb.mxu0 %vm11011_vm3, %v5886_v9  ;;  %vm11218_vm10 = vmand %vm275_vm0, %vm355_vm13  ;;  %vm251_vm13 = vcmp.ge.s32.totalorder %v11170_v31, %v10291_v21 }
 0x3e4   : > { %4036 = vmatpush.msrb.mxu2 %v3929_v6  ;;  %4131 = vmatpush.msrb.mxu1 %v4130_v14  ;;  %v4154_v6 = vsub.f32 %v11154_v15, %v4153_v20  ;;  %v483_v44 = vsel %vm11218_vm10, 1.0, %v12813_v12 }
 0x3e5   : > { %5595 = vmatpush.msk.msrb.mxu3 %vm10831_vm11, %v5886_v9  ;;  %5602 = vmatpush.msk.msrb.mxu0 %vm13299_vm4, %v5886_v9  ;;  %vm267_vm11 = vcmp.ge.s32.totalorder %v11170_v31, %v10276_v59 }
 0x3e6   : > { %4039 = vmatpush.msrb.mxu2 %v3934_v28  ;;  %4136 = vmatpush.msrb.mxu1 %v4135_v8  ;;  %vm11234_vm0 = vmand %vm267_vm11, %vm347_vm5  ;;  %v4155_v2 = vand.u32 4294901760, %v4154_v6  ;;  %vm243_vm5 = vcmp.ge.s32.totalorder %v11170_v31, %v10308_v23  ;;  %v11275_v8 = vsub.f32 %v483_v44, %v483_v44 }
 0x3e7   : > { %5596 = vmatpush.msk.msrb.mxu3 %vm10850_vm1, %v5886_v9  ;;  %5603 = vmatpush.msk.msrb.mxu0 %vm11049_vm6, %v5886_v9  ;;  %vm259_vm1 = vcmp.ge.s32.totalorder %v11170_v31, %v10282_v46  ;;  %vm331_vm6 = vcmp.lt.s32.totalorder %v11170_v31, %v10293_v7  ;;  %v475_v14 = vsel %vm11234_vm0, 1.0, %v12813_v12 }
 0x3e8   : > { %4042 = vmatpush.msrb.mxu2 %v13300_v32  ;;  %4141 = vmatpush.msrb.mxu1 %v4140_v37  ;;  %v13308_v37 = vand.u32 4294901760, %v10863_v36  ;;  %vm11262_vm11 = vmand %vm251_vm13, %vm331_vm6  ;;  %v13311_v36 = vand.u32 4294901760, %v10998_v19  ;;  %vm315_vm13 = vcmp.lt.s32.totalorder %v11170_v31, %v10337_v48 }
 0x3e9   : > { %5597 = vmatpush.msk.msrb.mxu3 %vm10868_vm7, %v5886_v9  ;;  %5604 = vmatpush.msk.msrb.mxu0 %vm11086_vm14, %v5886_v9  ;;  %vm11249_vm7 = vmand %vm259_vm1, %vm339_vm8  ;;  %v13310_v22 = vsel %vm11262_vm11, 4294967295, %v13309_v22  ;;  %vm323_vm1 = vcmp.lt.s32.totalorder %v11170_v31, %v10310_v5  ;;  %v459_v6 = vsel %vm11262_vm11, 1.0, %v12813_v12  ;;  %vm235_vm8 = vcmp.ge.s32.totalorder %v11170_v31, %v10327_v55 }
 0x3ea   : > { %4045 = vmatpush.msrb.mxu2 %v13303_v26  ;;  %4146 = vmatpush.msrb.mxu1 %v4145_v63  ;;  %v467_v0 = vsel %vm11249_vm7, 1.0, %v12813_v12  ;;  %v11286_v63 = vsub.f32 %v475_v14, %v475_v14  ;;  %vm11291_vm6 = vmand %vm243_vm5, %vm323_vm1  ;;  %vm307_vm1 = vcmp.lt.s32.totalorder %v11170_v31, %v10360_v11  ;;  %v13316_v26 = vand.u32 4294901760, %v10907_v54 }
 0x3eb   : > { %4080 = vmatmul.f32.vlgmr.msrb.gmra.mxu3 %v10728_v18  ;;  %5605 = vmatpush.msk.msrb.mxu0 %vm11104_vm12, %v5886_v9  ;;  %v11321_v44 = vsub.f32 %v459_v6, %v459_v6  ;;  %v451_v54 = vsel %vm11291_vm6, 1.0, %v12813_v12  ;;  %vm219_vm5 = vcmp.ge.s32.totalorder %v11170_v31, %v10407_v47  ;;  %vm299_vm11 = vcmp.lt.s32.totalorder %v11170_v31, %v10425_v40 }
 0x3ec   : > { %5606 = vmatpush.msk.msra.mxu3 %vm10943_vm9, %v5886_v9  ;;  %4048 = vmatpush.msrb.mxu2 %v13308_v37  ;;  %v13320_v14 = vand.u32 4294901760, %v10920_v62  ;;  %v4312_v34 = vand.u32 4294901760, %v11286_v63 }
 0x3ed   : > { %4151 = vmatpush.msrb.mxu1 %v4150_v53  ;;  %4105 = vmatmul.f32.vlgmr.msrb.gmra.mxu0 %v10795_v60  ;;  %v11304_v53 = vsub.f32 %v467_v0, %v467_v0  ;;  %v11358_v0 = vsub.f32 %v451_v54, %v451_v54 }
 0x3ee   : > { %5607 = vmatpush.msk.msra.mxu3 %vm13297_vm15, %v5886_v9  ;;  %4225 = vmatpush.msra.mxu0 %v13311_v36 }
 0x3ef   : > { %4051 = vmatpush.msrb.mxu2 %v13312_v57  ;;  %4156 = vmatpush.msrb.mxu1 %v4155_v2  ;;  %v4307_v2 = vand.u32 4294901760, %v11275_v8  ;;  %v12634_v62 = vand.u32 4294901760, %v11304_v53 }
 0x3f0   : > { %4158 = vmatmul.f32.vlgmr.msrb.gmra.mxu1 %v10728_v18  ;;  %5608 = vmatpush.msk.msra.mxu3 %vm13298_vm2, %v5886_v9 }
 0x3f1   : > { %4228 = vmatpush.msra.mxu0 %v13315_v49  ;;  %5614 = vmatpush.msk.msra.mxu1 %vm10943_vm9, %v5886_v9  ;;  %vm11326_vm9 = vmand %vm235_vm8, %vm315_vm13  ;;  %v4313_v49 = vsub.f32 %v11286_v63, %v4312_v34 }
 0x3f2   : > { %4054 = vmatpush.msrb.mxu2 %v13316_v26  ;;  %5609 = vmatpush.msk.msra.mxu3 %vm11011_vm3, %v5886_v9  ;;  %v443_v57 = vsel %vm11326_vm9, 1.0, %v12813_v12  ;;  %vm11363_vm13 = vmand %vm219_vm5, %vm299_vm11  ;;  %v11384_v26 = vadd.s32 640, %v13225_v24 }
 0x3f3   : > { %4231 = vmatpush.msra.mxu0 %v13317_v3  ;;  %5615 = vmatpush.msk.msra.mxu1 %vm13297_vm15, %v5886_v9  ;;  %vm13321_vm15 = vcmp.ge.s32.totalorder %v11170_v31, %v10347_v16  ;;  %v4308_v31 = vsub.f32 %v11275_v8, %v4307_v2  ;;  %v11394_v50 = vsub.f32 %v443_v57, %v443_v57  ;;  %v427_v3 = vsel %vm11363_vm13, 1.0, %v12813_v12 }
 0x3f4   : > { %4057 = vmatpush.msrb.mxu2 %v13320_v14  ;;  %5610 = vmatpush.msk.msra.mxu3 %vm13299_vm4, %v5886_v9  ;;  %vm11343_vm8 = vmand %vm13321_vm15, %vm307_vm1  ;;  %vm13326_vm1 = vnez %v13292_v58  ;;  %v12631_v14 = vand.u32 4294901760, %v11358_v0  ;;  %v4314_v4 = vand.u32 4294901760, %v4313_v49  ;;  %vm348_vm11 = vcmp.lt.s32.totalorder %v11384_v26, %v10278_v52 }
 0x3f5   : > { %4059 = vmatmul.f32.vlgmr.msrb.gmra.mxu2 %v10728_v18  ;;  %4234 = vmatpush.msra.mxu0 %v4133_v25  ;;  %v435_v6 = vsel %vm11343_vm8, 1.0, %v12813_v12  ;;  %v4309_v54 = vand.u32 4294901760, %v4308_v31  ;;  %v11418_v31 = vsub.f32 %v427_v3, %v427_v3  ;;  %vm260_vm15 = vcmp.ge.s32.totalorder %v11384_v26, %v10282_v46 }
 0x3f6   : > { %4171 = vmatpush.msra.mxu2 %v10998_v19  ;;  %5616 = vmatpush.msk.msra.mxu1 %vm13298_vm2, %v5886_v9  ;;  %v12632_v19 = vand.u32 4294901760, %v11321_v44  ;;  %vm356_vm2 = vcmp.lt.s32.totalorder %v11384_v26, %v10271_v45  ;;  %v4328_v58 = vsub.f32 %v11358_v0, %v12631_v14 }
 0x3f7   : > { %5611 = vmatpush.msk.msra.mxu3 %vm13326_vm1, %v5886_v9  ;;  %4237 = vmatpush.msra.mxu0 %v13327_v39  ;;  %v12624_v39 = vand.u32 4294901760, %v11418_v31 }
 0x3f8   : > { %4173 = vmatpush.msra.mxu2 %v11019_v27  ;;  %5617 = vmatpush.msk.msra.mxu1 %vm11011_vm3, %v5886_v9  ;;  %v4318_v27 = vsub.f32 %v11304_v53, %v12634_v62  ;;  %vm276_vm3 = vcmp.ge.s32.totalorder %v11384_v26, %v10269_v30 }
 0x3f9   : > { %5612 = vmatpush.msk.msra.mxu3 %vm11086_vm14, %v5886_v9  ;;  %4240 = vmatpush.msra.mxu0 %v4143_v61  ;;  %v11404_v61 = vsub.f32 %v435_v6, %v435_v6  ;;  %vm11441_vm5 = vmand %vm276_vm3, %vm356_vm2  ;;  %v13330_v6 = vmov 0  ;;  %vm332_vm3 = vcmp.lt.s32.totalorder %v11384_v26, %v10293_v7 }
 0x3fa   : > { %4175 = vmatpush.msra.mxu2 %v11047_v35  ;;  %5618 = vmatpush.msk.msra.mxu1 %vm13299_vm4, %v5886_v9  ;;  %v4323_v35 = vsub.f32 %v11321_v44, %v12632_v19  ;;  %vm268_vm4 = vcmp.ge.s32.totalorder %v11384_v26, %v10276_v59  ;;  %v484_v49 = vsel %vm11441_vm5, 1.0, %v12813_v12 }
 0x3fb   : > { %5613 = vmatpush.msk.msra.mxu3 %vm11104_vm12, %v5886_v9  ;;  %4243 = vmatpush.msra.mxu0 %v4148_v1  ;;  %v4319_v1 = vand.u32 4294901760, %v4318_v27  ;;  %v12627_v57 = vand.u32 4294901760, %v11404_v61  ;;  %v4343_v27 = vsub.f32 %v11418_v31, %v12624_v39 }
 0x3fc   : > { %4177 = vmatpush.msra.mxu2 %v11068_v33  ;;  %5619 = vmatpush.msk.msra.mxu1 %vm13326_vm1, %v5886_v9  ;;  %v12628_v33 = vand.u32 4294901760, %v11394_v50  ;;  %vm340_vm1 = vcmp.lt.s32.totalorder %v11384_v26, %v10284_v51 }
 0x3fd   : > { %4211 = vmatmul.f32.vlgmr.msra.gmra.mxu3 %v10763_v56  ;;  %4246 = vmatpush.msra.mxu0 %v4153_v20  ;;  %v4324_v20 = vand.u32 4294901760, %v4323_v35  ;;  %v4338_v43 = vsub.f32 %v11404_v61, %v12627_v57  ;;  %vm11487_vm2 = vmand %vm260_vm15, %vm340_vm1  ;;  %v11495_v35 = vsub.f32 %v484_v49, %v484_v49  ;;  %vm236_vm1 = vcmp.ge.s32.totalorder %v11384_v26, %v10327_v55 }
 0x3fe   : > { %4310 = vmatpush.msrb.mxu3 %v4309_v54  ;;  %4179 = vmatpush.msra.mxu2 %v11095_v17  ;;  %v4333_v10 = vsub.f32 %v11394_v50, %v12628_v33 }
 0x3ff   : > { %5620 = vmatpush.msk.msra.mxu1 %vm11086_vm14, %v5886_v9  ;;  %4248 = vmatmul.f32.vlgmr.msra.gmra.mxu0 %v10728_v18  ;;  %vm11454_vm14 = vmand %vm268_vm4, %vm348_vm11  ;;  %vm244_vm4 = vcmp.ge.s32.totalorder %v11384_v26, %v10308_v23  ;;  %vm324_vm11 = vcmp.lt.s32.totalorder %v11384_v26, %v10310_v5 }
 0x400   : > { %4315 = vmatpush.msrb.mxu3 %v4314_v4  ;;  %4360 = vmatpush.msrb.mxu0 %v11275_v8  ;;  %v13331_v6 = vsel %vm11454_vm14, 4294967295, %v13330_v6  ;;  %v476_v3 = vsel %vm11454_vm14, 1.0, %v12813_v12  ;;  %v4339_v4 = vand.u32 4294901760, %v4338_v43  ;;  %vm316_vm14 = vcmp.lt.s32.totalorder %v11384_v26, %v10337_v48 }
 0x401   : > { %4181 = vmatpush.msra.mxu2 %v11113_v13  ;;  %5621 = vmatpush.msk.msra.mxu1 %vm11104_vm12, %v5886_v9  ;;  %v4329_v13 = vand.u32 4294901760, %v4328_v58  ;;  %vm252_vm12 = vcmp.ge.s32.totalorder %v11384_v26, %v10291_v21  ;;  %v11514_v58 = vsub.f32 %v476_v3, %v476_v3  ;;  %v13339_v3 = vmov 0 }
 0x402   : > { %4269 = vmatmul.f32.vlgmr.msra.gmra.mxu1 %v10728_v18  ;;  %4320 = vmatpush.msrb.mxu3 %v4319_v1  ;;  %vm11508_vm15 = vmand %vm252_vm12, %vm332_vm3  ;;  %v13334_v1 = vmov 0  ;;  %vm13338_vm3 = vnez %v13310_v22 }
 0x403   : > { %4362 = vmatpush.msrb.mxu0 %v11286_v63  ;;  %5630 = vmatpush.msk.msrb.mxu1 %vm11218_vm10, %v5886_v9  ;;  %v13335_v1 = vsel %vm11508_vm15, 4294967295, %v13334_v1  ;;  %vm11529_vm12 = vmand %vm244_vm4, %vm324_vm11  ;;  %v460_v43 = vsel %vm11508_vm15, 1.0, %v12813_v12  ;;  %vm228_vm11 = vcmp.ge.s32.totalorder %v11384_v26, %v10347_v16  ;;  %vm308_vm15 = vcmp.lt.s32.totalorder %v11384_v26, %v10360_v11 }
 0x404   : > { %4183 = vmatpush.msra.mxu2 %v11141_v41  ;;  %4325 = vmatpush.msrb.mxu3 %v4324_v20  ;;  %v4334_v41 = vand.u32 4294901760, %v4333_v10  ;;  %v13336_v20 = vmov 0  ;;  %v4344_v10 = vand.u32 4294901760, %v4343_v27  ;;  %vm11546_vm4 = vmand %vm236_vm1, %vm316_vm14  ;;  %v12630_v27 = vand.u32 4294901760, %v11514_v58 }
 0x405   : > { %4364 = vmatpush.msrb.mxu0 %v11304_v53  ;;  %5631 = vmatpush.msk.msrb.mxu1 %vm11234_vm0, %v5886_v9  ;;  %v13337_v20 = vsel %vm11529_vm12, 4294967295, %v13336_v20  ;;  %v13340_v3 = vsel %vm11546_vm4, 4294967295, %v13339_v3  ;;  %vm220_vm14 = vcmp.ge.s32.totalorder %v11384_v26, %v10407_v47  ;;  %vm300_vm1 = vcmp.lt.s32.totalorder %v11384_v26, %v10425_v40 }
 0x406   : > { %4185 = vmatpush.msra.mxu2 %v11154_v15  ;;  %4330 = vmatpush.msrb.mxu3 %v4329_v13  ;;  %v468_v15 = vsel %vm11487_vm2, 1.0, %v12813_v12  ;;  %v12629_v13 = vand.u32 4294901760, %v11495_v35  ;;  %v444_v39 = vsel %vm11546_vm4, 1.0, %v12813_v12  ;;  %v4502_v26 = vsub.f32 %v11514_v58, %v12630_v27 }
 0x407   : > { %4188 = vmatmul.f32.vlgmr.msra.gmra.mxu2 %v10742_v42  ;;  %4366 = vmatpush.msrb.mxu0 %v11321_v44  ;;  %v11544_v49 = vsub.f32 %v468_v15, %v468_v15  ;;  %v11565_v15 = vsub.f32 %v460_v43, %v460_v43  ;;  %v13348_v63 = vand.u32 4294901760, %v11304_v53 }
 0x408   : > { %5622 = vmatpush.msk.msrb.mxu2 %vm11218_vm10, %v5886_v9  ;;  %5632 = vmatpush.msk.msrb.mxu1 %vm11249_vm7, %v5886_v9  ;;  %v4503_v29 = vand.u32 4294901760, %v4502_v26 }
 0x409   : > { %4335 = vmatpush.msrb.mxu3 %v4334_v41  ;;  %4368 = vmatpush.msrb.mxu0 %v11358_v0  ;;  %v452_v41 = vsel %vm11529_vm12, 1.0, %v12813_v12  ;;  %vm11581_vm12 = vmand %vm228_vm11, %vm308_vm15  ;;  %v13365_v17 = vand.u32 4294901760, %v11544_v49 }
 0x40a   : > { %5623 = vmatpush.msk.msrb.mxu2 %vm11234_vm0, %v5886_v9  ;;  %5633 = vmatpush.msk.msrb.mxu1 %vm13338_vm3, %v5886_v9  ;;  %v11592_v57 = vsub.f32 %v452_v41, %v452_v41  ;;  %vm11599_vm15 = vmand %vm220_vm14, %vm300_vm1  ;;  %v4511_v41 = vand.u32 4294901760, %v11565_v15  ;;  %v436_v27 = vsel %vm11581_vm12, 1.0, %v12813_v12 }
 0x40b   : > { %4340 = vmatpush.msrb.mxu3 %v4339_v4  ;;  %4370 = vmatpush.msrb.mxu0 %v11394_v50  ;;  %v4497_v4 = vsub.f32 %v11495_v35, %v12629_v13  ;;  %v11610_v13 = vsub.f32 %v444_v39, %v444_v39  ;;  %v428_v19 = vsel %vm11599_vm15, 1.0, %v12813_v12 }
 0x40c   : > { %5624 = vmatpush.msk.msrb.mxu2 %vm11249_vm7, %v5886_v9  ;;  %5634 = vmatpush.msk.msrb.mxu1 %vm11291_vm6, %v5886_v9  ;;  %v12635_v14 = vand.u32 4294901760, %v11592_v57  ;;  %v11651_v26 = vsub.f32 %v428_v19, %v428_v19  ;;  %v13375_v54 = vand.u32 4294901760, %v11592_v57 }
 0x40d   : > { %4345 = vmatpush.msrb.mxu3 %v4344_v10  ;;  %4372 = vmatpush.msrb.mxu0 %v11404_v61  ;;  %v12633_v10 = vand.u32 4294901760, %v11544_v49  ;;  %v4498_v28 = vand.u32 4294901760, %v4497_v4  ;;  %v11638_v4 = vsub.f32 %v436_v27, %v436_v27  ;;  %v4521_v62 = vand.u32 4294901760, %v11610_v13 }
 0x40e   : > { %5625 = vmatpush.msk.msrb.mxu2 %vm13338_vm3, %v5886_v9  ;;  %5635 = vmatpush.msk.msrb.mxu1 %vm11326_vm9, %v5886_v9  ;;  %v4517_v27 = vsub.f32 %v11592_v57, %v12635_v14 }
 0x40f   : > { %4347 = vmatmul.f32.vlgmr.msrb.gmra.mxu3 %v10728_v18  ;;  %4374 = vmatpush.msrb.mxu0 %v11418_v31  ;;  %v4507_v39 = vsub.f32 %v11544_v49, %v12633_v10  ;;  %v4512_v10 = vsub.f32 %v11565_v15, %v4511_v41  ;;  %v4526_v19 = vand.u32 4294901760, %v11638_v4 }
 0x410   : > { %5638 = vmatpush.msk.msra.mxu3 %vm11218_vm10, %v5886_v9  ;;  %5626 = vmatpush.msk.msrb.mxu2 %vm11291_vm6, %v5886_v9  ;;  %vm13345_vm10 = vnez %v13331_v6  ;;  %v4518_v14 = vand.u32 4294901760, %v4517_v27  ;;  %v13357_v27 = vmov 0 }
 0x411   : > { %5636 = vmatpush.msk.msrb.mxu1 %vm11343_vm8, %v5886_v9  ;;  %4377 = vmatmul.f32.vlgmr.msrb.gmra.mxu0 %v10742_v42  ;;  %v4508_v38 = vand.u32 4294901760, %v4507_v39  ;;  %v4513_v22 = vand.u32 4294901760, %v4512_v10  ;;  %v4522_v39 = vsub.f32 %v11610_v13, %v4521_v62  ;;  %v4527_v32 = vsub.f32 %v11638_v4, %v4526_v19 }
 0x412   : > { %5639 = vmatpush.msk.msra.mxu3 %vm11234_vm0, %v5886_v9  ;;  %5646 = vmatpush.msk.msra.mxu0 %vm11441_vm5, %v5886_v9  ;;  %vm13346_vm0 = vnez %v13335_v1  ;;  %v13356_v10 = vand.u32 4294901760, %v11358_v0  ;;  %v13359_v0 = vand.u32 4294901760, %v11495_v35 }
 0x413   : > { %5627 = vmatpush.msk.msrb.mxu2 %vm11326_vm9, %v5886_v9  ;;  %5637 = vmatpush.msk.msrb.mxu1 %vm11363_vm13, %v5886_v9  ;;  %v4523_v8 = vand.u32 4294901760, %v4522_v39  ;;  %v4528_v53 = vand.u32 4294901760, %v4527_v32  ;;  %v13360_v32 = vand.u32 4294901760, %v11394_v50  ;;  %v13363_v50 = vand.u32 4294901760, %v11514_v58 }
 0x414   : > { %4400 = vmatmul.f32.vlgmr.msrb.gmra.mxu1 %v10763_v56  ;;  %5640 = vmatpush.msk.msra.mxu3 %vm11249_vm7, %v5886_v9  ;;  %vm13347_vm7 = vnez %v13337_v20 }
 0x415   : > { %5647 = vmatpush.msk.msra.mxu0 %vm13345_vm10, %v5886_v9  ;;  %4499 = vmatpush.msra.mxu1 %v4498_v28  ;;  %v11667_v28 = vadd.s32 768, %v13225_v24 }
 0x416   : > { %5628 = vmatpush.msk.msrb.mxu2 %vm11343_vm8, %v5886_v9  ;;  %5641 = vmatpush.msk.msra.mxu3 %vm13338_vm3, %v5886_v9 }
 0x417   : > { %5648 = vmatpush.msk.msra.mxu0 %vm11487_vm2, %v5886_v9  ;;  %4504 = vmatpush.msra.mxu1 %v4503_v29  ;;  %v4531_v29 = vand.u32 4294901760, %v11651_v26  ;;  %vm357_vm3 = vcmp.lt.s32.totalorder %v11667_v28, %v10271_v45  ;;  %vm349_vm11 = vcmp.lt.s32.totalorder %v11667_v28, %v10278_v52  ;;  %vm341_vm1 = vcmp.lt.s32.totalorder %v11667_v28, %v10284_v51 }
 0x418   : > { %5629 = vmatpush.msk.msrb.mxu2 %vm11363_vm13, %v5886_v9  ;;  %5642 = vmatpush.msk.msra.mxu3 %vm11291_vm6, %v5886_v9  ;;  %vm277_vm6 = vcmp.ge.s32.totalorder %v11667_v28, %v10269_v30 }
 0x419   : > { %4294 = vmatmul.f32.vlgmr.msrb.gmra.mxu2 %v10795_v60  ;;  %5649 = vmatpush.msk.msra.mxu0 %vm13346_vm0, %v5886_v9  ;;  %vm11715_vm14 = vmand %vm277_vm6, %vm357_vm3  ;;  %vm253_vm3 = vcmp.ge.s32.totalorder %v11667_v28, %v10291_v21 }
 0x41a   : > { %4414 = vmatpush.msra.mxu2 %v4307_v2  ;;  %4509 = vmatpush.msra.mxu1 %v4508_v38  ;;  %v4532_v2 = vsub.f32 %v11651_v26, %v4531_v29 }
 0x41b   : > { %5643 = vmatpush.msk.msra.mxu3 %vm11326_vm9, %v5886_v9  ;;  %5650 = vmatpush.msk.msra.mxu0 %vm13347_vm7, %v5886_v9  ;;  %vm269_vm9 = vcmp.ge.s32.totalorder %v11667_v28, %v10276_v59 }
 0x41c   : > { %4417 = vmatpush.msra.mxu2 %v4312_v34  ;;  %4514 = vmatpush.msra.mxu1 %v4513_v22  ;;  %v13351_v34 = vand.u32 4294901760, %v11321_v44  ;;  %vm11731_vm6 = vmand %vm269_vm9, %vm349_vm11  ;;  %v4533_v25 = vand.u32 4294901760, %v4532_v2  ;;  %v485_v44 = vsel %vm11715_vm14, 1.0, %v12813_v12  ;;  %vm245_vm11 = vcmp.ge.s32.totalorder %v11667_v28, %v10308_v23 }
 0x41d   : > { %5644 = vmatpush.msk.msra.mxu3 %vm11343_vm8, %v5886_v9  ;;  %5651 = vmatpush.msk.msra.mxu0 %vm11546_vm4, %v5886_v9  ;;  %vm261_vm8 = vcmp.ge.s32.totalorder %v11667_v28, %v10282_v46  ;;  %vm333_vm4 = vcmp.lt.s32.totalorder %v11667_v28, %v10293_v7  ;;  %v477_v38 = vsel %vm11731_vm6, 1.0, %v12813_v12  ;;  %v11772_v22 = vsub.f32 %v485_v44, %v485_v44 }
 0x41e   : > { %4420 = vmatpush.msra.mxu2 %v13348_v63  ;;  %4519 = vmatpush.msra.mxu1 %v4518_v14  ;;  %vm11759_vm9 = vmand %vm253_vm3, %vm333_vm4  ;;  %vm317_vm3 = vcmp.lt.s32.totalorder %v11667_v28, %v10337_v48 }
 0x41f   : > { %5645 = vmatpush.msk.msra.mxu3 %vm11363_vm13, %v5886_v9  ;;  %5652 = vmatpush.msk.msra.mxu0 %vm11581_vm12, %v5886_v9  ;;  %vm11746_vm13 = vmand %vm261_vm8, %vm341_vm1  ;;  %v13358_v27 = vsel %vm11759_vm9, 4294967295, %v13357_v27  ;;  %vm325_vm8 = vcmp.lt.s32.totalorder %v11667_v28, %v10310_v5  ;;  %v461_v2 = vsel %vm11759_vm9, 1.0, %v12813_v12  ;;  %vm237_vm1 = vcmp.ge.s32.totalorder %v11667_v28, %v10327_v55 }
 0x420   : > { %4423 = vmatpush.msra.mxu2 %v13351_v34  ;;  %4524 = vmatpush.msra.mxu1 %v4523_v8  ;;  %v469_v39 = vsel %vm11746_vm13, 1.0, %v12813_v12  ;;  %v11783_v8 = vsub.f32 %v477_v38, %v477_v38  ;;  %vm11788_vm4 = vmand %vm245_vm11, %vm325_vm8  ;;  %vm309_vm8 = vcmp.lt.s32.totalorder %v11667_v28, %v10360_v11  ;;  %v13364_v34 = vand.u32 4294901760, %v11404_v61 }
 0x421   : > { %4458 = vmatmul.f32.vlgmr.msra.gmra.mxu3 %v10728_v18  ;;  %5653 = vmatpush.msk.msra.mxu0 %vm11599_vm15, %v5886_v9  ;;  %v11818_v44 = vsub.f32 %v461_v2, %v461_v2  ;;  %v453_v61 = vsel %vm11788_vm4, 1.0, %v12813_v12  ;;  %vm221_vm11 = vcmp.ge.s32.totalorder %v11667_v28, %v10407_v47  ;;  %vm301_vm9 = vcmp.lt.s32.totalorder %v11667_v28, %v10425_v40 }
 0x422   : > { %5654 = vmatpush.msk.msrb.mxu3 %vm11441_vm5, %v5886_v9  ;;  %4426 = vmatpush.msra.mxu2 %v13356_v10  ;;  %v13368_v38 = vand.u32 4294901760, %v11418_v31  ;;  %v4690_v6 = vand.u32 4294901760, %v11783_v8 }
 0x423   : > { %4529 = vmatpush.msra.mxu1 %v4528_v53  ;;  %4483 = vmatmul.f32.vlgmr.msra.gmra.mxu0 %v10795_v60  ;;  %v11801_v53 = vsub.f32 %v469_v39, %v469_v39  ;;  %v11855_v39 = vsub.f32 %v453_v61, %v453_v61 }
 0x424   : > { %5655 = vmatpush.msk.msrb.mxu3 %vm13345_vm10, %v5886_v9  ;;  %4603 = vmatpush.msrb.mxu0 %v13359_v0 }
 0x425   : > { %4429 = vmatpush.msra.mxu2 %v13360_v32  ;;  %4534 = vmatpush.msra.mxu1 %v4533_v25  ;;  %v4685_v25 = vand.u32 4294901760, %v11772_v22  ;;  %v4695_v31 = vand.u32 4294901760, %v11801_v53  ;;  %v4705_v61 = vand.u32 4294901760, %v11855_v39 }
 0x426   : > { %4536 = vmatmul.f32.vlgmr.msra.gmra.mxu1 %v10728_v18  ;;  %5656 = vmatpush.msk.msrb.mxu3 %vm11487_vm2, %v5886_v9 }
 0x427   : > { %4606 = vmatpush.msrb.mxu0 %v13363_v50  ;;  %5662 = vmatpush.msk.msrb.mxu1 %vm11441_vm5, %v5886_v9  ;;  %vm11823_vm5 = vmand %vm237_vm1, %vm317_vm3  ;;  %v4691_v50 = vsub.f32 %v11783_v8, %v4690_v6 }
 0x428   : > { %4432 = vmatpush.msra.mxu2 %v13364_v34  ;;  %5657 = vmatpush.msk.msrb.mxu3 %vm13346_vm0, %v5886_v9  ;;  %v445_v32 = vsel %vm11823_vm5, 1.0, %v12813_v12  ;;  %vm11860_vm3 = vmand %vm221_vm11, %vm301_vm9  ;;  %v11881_v34 = vadd.s32 896, %v13225_v24 }
 0x429   : > { %4609 = vmatpush.msrb.mxu0 %v13365_v17  ;;  %5663 = vmatpush.msk.msrb.mxu1 %vm13345_vm10, %v5886_v9  ;;  %vm13369_vm10 = vcmp.ge.s32.totalorder %v11667_v28, %v10347_v16  ;;  %v4686_v28 = vsub.f32 %v11772_v22, %v4685_v25  ;;  %v11891_v1 = vsub.f32 %v445_v32, %v445_v32  ;;  %v429_v17 = vsel %vm11860_vm3, 1.0, %v12813_v12 }
 0x42a   : > { %4435 = vmatpush.msra.mxu2 %v13368_v38  ;;  %5658 = vmatpush.msk.msrb.mxu3 %vm13347_vm7, %v5886_v9  ;;  %vm11840_vm1 = vmand %vm13369_vm10, %vm309_vm8  ;;  %vm13374_vm8 = vnez %v13340_v3  ;;  %v4692_v20 = vand.u32 4294901760, %v4691_v50  ;;  %v11915_v38 = vsub.f32 %v429_v17, %v429_v17  ;;  %v4706_v3 = vsub.f32 %v11855_v39, %v4705_v61 }
 0x42b   : > { %4437 = vmatmul.f32.vlgmr.msra.gmra.mxu2 %v10728_v18  ;;  %4612 = vmatpush.msrb.mxu0 %v4511_v41  ;;  %v437_v2 = vsel %vm11840_vm1, 1.0, %v12813_v12  ;;  %v4687_v24 = vand.u32 4294901760, %v4686_v28  ;;  %vm350_vm9 = vcmp.lt.s32.totalorder %v11881_v34, %v10278_v52  ;;  %v13378_v52 = vmov 0 }
 0x42c   : > { %4549 = vmatpush.msrb.mxu2 %v11495_v35  ;;  %5664 = vmatpush.msk.msrb.mxu1 %vm11487_vm2, %v5886_v9  ;;  %v4700_v35 = vand.u32 4294901760, %v11818_v44  ;;  %vm278_vm2 = vcmp.ge.s32.totalorder %v11881_v34, %v10269_v30  ;;  %vm262_vm10 = vcmp.ge.s32.totalorder %v11881_v34, %v10282_v46 }
 0x42d   : > { %5659 = vmatpush.msk.msrb.mxu3 %vm13374_vm8, %v5886_v9  ;;  %4615 = vmatpush.msrb.mxu0 %v13375_v54 }
 0x42e   : > { %4551 = vmatpush.msrb.mxu2 %v11514_v58  ;;  %5665 = vmatpush.msk.msrb.mxu1 %vm13346_vm0, %v5886_v9  ;;  %v4696_v58 = vsub.f32 %v11801_v53, %v4695_v31  ;;  %vm358_vm0 = vcmp.lt.s32.totalorder %v11881_v34, %v10271_v45 }
 0x42f   : > { %5660 = vmatpush.msk.msrb.mxu3 %vm11581_vm12, %v5886_v9  ;;  %4618 = vmatpush.msrb.mxu0 %v4521_v62  ;;  %v11901_v62 = vsub.f32 %v437_v2, %v437_v2  ;;  %vm11938_vm11 = vmand %vm278_vm2, %vm358_vm0  ;;  %vm334_vm2 = vcmp.lt.s32.totalorder %v11881_v34, %v10293_v7  ;;  %v13382_v2 = vmov 0 }
 0x430   : > { %4553 = vmatpush.msrb.mxu2 %v11544_v49  ;;  %5666 = vmatpush.msk.msrb.mxu1 %vm13347_vm7, %v5886_v9  ;;  %v4701_v49 = vsub.f32 %v11818_v44, %v4700_v35  ;;  %vm270_vm7 = vcmp.ge.s32.totalorder %v11881_v34, %v10276_v59  ;;  %v486_v43 = vsel %vm11938_vm11, 1.0, %v12813_v12 }
 0x431   : > { %5661 = vmatpush.msk.msrb.mxu3 %vm11599_vm15, %v5886_v9  ;;  %4621 = vmatpush.msrb.mxu0 %v4526_v19  ;;  %v4697_v19 = vand.u32 4294901760, %v4696_v58  ;;  %v4715_v30 = vand.u32 4294901760, %v11901_v62  ;;  %v11992_v54 = vsub.f32 %v486_v43, %v486_v43 }
 0x432   : > { %4555 = vmatpush.msrb.mxu2 %v11565_v15  ;;  %5667 = vmatpush.msk.msrb.mxu1 %vm13374_vm8, %v5886_v9  ;;  %v4710_v15 = vand.u32 4294901760, %v11891_v1  ;;  %vm342_vm8 = vcmp.lt.s32.totalorder %v11881_v34, %v10284_v51 }
 0x433   : > { %4589 = vmatmul.f32.vlgmr.msrb.gmra.mxu3 %v10763_v56  ;;  %4624 = vmatpush.msrb.mxu0 %v4531_v29  ;;  %v4720_v29 = vand.u32 4294901760, %v11915_v38  ;;  %v4716_v33 = vsub.f32 %v11901_v62, %v4715_v30  ;;  %vm11984_vm0 = vmand %vm262_vm10, %vm342_vm8  ;;  %vm238_vm8 = vcmp.ge.s32.totalorder %v11881_v34, %v10327_v55 }
 0x434   : > { %4688 = vmatpush.msra.mxu3 %v4687_v24  ;;  %4557 = vmatpush.msrb.mxu2 %v11592_v57  ;;  %v4702_v57 = vand.u32 4294901760, %v4701_v49  ;;  %v4711_v59 = vsub.f32 %v11891_v1, %v4710_v15 }
 0x435   : > { %5668 = vmatpush.msk.msrb.mxu1 %vm11581_vm12, %v5886_v9  ;;  %4626 = vmatmul.f32.vlgmr.msrb.gmra.mxu0 %v10728_v18  ;;  %vm11951_vm12 = vmand %vm270_vm7, %vm350_vm9  ;;  %v4721_v51 = vsub.f32 %v11915_v38, %v4720_v29  ;;  %vm246_vm7 = vcmp.ge.s32.totalorder %v11881_v34, %v10308_v23  ;;  %vm326_vm9 = vcmp.lt.s32.totalorder %v11881_v34, %v10310_v5  ;;  %v4717_v46 = vand.u32 4294901760, %v4716_v33 }
 0x436   : > { %4693 = vmatpush.msra.mxu3 %v4692_v20  ;;  %4738 = vmatpush.msra.mxu0 %v11772_v22  ;;  %v13379_v52 = vsel %vm11951_vm12, 4294967295, %v13378_v52  ;;  %v478_v28 = vsel %vm11951_vm12, 1.0, %v12813_v12  ;;  %v470_v5 = vsel %vm11984_vm0, 1.0, %v12813_v12  ;;  %vm318_vm12 = vcmp.lt.s32.totalorder %v11881_v34, %v10337_v48 }
 0x437   : > { %4559 = vmatpush.msrb.mxu2 %v11610_v13  ;;  %5669 = vmatpush.msk.msrb.mxu1 %vm11599_vm15, %v5886_v9  ;;  %v4707_v13 = vand.u32 4294901760, %v4706_v3  ;;  %vm254_vm15 = vcmp.ge.s32.totalorder %v11881_v34, %v10291_v21  ;;  %v12011_v23 = vsub.f32 %v478_v28, %v478_v28  ;;  %v4722_v7 = vand.u32 4294901760, %v4721_v51  ;;  %v3592_v17 = vpop.f32.mrf.mxu3 }
 0x438   : > { %4647 = vmatmul.f32.vlgmr.msrb.gmra.mxu1 %v10728_v18  ;;  %4698 = vmatpush.msra.mxu3 %v4697_v19  ;;  %vm12005_vm10 = vmand %vm254_vm15, %vm334_vm2  ;;  %vm13386_vm2 = vnez %v13358_v27  ;;  %v12041_v58 = vsub.f32 %v470_v5, %v470_v5 }
 0x439   : > { %4740 = vmatpush.msra.mxu0 %v11783_v8  ;;  %5678 = vmatpush.msk.msra.mxu1 %vm11715_vm14, %v5886_v9  ;;  %v13383_v2 = vsel %vm12005_vm10, 4294967295, %v13382_v2  ;;  %vm12026_vm15 = vmand %vm246_vm7, %vm326_vm9  ;;  %v462_v48 = vsel %vm12005_vm10, 1.0, %v12813_v12  ;;  %vm230_vm9 = vcmp.ge.s32.totalorder %v11881_v34, %v10347_v16  ;;  %vm310_vm10 = vcmp.lt.s32.totalorder %v11881_v34, %v10360_v11  ;;  %v5781_v11 = vld [vmem:[%s5999_s30 + $0x18] sm:$0xff] }
 0x43a   : > { %4561 = vmatpush.msrb.mxu2 %v11638_v4  ;;  %4703 = vmatpush.msra.mxu3 %v4702_v57  ;;  %v4712_v4 = vand.u32 4294901760, %v4711_v59  ;;  %vm12046_vm7 = vmand %vm238_vm8, %vm318_vm12  ;;  %v4879_v49 = vand.u32 4294901760, %v12011_v23  ;;  %v454_v20 = vsel %vm12026_vm15, 1.0, %v12813_v12  ;;  %v12065_v19 = vsub.f32 %v462_v48, %v462_v48 }
 0x43b   : > { %4742 = vmatpush.msra.mxu0 %v11801_v53  ;;  %5679 = vmatpush.msk.msra.mxu1 %vm11731_vm6, %v5886_v9  ;;  %vm302_vm8 = vcmp.lt.s32.totalorder %v11881_v34, %v10425_v40  ;;  %v446_v57 = vsel %vm12046_vm7, 1.0, %v12813_v12  ;;  %vm12084_vm12 = vmand %vm230_vm9, %vm310_vm10  ;;  %v3622_v40 = vpop.f32.mrf.mxu0  ;;  %v12095_v33 = vsub.f32 %v454_v20, %v454_v20  ;;  %vm13391_vm10 = vcmp.ge.s32.totalorder %v11881_v34, %v10407_v47  ;;  %v3645_v34 = vpop.f32.mrf.mxu1 }
 0x43c   : > { %4563 = vmatpush.msrb.mxu2 %v11651_v26  ;;  %4708 = vmatpush.msra.mxu3 %v4707_v13  ;;  %v4874_v26 = vand.u32 4294901760, %v11992_v54  ;;  %v4884_v13 = vand.u32 4294901760, %v12041_v58  ;;  %v4880_v16 = vsub.f32 %v12011_v23, %v4879_v49  ;;  %vm12105_vm9 = vmand %vm13391_vm10, %vm302_vm8  ;;  %v4889_v51 = vand.u32 4294901760, %v12065_v19 }
 0x43d   : > { %4566 = vmatmul.f32.vlgmr.msrb.gmra.mxu2 %v10742_v42  ;;  %4744 = vmatpush.msra.mxu0 %v11818_v44  ;;  %v12116_v28 = vsub.f32 %v446_v57, %v446_v57  ;;  %v438_v47 = vsel %vm12084_vm12, 1.0, %v12813_v12  ;;  %v430_v5 = vsel %vm12105_vm9, 1.0, %v12813_v12 }
 0x43e   : > { %5670 = vmatpush.msk.msra.mxu2 %vm11715_vm14, %v5886_v9  ;;  %5680 = vmatpush.msk.msra.mxu1 %vm11746_vm13, %v5886_v9  ;;  %v4875_v3 = vsub.f32 %v11992_v54, %v4874_v26  ;;  %v4881_v36 = vand.u32 4294901760, %v4880_v16  ;;  %v4890_v12 = vsub.f32 %v12065_v19, %v4889_v51  ;;  %v12157_v20 = vsub.f32 %v430_v5, %v430_v5 }
 0x43f   : > { %4713 = vmatpush.msra.mxu3 %v4712_v4  ;;  %4746 = vmatpush.msra.mxu0 %v11855_v39  ;;  %v3539_v50 = vpop.f32.mrf.mxu2  ;;  %v4885_v4 = vsub.f32 %v12041_v58, %v4884_v13 }
 0x440   : > { %5671 = vmatpush.msk.msra.mxu2 %vm11731_vm6, %v5886_v9  ;;  %5681 = vmatpush.msk.msra.mxu1 %vm13386_vm2, %v5886_v9  ;;  %v3593_v55 = vadd.f32 %v3592_v17, %v3539_v50  ;;  %v4876_v37 = vand.u32 4294901760, %v4875_v3  ;;  %v4899_v50 = vand.u32 4294901760, %v12116_v28  ;;  %v3703_v57 = vpop.f32.mrf.mxu3  ;;  %v4891_v27 = vand.u32 4294901760, %v4890_v12 }
 0x441   : > { %4718 = vmatpush.msra.mxu3 %v4717_v46  ;;  %4748 = vmatpush.msra.mxu0 %v11891_v1  ;;  %v4894_v46 = vand.u32 4294901760, %v12095_v33  ;;  %v4886_v14 = vand.u32 4294901760, %v4885_v4  ;;  %v5779_v1 = vld [vmem:[%s5999_s30 + $0x8] sm:$0xff] }
 0x442   : > { %5672 = vmatpush.msk.msra.mxu2 %vm11746_vm13, %v5886_v9  ;;  %5682 = vmatpush.msk.msra.mxu1 %vm11788_vm4, %v5886_v9  ;;  %v3623_v43 = vadd.f32 %v3622_v40, %v3593_v55 }
 0x443   : > { %4723 = vmatpush.msra.mxu3 %v4722_v7  ;;  %4750 = vmatpush.msra.mxu0 %v11901_v62  ;;  %v12144_v7 = vsub.f32 %v438_v47, %v438_v47  ;;  %v4895_v3 = vsub.f32 %v12095_v33, %v4894_v46  ;;  %v3728_v47 = vpop.f32.mrf.mxu0 }
 0x444   : > { %5673 = vmatpush.msk.msra.mxu2 %vm13386_vm2, %v5886_v9  ;;  %5683 = vmatpush.msk.msra.mxu1 %vm11823_vm5, %v5886_v9  ;;  %v3646_v48 = vadd.f32 %v3645_v34, %v3623_v43  ;;  %v4900_v43 = vsub.f32 %v12116_v28, %v4899_v50  ;;  %v5778_v34 = vld [vmem:[%s5999_s30] sm:$0xff] }
 0x445   : > { %4725 = vmatmul.f32.vlgmr.msra.gmra.mxu3 %v10728_v18  ;;  %4752 = vmatpush.msra.mxu0 %v11915_v38  ;;  %v4904_v40 = vand.u32 4294901760, %v12144_v7  ;;  %v4896_v63 = vand.u32 4294901760, %v4895_v3 }
 0x446   : > { %5686 = vmatpush.msk.msrb.mxu3 %vm11715_vm14, %v5886_v9  ;;  %5674 = vmatpush.msk.msra.mxu2 %vm11788_vm4, %v5886_v9  ;;  %vm13394_vm14 = vnez %v13379_v52  ;;  %v4901_v22 = vand.u32 4294901760, %v4900_v43 }
 0x447   : > { %5684 = vmatpush.msk.msra.mxu1 %vm11840_vm1, %v5886_v9  ;;  %4755 = vmatmul.f32.vlgmr.msra.gmra.mxu0 %v10742_v42  ;;  %v4905_v5 = vsub.f32 %v12144_v7, %v4904_v40 }
 0x448   : > { %5687 = vmatpush.msk.msrb.mxu3 %vm11731_vm6, %v5886_v9  ;;  %5694 = vmatpush.msk.msrb.mxu0 %vm11938_vm11, %v5886_v9  ;;  %vm13395_vm6 = vnez %v13383_v2  ;;  %v5780_v2 = vld [vmem:[%s5999_s30 + $0x10] sm:$0xff] }
 0x449   : > { %5675 = vmatpush.msk.msra.mxu2 %vm11823_vm5, %v5886_v9  ;;  %5685 = vmatpush.msk.msra.mxu1 %vm11860_vm3, %v5886_v9  ;;  %v3682_v17 = vpop.f32.mrf.mxu2  ;;  %v4906_v10 = vand.u32 4294901760, %v4905_v5 }
 0x44a   : > { %4778 = vmatmul.f32.vlgmr.msra.gmra.mxu1 %v10763_v56  ;;  %5688 = vmatpush.msk.msrb.mxu3 %vm11746_vm13, %v5886_v9  ;;  %v3683_v55 = vadd.f32 %v3682_v17, %v3646_v48 }
 0x44b   : > { %5695 = vmatpush.msk.msrb.mxu0 %vm13394_vm14, %v5886_v9  ;;  %4877 = vmatpush.msrb.mxu1 %v4876_v37  ;;  %v4909_v37 = vand.u32 4294901760, %v12157_v20  ;;  %v3871_v44 = vpop.f32.mrf.mxu0 }
 0x44c   : > { %5676 = vmatpush.msk.msra.mxu2 %vm11840_vm1, %v5886_v9  ;;  %5689 = vmatpush.msk.msrb.mxu3 %vm13386_vm2, %v5886_v9  ;;  %v3704_v16 = vadd.f32 %v3703_v57, %v3683_v55  ;;  %v5782_v57 = vld [vmem:[%s5999_s30 + $0x20] sm:$0xff] }
 0x44d   : > { %5696 = vmatpush.msk.msrb.mxu0 %vm11984_vm0, %v5886_v9  ;;  %4882 = vmatpush.msrb.mxu1 %v4881_v36  ;;  %v3781_v36 = vpop.f32.mrf.mxu1 }
 0x44e   : > { %5677 = vmatpush.msk.msra.mxu2 %vm11860_vm3, %v5886_v9  ;;  %5690 = vmatpush.msk.msrb.mxu3 %vm11788_vm4, %v5886_v9  ;;  %v5029_v4 = vmul.f32 %v5778_v34, %v3704_v16  ;;  %v3782_v8 = vadd.f32 %v3781_v36, %v3728_v47 }
 0x44f   : > { %4672 = vmatmul.f32.vlgmr.msra.gmra.mxu2 %v10795_v60  ;;  %5697 = vmatpush.msk.msrb.mxu0 %vm13395_vm6, %v5886_v9 }
 0x450   : > { %4792 = vmatpush.msrb.mxu2 %v4685_v25  ;;  %4887 = vmatpush.msrb.mxu1 %v4886_v14  ;;  %5037 = vst [vmem:[%s12200_s6] sm:$0xff] %v5029_v4  ;;  %v4910_v25 = vsub.f32 %v12157_v20, %v4909_v37 }
 0x451   : > { %5691 = vmatpush.msk.msrb.mxu3 %vm11823_vm5, %v5886_v9  ;;  %5698 = vmatpush.msk.msrb.mxu0 %vm12026_vm15, %v5886_v9 }
 0x452   : > { %4795 = vmatpush.msrb.mxu2 %v4690_v6  ;;  %4892 = vmatpush.msrb.mxu1 %v4891_v27  ;;  %v4911_v53 = vand.u32 4294901760, %v4910_v25  ;;  %v5783_v25 = vld [vmem:[%s5999_s30 + $0x28] sm:$0xff] }
 0x453   : > { %5692 = vmatpush.msk.msrb.mxu3 %vm11840_vm1, %v5886_v9  ;;  %5699 = vmatpush.msk.msrb.mxu0 %vm12046_vm7, %v5886_v9 }
 0x454   : > { %4798 = vmatpush.msrb.mxu2 %v4695_v31  ;;  %4897 = vmatpush.msrb.mxu1 %v4896_v63  ;;  %v3834_v31 = vpop.f32.mrf.mxu3 }
 0x455   : > { %5693 = vmatpush.msk.msrb.mxu3 %vm11860_vm3, %v5886_v9  ;;  %5700 = vmatpush.msk.msrb.mxu0 %vm12084_vm12, %v5886_v9  ;;  %v3892_v39 = vpop.f32.mrf.mxu1 }
 0x456   : > { %v3811_v6 = vpop.f32.mrf.mxu2  ;;  %4801 = vmatpush.msrb.mxu2 %v4700_v35  ;;  %4902 = vmatpush.msrb.mxu1 %v4901_v22 }
 0x457   : > { %v3812_v0 = vadd.f32 %v3811_v6, %v3782_v8  ;;  %4836 = vmatmul.f32.vlgmr.msrb.gmra.mxu3 %v10728_v18  ;;  %5701 = vmatpush.msk.msrb.mxu0 %vm12105_vm9, %v5886_v9 }
 0x458   : > { %5702 = vmatpush.msk.msra.mxu3 %vm11938_vm11, %v5886_v9  ;;  %4804 = vmatpush.msrb.mxu2 %v4705_v61 }
 0x459   : > { %v3835_v41 = vadd.f32 %v3834_v31, %v3812_v0  ;;  %4907 = vmatpush.msrb.mxu1 %v4906_v10  ;;  %4861 = vmatmul.f32.vlgmr.msrb.gmra.mxu0 %v10795_v60 }
 0x45a   : > { %5703 = vmatpush.msk.msra.mxu3 %vm13394_vm14, %v5886_v9  ;;  %4981 = vmatpush.msra.mxu0 %v4874_v26 }
 0x45b   : > { %v3872_v35 = vadd.f32 %v3871_v44, %v3835_v41  ;;  %4807 = vmatpush.msrb.mxu2 %v4710_v15  ;;  %4912 = vmatpush.msrb.mxu1 %v4911_v53  ;;  %v4000_v15 = vpop.f32.mrf.mxu0 }
 0x45c   : > { %4914 = vmatmul.f32.vlgmr.msrb.gmra.mxu1 %v10728_v18  ;;  %5704 = vmatpush.msk.msra.mxu3 %vm11984_vm0, %v5886_v9 }
 0x45d   : > { %v3893_v60 = vadd.f32 %v3892_v39, %v3872_v35  ;;  %4984 = vmatpush.msra.mxu0 %v4879_v49  ;;  %5710 = vmatpush.msk.msra.mxu1 %vm11938_vm11, %v5886_v9  ;;  %v4023_v45 = vpop.f32.mrf.mxu1 }
 0x45e   : > { %4810 = vmatpush.msrb.mxu2 %v4715_v30  ;;  %5705 = vmatpush.msk.msra.mxu3 %vm13395_vm6, %v5886_v9 }
 0x45f   : > { %v5030_v61 = vmul.f32 %v5779_v1, %v3893_v60  ;;  %4987 = vmatpush.msra.mxu0 %v4884_v13  ;;  %5711 = vmatpush.msk.msra.mxu1 %vm13394_vm14, %v5886_v9 }
 0x460   : > { %4813 = vmatpush.msrb.mxu2 %v4720_v29  ;;  %5706 = vmatpush.msk.msra.mxu3 %vm12026_vm15, %v5886_v9 }
 0x461   : > { %5038 = vst [vmem:[%s12200_s6 + $0x8] sm:$0xff] %v5030_v61  ;;  %4815 = vmatmul.f32.vlgmr.msrb.gmra.mxu2 %v10728_v18  ;;  %4990 = vmatpush.msra.mxu0 %v4889_v51  ;;  %v5784_v61 = vld [vmem:[%s5999_s30 + $0x30] sm:$0xff] }
 0x462   : > { %4927 = vmatpush.msra.mxu2 %v11992_v54  ;;  %5712 = vmatpush.msk.msra.mxu1 %vm11984_vm0, %v5886_v9 }
 0x463   : > { %5707 = vmatpush.msk.msra.mxu3 %vm12046_vm7, %v5886_v9  ;;  %4993 = vmatpush.msra.mxu0 %v4894_v46 }
 0x464   : > { %4929 = vmatpush.msra.mxu2 %v12011_v23  ;;  %5713 = vmatpush.msk.msra.mxu1 %vm13395_vm6, %v5886_v9 }
 0x465   : > { %5708 = vmatpush.msk.msra.mxu3 %vm12084_vm12, %v5886_v9  ;;  %4996 = vmatpush.msra.mxu0 %v4899_v50 }
 0x466   : > { %4931 = vmatpush.msra.mxu2 %v12041_v58  ;;  %5714 = vmatpush.msk.msra.mxu1 %vm12026_vm15, %v5886_v9  ;;  %v3917_v62 = vpop.f32.mrf.mxu2 }
 0x467   : > { %5709 = vmatpush.msk.msra.mxu3 %vm12105_vm9, %v5886_v9  ;;  %4999 = vmatpush.msra.mxu0 %v4904_v40 }
 0x468   : > { %4933 = vmatpush.msra.mxu2 %v12065_v19  ;;  %5715 = vmatpush.msk.msra.mxu1 %vm12046_vm7, %v5886_v9 }
 0x469   : > { %4967 = vmatmul.f32.vlgmr.msra.gmra.mxu3 %v10763_v56  ;;  %5002 = vmatpush.msra.mxu0 %v4909_v37  ;;  %v3970_v56 = vpop.f32.mrf.mxu3 }
 0x46a   : > { %4935 = vmatpush.msra.mxu2 %v12095_v33  ;;  %5716 = vmatpush.msk.msra.mxu1 %vm12084_vm12, %v5886_v9  ;;  %v3971_v38 = vadd.f32 %v3970_v56, %v3917_v62  ;;  %v4106_v23 = vpop.f32.mrf.mxu0 }
 0x46b   : > { %5004 = vmatmul.f32.vlgmr.msra.gmra.mxu0 %v10728_v18 }
 0x46c   : > { %4937 = vmatpush.msra.mxu2 %v12116_v28  ;;  %5717 = vmatpush.msk.msra.mxu1 %vm12105_vm9, %v5886_v9  ;;  %v4001_v30 = vadd.f32 %v4000_v15, %v3971_v38 }
 0x46d   : > { %5025 = vmatmul.f32.vlgmr.msra.gmra.mxu1 %v10728_v18  ;;  %v4159_v21 = vpop.f32.mrf.mxu1 }
 0x46e   : > { %4939 = vmatpush.msra.mxu2 %v12144_v7  ;;  %v4024_v29 = vadd.f32 %v4023_v45, %v4001_v30  ;;  %v4160_v26 = vadd.f32 %v4159_v21, %v4106_v23 }
 0x470   : > { %4941 = vmatpush.msra.mxu2 %v12157_v20 }
 0x471   : > { %4944 = vmatmul.f32.vlgmr.msra.gmra.mxu2 %v10742_v42  ;;  %v4081_v9 = vpop.f32.mrf.mxu3 }
 0x478   : > { %v4060_v52 = vpop.f32.mrf.mxu2 }
 0x479   : > { %v4061_v32 = vadd.f32 %v4060_v52, %v4024_v29 }
 0x47b   : > { %v4082_v54 = vadd.f32 %v4081_v9, %v4061_v32 }
 0x47c   : > { %v4249_v19 = vpop.f32.mrf.mxu0 }
 0x47d   : > { %v5031_v18 = vmul.f32 %v5780_v2, %v4082_v54 }
 0x47f   : > { %5039 = vst [vmem:[%s12200_s6 + $0x10] sm:$0xff] %v5031_v18  ;;  %v4270_v13 = vpop.f32.mrf.mxu1  ;;  %v5785_v18 = vld [vmem:[%s5999_s30 + $0x38] sm:$0xff] }
 0x480   : > { %v4212_v49 = vpop.f32.mrf.mxu3 }
 0x48a   : > { %v4189_v58 = vpop.f32.mrf.mxu2 }
 0x48b   : > { %v4190_v24 = vadd.f32 %v4189_v58, %v4160_v26 }
 0x48d   : > { %v4213_v42 = vadd.f32 %v4212_v49, %v4190_v24 }
 0x48e   : > { %v4378_v48 = vpop.f32.mrf.mxu0 }
 0x48f   : > { %v4250_v59 = vadd.f32 %v4249_v19, %v4213_v42 }
 0x491   : > { %v4271_v33 = vadd.f32 %v4270_v13, %v4250_v59  ;;  %v4401_v50 = vpop.f32.mrf.mxu1 }
 0x492   : > { %v4348_v46 = vpop.f32.mrf.mxu3 }
 0x493   : > { %v5032_v51 = vmul.f32 %v5781_v11, %v4271_v33 }
 0x495   : > { %5040 = vst [vmem:[%s12200_s6 + $0x18] sm:$0xff] %v5032_v51 }
 0x49c   : > { %v4295_v28 = vpop.f32.mrf.mxu2 }
 0x49d   : > { %v4349_v7 = vadd.f32 %v4348_v46, %v4295_v28 }
 0x49f   : > { %v4379_v12 = vadd.f32 %v4378_v48, %v4349_v7 }
 0x4a0   : > { %v4484_v16 = vpop.f32.mrf.mxu0 }
 0x4a1   : > { %v4402_v17 = vadd.f32 %v4401_v50, %v4379_v12 }
 0x4a3   : > { %v4537_v27 = vpop.f32.mrf.mxu1 }
 0x4a4   : > { %v4459_v14 = vpop.f32.mrf.mxu3  ;;  %v4538_v43 = vadd.f32 %v4537_v27, %v4484_v16 }
 0x4ae   : > { %v4438_v20 = vpop.f32.mrf.mxu2 }
 0x4af   : > { %v4439_v55 = vadd.f32 %v4438_v20, %v4402_v17 }
 0x4b1   : > { %v4460_v3 = vadd.f32 %v4459_v14, %v4439_v55 }
 0x4b2   : > { %v4627_v63 = vpop.f32.mrf.mxu0 }
 0x4b3   : > { %v5033_v40 = vmul.f32 %v5782_v57, %v4460_v3 }
 0x4b5   : > { %5041 = vst [vmem:[%s12200_s6 + $0x20] sm:$0xff] %v5033_v40  ;;  %v4648_v36 = vpop.f32.mrf.mxu1 }
 0x4b6   : > { %v4590_v34 = vpop.f32.mrf.mxu3 }
 0x4c0   : > { %v4567_v47 = vpop.f32.mrf.mxu2 }
 0x4c1   : > { %v4568_v37 = vadd.f32 %v4567_v47, %v4538_v43 }
 0x4c3   : > { %v4591_v4 = vadd.f32 %v4590_v34, %v4568_v37 }
 0x4c4   : > { %v4756_v53 = vpop.f32.mrf.mxu0 }
 0x4c5   : > { %v4628_v5 = vadd.f32 %v4627_v63, %v4591_v4 }
 0x4c7   : > { %v4649_v22 = vadd.f32 %v4648_v36, %v4628_v5  ;;  %v4779_v41 = vpop.f32.mrf.mxu1 }
 0x4c8   : > { %v4726_v6 = vpop.f32.mrf.mxu3 }
 0x4c9   : > { %v5034_v8 = vmul.f32 %v5783_v25, %v4649_v22 }
 0x4cb   : > { %5042 = vst [vmem:[%s12200_s6 + $0x28] sm:$0xff] %v5034_v8 }
 0x4d2   : > { %v4673_v10 = vpop.f32.mrf.mxu2 }
 0x4d3   : > { %v4727_v0 = vadd.f32 %v4726_v6, %v4673_v10 }
 0x4d5   : > { %v4757_v31 = vadd.f32 %v4756_v53, %v4727_v0 }
 0x4d6   : > { %v4862_v56 = vpop.f32.mrf.mxu0 }
 0x4d7   : > { %v4780_v44 = vadd.f32 %v4779_v41, %v4757_v31 }
 0x4d9   : > { %v4915_v38 = vpop.f32.mrf.mxu1 }
 0x4da   : > { %v4837_v60 = vpop.f32.mrf.mxu3  ;;  %v4916_v15 = vadd.f32 %v4915_v38, %v4862_v56 }
 0x4e4   : > { %v4816_v35 = vpop.f32.mrf.mxu2 }
 0x4e5   : > { %v4817_v39 = vadd.f32 %v4816_v35, %v4780_v44 }
 0x4e7   : > { %v4838_v1 = vadd.f32 %v4837_v60, %v4817_v39 }
 0x4e8   : > { %v5005_v32 = vpop.f32.mrf.mxu0 }
 0x4e9   : > { %v5035_v62 = vmul.f32 %v5784_v61, %v4838_v1 }
 0x4ea   : > { %v5026_v54 = vpop.f32.mrf.mxu1 }
 0x4eb   : > { %5043 = vst [vmem:[%s12200_s6 + $0x30] sm:$0xff] %v5035_v62 }
 0x4ec   : > { %v4968_v29 = vpop.f32.mrf.mxu3 }
 0x4f4   : > { %v4945_v30 = vpop.f32.mrf.mxu2 }
 0x4f5   : > { %v4946_v45 = vadd.f32 %v4945_v30, %v4916_v15 }
 0x4f7   : > { %v4969_v52 = vadd.f32 %v4968_v29, %v4946_v45 }
 0x4f9   : > { %v5006_v9 = vadd.f32 %v5005_v32, %v4969_v52 }
 0x4fb   : > { %v5027_v2 = vadd.f32 %v5026_v54, %v5006_v9 }
 0x4fd   : > { %v5036_v23 = vmul.f32 %v5785_v18, %v5027_v2 }
 0x4ff   : > { %5044 = vst [vmem:[%s12200_s6 + $0x38] sm:$0xff] %v5036_v23 }
 0x500   : > { %5843 = shalt.err (!%p5840_p4)
}
 0x501   : > { %5727 = dma.vmem_to_hbm [thread:$0]  (%p5957_p11), %s5060_s10, 1024, %s5062_s11, %s5046_s16  }
 0x502 PF: > { %s5073_s26 = sand.u32 1, %s5870_s12   ;;  %p13396_p7 = scmp.ge.s32.totalorder %s5882_s15, 2 }
 0x503   : > { %s5074_s30 = scalar_lea.sflag [#allocation4], %s5073_s26 }
 0x504   : > { %p5734_p5 = pnand %p13396_p7, %p5961_p12 }
 0x506   : > { %p5735_p8 = pneg %p5734_p5 }
 0x508   : > { %5865 = dma.done.wait (%p5735_p8), %s5074_s30, 1024  }
 0x509   : > { %5867 = vsyncadd (%p5735_p8), %s5074_s30, 4294966272  ;;  %p16_p10 = scmp.ge.s32.totalorder %s5932_s18, 4   ;;  %s13397_s12 = smov %s5874_s13 }
 0x50a   : > { %s13398_s13 = smov %s5878_s14  ;;  %s13399_s14 = smov %s5944_s21 }
 0x50b   : > { %s13400_s15 = smov %s5932_s18  ;;  %18 = sbr.rel (!%p16_p10) target bundleno = 5 (0x5), region = 77 }
 0x510   :  { %5080 = vsyncpa [#allocation3], 1 }
 0x511   :  { %5082 = vsyncpa [#allocation3 + $0x1], 1 }
 0x512   :  { %5083 = vsyncpa [#allocation4], 1 }
 0x513   :  { %5085 = vsyncpa [#allocation4 + $0x1], 1 }

</bundles_post_ra>
